<compile_context>
chip_gen: v7x
topology: tpu7x:2x2x1
jax: 0.10.0
libtpu: 0.0.40
codegen_flags: <defaults>
</compile_context>

<pallas_src>
import functools

import jax
import jax.numpy as jnp
import numpy as np
from jax.experimental import pallas as pl
from jax.experimental.pallas import tpu as pltpu


def _round_up(x, m):
    return (x + m - 1) // m * m


def _choose_row_block(m):
    """Row-block size for the encoder/projection kernel (m is a multiple of 16)."""
    if m <= 1024:
        return m
    for tm in (1024, 512, 256, 128, 64, 32, 16):
        if m % tm == 0:
            return tm
    return m


# ----------------------------------------------------------------------------
# Fused stand-in encoder + hoisted LSTM input projection.
#   x2d (M, F) bf16 -> gates_x (M, 4*Ep) f32
# ----------------------------------------------------------------------------
def _encode_project_kernel(x_ref, wenc_ref, benc_ref, wih_ref, blstm_ref, gx_ref):
    # Stand-in "pretrained encoder": Linear(F->H) + GELU (tanh approx), f32 math.
    h = jnp.dot(x_ref[...], wenc_ref[...], preferred_element_type=jnp.float32)
    h = jax.nn.gelu(h + benc_ref[...], approximate=True)
    # Hoisted LSTM input projection: gates_x = hs @ W_ih^T + (b_ih + b_hh).
    gx = jnp.dot(h.astype(jnp.bfloat16), wih_ref[...],
                 preferred_element_type=jnp.float32)
    gx_ref[...] = gx + blstm_ref[...]


def _encode_and_project(x2d, w_enc, b_enc, w_ih_pad, b_lstm_pad):
    m, f = x2d.shape
    h = w_enc.shape[1]
    g = w_ih_pad.shape[1]          # 4 * Ep (lane-dense, multiple of 128)
    tm = _choose_row_block(m)
    # NOTE: weight/bias specs have constant index maps; at realistic sizes they
    # could additionally be single-buffered (pl.Buffered(1)) to halve VMEM use.
    return pl.pallas_call(
        _encode_project_kernel,
        out_shape=jax.ShapeDtypeStruct((m, g), jnp.float32),
        grid=(m // tm,),
        in_specs=[
            pl.BlockSpec((tm, f), lambda i: (i, 0)),
            pl.BlockSpec((f, h), lambda i: (0, 0)),
            pl.BlockSpec((1, h), lambda i: (0, 0)),
            pl.BlockSpec((h, g), lambda i: (0, 0)),
            pl.BlockSpec((1, g), lambda i: (0, 0)),
        ],
        out_specs=pl.BlockSpec((tm, g), lambda i: (i, 0)),
        compiler_params=pltpu.CompilerParams(
            dimension_semantics=("parallel",),
            vmem_limit_bytes=32 * 1024 * 1024,
        ),
    )(x2d, w_enc, b_enc, w_ih_pad, b_lstm_pad)


# ----------------------------------------------------------------------------
# LSTM recurrence over precomputed input-gate activations.
#   gx (T, BB, 4*Ep) f32, w_hh_pad (Ep, 4*Ep) f32, lens (BB, 1) i32 -> h (BB, Ep)
# PyTorch gate order (i, f, g, o).  Rows whose length is 0 stay exactly zero.
# ----------------------------------------------------------------------------
def _lstm_kernel(gx_ref, whh_ref, lens_ref, out_ref, *, unroll):
    t_steps, bb, _ = gx_ref.shape
    ep = whh_ref.shape[0]
    lens = lens_ref[...]                                   # (BB, 1) int32

    def step(t, carry):
        h, c = carry
        gates = gx_ref[t] + jnp.dot(h, whh_ref[...],
                                    preferred_element_type=jnp.float32)
        # Each gate slab is a full 128-lane-aligned slice (Ep = multiple of 128).
        i_g = jax.nn.sigmoid(gates[:, 0 * ep:1 * ep])
        f_g = jax.nn.sigmoid(gates[:, 1 * ep:2 * ep])
        g_g = jnp.tanh(gates[:, 2 * ep:3 * ep])
        o_g = jax.nn.sigmoid(gates[:, 3 * ep:4 * ep])
        c_new = f_g * c + i_g * g_g
        h_new = o_g * jnp.tanh(c_new)
        m = (lens > t).astype(jnp.float32)                 # (BB, 1): 0 -> frozen
        h = h + m * (h_new - h)
        c = c + m * (c_new - c)
        return h, c

    h0 = jnp.zeros((bb, ep), jnp.float32)
    c0 = jnp.zeros((bb, ep), jnp.float32)
    h_final, _ = jax.lax.fori_loop(0, t_steps, step, (h0, c0), unroll=unroll)
    out_ref[...] = h_final.astype(out_ref.dtype)


def _lstm_final_hidden(gx, w_hh_pad, lens, bb):
    t_steps, b_pad, g = gx.shape
    ep = w_hh_pad.shape[0]
    kernel = functools.partial(_lstm_kernel,
                               unroll=True if t_steps <= 32 else 8)
    return pl.pallas_call(
        kernel,
        out_shape=jax.ShapeDtypeStruct((b_pad, ep), jnp.float32),
        grid=(b_pad // bb,),                       # independent batch blocks
        in_specs=[
            pl.BlockSpec((t_steps, bb, g), lambda b: (0, b, 0)),
            pl.BlockSpec((ep, g), lambda b: (0, 0)),
            pl.BlockSpec((bb, 1), lambda b: (b, 0)),
        ],
        out_specs=pl.BlockSpec((bb, ep), lambda b: (b, 0)),
        compiler_params=pltpu.CompilerParams(
            dimension_semantics=("parallel",),     # shards across TCs on v7x
            vmem_limit_bytes=32 * 1024 * 1024,
        ),
    )(gx, w_hh_pad, lens)


# ----------------------------------------------------------------------------
# Parameters: PyTorch-equivalent layout + padded/packed device layout.
# ----------------------------------------------------------------------------
def init_params(key, feat_dim, hidden_size, embed_size):
    k = jax.random.split(key, 5)
    s = 0.1
    return {
        "w_enc": s * jax.random.normal(k[0], (feat_dim, hidden_size), jnp.float32),
        "b_enc": s * jax.random.normal(k[1], (hidden_size,), jnp.float32),
        # stored already transposed: W_ih^T (H, 4E), W_hh^T (E, 4E); gate order i,f,g,o
        "w_ih_t": s * jax.random.normal(k[2], (hidden_size, 4 * embed_size), jnp.float32),
        "w_hh_t": s * jax.random.normal(k[3], (embed_size, 4 * embed_size), jnp.float32),
        # combined bias b_ih + b_hh
        "b_lstm": s * jax.random.normal(k[4], (4 * embed_size,), jnp.float32),
    }


def _pad_gate_cols(w, e, ep):
    """(..., 4e) -> (..., 4ep): gate k's e real columns land at offset k*ep."""
    pads = [(0, 0)] * (w.ndim - 1) + [(0, ep - e)]
    parts = [jnp.pad(w[..., k * e:(k + 1) * e], pads) for k in range(4)]
    return jnp.concatenate(parts, axis=-1)


def prepare_params(params):
    """Pad E -> Ep = multiple of 128 lanes; cast projection weights to bf16."""
    e = params["w_hh_t"].shape[0]
    ep = _round_up(e, 128)
    w_ih_pad = _pad_gate_cols(params["w_ih_t"], e, ep).astype(jnp.bfloat16)
    b_lstm_pad = _pad_gate_cols(params["b_lstm"].reshape(1, -1), e, ep)
    w_hh_pad = _pad_gate_cols(jnp.pad(params["w_hh_t"], ((0, ep - e), (0, 0))), e, ep)
    return {
        "w_enc": params["w_enc"].astype(jnp.bfloat16),
        "b_enc": params["b_enc"].reshape(1, -1).astype(jnp.float32),
        "w_ih_pad": w_ih_pad,                              # (H, 4Ep) bf16
        "b_lstm_pad": b_lstm_pad.astype(jnp.float32),      # (1, 4Ep) f32
        "w_hh_pad": w_hh_pad.astype(jnp.float32),          # (Ep, 4Ep) f32
    }


# ----------------------------------------------------------------------------
# Full module forward: one batched encoder+projection call + one LSTM call.
# ----------------------------------------------------------------------------
@functools.partial(jax.jit, static_argnames=("bb",))
def _forward_core(x_tm, lens, w_enc, b_enc, w_ih_pad, b_lstm_pad, w_hh_pad, bb):
    t_max, b_pad, f = x_tm.shape
    g = w_hh_pad.shape[1]                                   # 4 * Ep
    gx = _encode_and_project(x_tm.reshape(t_max * b_pad, f),
                             w_enc, b_enc, w_ih_pad, b_lstm_pad)
    gx = gx.reshape(t_max, b_pad, g)                        # already time-major
    return _lstm_final_hidden(gx, w_hh_pad, lens, bb)       # (B_pad, Ep)


def pretrained_audio_embedding_forward(audios, params):
    """audios: list of (B_i, T_i, F) feature batches -> (N, B_max, E)."""
    prep = prepare_params(params)
    e = params["w_hh_t"].shape[0]
    n = len(audios)
    b_max = max(a.shape[0] for a in audios)
    t_max = max(a.shape[1] for a in audios)
    rows = n * b_max
    if rows <= 64:
        b_pad, bb = _round_up(rows, 16), _round_up(rows, 16)
    else:
        b_pad, bb = _round_up(rows, 64), 64

    # Pack all audios into one zero-padded, TIME-MAJOR slab + per-row lengths.
    # Rows for b >= B_i (and rows >= N*B_max) get length 0 so their final hidden
    # state is exactly zero, matching pad_sequence's zero padding.
    x_tm = jnp.zeros((t_max, b_pad, audios[0].shape[-1]), jnp.bfloat16)
    lens_np = np.zeros((b_pad, 1), np.int32)
    for i, a in enumerate(audios):
        b_i, t_i = a.shape[0], a.shape[1]
        x_tm = x_tm.at[:t_i, i * b_max:i * b_max + b_i, :].set(
            jnp.transpose(a, (1, 0, 2)).astype(jnp.bfloat16))
        lens_np[i * b_max:i * b_max + b_i, 0] = t_i
    lens = jnp.asarray(lens_np)

    h = _forward_core(x_tm, lens, prep["w_enc"], prep["b_enc"],
                      prep["w_ih_pad"], prep["b_lstm_pad"], prep["w_hh_pad"],
                      bb=bb)                                # (B_pad, Ep)
    return h[:rows, :e].reshape(n, b_max, e)


# ----------------------------------------------------------------------------
# Pure-JAX reference (same dtype choices) for a correctness check.
# ----------------------------------------------------------------------------
def _reference_forward(audios, params):
    w_enc, b_enc = params["w_enc"], params["b_enc"]
    w_ih_t, w_hh_t, b = params["w_ih_t"], params["w_hh_t"], params["b_lstm"]
    e = w_hh_t.shape[0]
    embeds = []
    for a in audios:
        hs = jax.nn.gelu(
            jnp.dot(a.astype(jnp.bfloat16), w_enc.astype(jnp.bfloat16),
                    preferred_element_type=jnp.float32) + b_enc,
            approximate=True)
        gx = jnp.dot(hs.astype(jnp.bfloat16), w_ih_t.astype(jnp.bfloat16),
                     preferred_element_type=jnp.float32) + b
        bsz, t_len = a.shape[0], a.shape[1]
        h = jnp.zeros((bsz, e), jnp.float32)
        c = jnp.zeros((bsz, e), jnp.float32)
        for t in range(t_len):
            g = gx[:, t, :] + jnp.dot(h, w_hh_t, preferred_element_type=jnp.float32)
            i_g = jax.nn.sigmoid(g[:, :e])
            f_g = jax.nn.sigmoid(g[:, e:2 * e])
            g_g = jnp.tanh(g[:, 2 * e:3 * e])
            o_g = jax.nn.sigmoid(g[:, 3 * e:])
            c = f_g * c + i_g * g_g
            h = o_g * jnp.tanh(c)
        embeds.append(h)
    n = len(embeds)
    b_max = max(x.shape[0] for x in embeds)
    out = jnp.zeros((n, b_max, e), jnp.float32)
    for i, x in enumerate(embeds):
        out = out.at[i, :x.shape[0]].set(x)
    return out


if __name__ == "__main__":
    key = jax.random.PRNGKey(0)
    F = 16   # raw feature dim fed to the (stand-in) pretrained encoder
    H = 32   # pretrained model hidden_size
    E = 32   # embed_size

    keys = jax.random.split(key, 8)
    # list of "BatchFeature"s with variable batch and sequence lengths
    shapes = [(2, 8, F), (3, 6, F), (1, 10, F)]
    audios = [jax.random.normal(keys[i], s, jnp.float32) for i, s in enumerate(shapes)]

    params = init_params(keys[7], F, H, E)

    out = pretrained_audio_embedding_forward(audios, params)
    jax.block_until_ready(out)
    assert out.shape == (3, 3, E) and out.dtype == jnp.float32

    ref = _reference_forward(audios, params)
    jax.block_until_ready(ref)
    assert float(jnp.max(jnp.abs(out - ref))) < 1e-2, "mismatch vs pure-JAX reference"

    print("KERNEL_OK")
</pallas_src>

<mosaic_0001>
module attributes {stable_mosaic.version = 11 : i64} {
  func.func @_lstm_kernel(%arg0: i32, %arg1: memref<10x16x512xf32, #tpu.memory_space<vmem>>, %arg2: memref<128x512xf32, #tpu.memory_space<vmem>>, %arg3: memref<16x1xi32, #tpu.memory_space<vmem>>, %arg4: memref<16x128xf32, #tpu.memory_space<vmem>>) attributes {dimension_semantics = [#tpu.dimension_semantics<parallel>], iteration_bounds = array<i64: 1>, scalar_prefetch = 0 : i64, scratch_operands = 0 : i64, tpu.core_type = #tpu.core_type<tc>, window_params = [{transform_indices = @transform_0, window_bounds = array<i64: 10, 16, 512>}, {pipeline_mode = #tpu.pipeline_mode<synchronous>, transform_indices = @transform_1, window_bounds = array<i64: 128, 512>}, {transform_indices = @transform_2, window_bounds = array<i64: 16, 1>}, {transform_indices = @transform_3, window_bounds = array<i64: 16, 128>}]} {
    %c0 = arith.constant 0 : index
    %c0_0 = arith.constant 0 : index
    %0 = vector.load %arg3[%c0, %c0_0] : memref<16x1xi32, #tpu.memory_space<vmem>>, vector<16x1xi32>
    %cst = arith.constant 0.000000e+00 : f32
    %1 = vector.broadcast %cst : f32 to vector<16x128xf32>
    %cst_1 = arith.constant 0.000000e+00 : f32
    %2 = vector.broadcast %cst_1 : f32 to vector<16x128xf32>
    %c0_i32 = arith.constant 0 : i32
    %3 = arith.index_cast %c0_i32 : i32 to index
    %c0_2 = arith.constant 0 : index
    %c0_3 = arith.constant 0 : index
    %4 = vector.load %arg1[%3, %c0_2, %c0_3] : memref<10x16x512xf32, #tpu.memory_space<vmem>>, vector<1x16x512xf32>
    %5 = vector.shape_cast %4 : vector<1x16x512xf32> to vector<16x512xf32>
    %c0_4 = arith.constant 0 : index
    %c0_5 = arith.constant 0 : index
    %6 = vector.load %arg2[%c0_4, %c0_5] : memref<128x512xf32, #tpu.memory_space<vmem>>, vector<128x512xf32>
    %cst_6 = arith.constant dense<0.000000e+00> : vector<16x512xf32>
    %7 = tpu.matmul %1, %6, %cst_6 {dimension_numbers = #tpu.dot_dimension_numbers<[1], [0], [0], [1], [0, 0, 1, 1], [], []>} : vector<16x128xf32>, vector<128x512xf32>, vector<16x512xf32> -> vector<16x512xf32>
    %8 = arith.addf %5, %7 : vector<16x512xf32>
    %9 = vector.extract_strided_slice %8 {offsets = [0, 0], sizes = [16, 128], strides = [1, 1]} : vector<16x512xf32> to vector<16x128xf32>
    %10 = arith.negf %9 : vector<16x128xf32>
    %11 = math.exp %10 : vector<16x128xf32>
    %cst_7 = arith.constant 1.000000e+00 : f32
    %12 = vector.broadcast %cst_7 : f32 to vector<16x128xf32>
    %13 = arith.addf %12, %11 : vector<16x128xf32>
    %14 = arith.divf %12, %13 : vector<16x128xf32>
    %15 = vector.extract_strided_slice %8 {offsets = [0, 128], sizes = [16, 128], strides = [1, 1]} : vector<16x512xf32> to vector<16x128xf32>
    %16 = arith.negf %15 : vector<16x128xf32>
    %17 = math.exp %16 : vector<16x128xf32>
    %cst_8 = arith.constant 1.000000e+00 : f32
    %18 = vector.broadcast %cst_8 : f32 to vector<16x128xf32>
    %19 = arith.addf %18, %17 : vector<16x128xf32>
    %20 = arith.divf %18, %19 : vector<16x128xf32>
    %21 = vector.extract_strided_slice %8 {offsets = [0, 256], sizes = [16, 128], strides = [1, 1]} : vector<16x512xf32> to vector<16x128xf32>
    %22 = math.tanh %21 : vector<16x128xf32>
    %23 = vector.extract_strided_slice %8 {offsets = [0, 384], sizes = [16, 128], strides = [1, 1]} : vector<16x512xf32> to vector<16x128xf32>
    %24 = arith.negf %23 : vector<16x128xf32>
    %25 = math.exp %24 : vector<16x128xf32>
    %cst_9 = arith.constant 1.000000e+00 : f32
    %26 = vector.broadcast %cst_9 : f32 to vector<16x128xf32>
    %27 = arith.addf %26, %25 : vector<16x128xf32>
    %28 = arith.divf %26, %27 : vector<16x128xf32>
    %29 = arith.mulf %20, %2 : vector<16x128xf32>
    %30 = arith.mulf %14, %22 : vector<16x128xf32>
    %31 = arith.addf %29, %30 : vector<16x128xf32>
    %32 = math.tanh %31 : vector<16x128xf32>
    %33 = arith.mulf %28, %32 : vector<16x128xf32>
    %34 = vector.broadcast %c0_i32 : i32 to vector<16x1xi32>
    %35 = arith.cmpi sgt, %0, %34 : vector<16x1xi32>
    %36 = arith.extui %35 : vector<16x1xi1> to vector<16x1xi32>
    %37 = arith.sitofp %36 : vector<16x1xi32> to vector<16x1xf32>
    %38 = arith.subf %33, %1 : vector<16x128xf32>
    %39 = vector.broadcast %37 : vector<16x1xf32> to vector<16x128xf32>
    %40 = arith.mulf %39, %38 : vector<16x128xf32>
    %41 = arith.addf %1, %40 : vector<16x128xf32>
    %42 = arith.subf %31, %2 : vector<16x128xf32>
    %43 = vector.broadcast %37 : vector<16x1xf32> to vector<16x128xf32>
    %44 = arith.mulf %43, %42 : vector<16x128xf32>
    %45 = arith.addf %2, %44 : vector<16x128xf32>
    %c1_i32 = arith.constant 1 : i32
    %46 = arith.index_cast %c1_i32 : i32 to index
    %c0_10 = arith.constant 0 : index
    %c0_11 = arith.constant 0 : index
    %47 = vector.load %arg1[%46, %c0_10, %c0_11] : memref<10x16x512xf32, #tpu.memory_space<vmem>>, vector<1x16x512xf32>
    %48 = vector.shape_cast %47 : vector<1x16x512xf32> to vector<16x512xf32>
    %c0_12 = arith.constant 0 : index
    %c0_13 = arith.constant 0 : index
    %49 = vector.load %arg2[%c0_12, %c0_13] : memref<128x512xf32, #tpu.memory_space<vmem>>, vector<128x512xf32>
    %cst_14 = arith.constant dense<0.000000e+00> : vector<16x512xf32>
    %50 = tpu.matmul %41, %49, %cst_14 {dimension_numbers = #tpu.dot_dimension_numbers<[1], [0], [0], [1], [0, 0, 1, 1], [], []>} : vector<16x128xf32>, vector<128x512xf32>, vector<16x512xf32> -> vector<16x512xf32>
    %51 = arith.addf %48, %50 : vector<16x512xf32>
    %52 = vector.extract_strided_slice %51 {offsets = [0, 0], sizes = [16, 128], strides = [1, 1]} : vector<16x512xf32> to vector<16x128xf32>
    %53 = arith.negf %52 : vector<16x128xf32>
    %54 = math.exp %53 : vector<16x128xf32>
    %cst_15 = arith.constant 1.000000e+00 : f32
    %55 = vector.broadcast %cst_15 : f32 to vector<16x128xf32>
    %56 = arith.addf %55, %54 : vector<16x128xf32>
    %57 = arith.divf %55, %56 : vector<16x128xf32>
    %58 = vector.extract_strided_slice %51 {offsets = [0, 128], sizes = [16, 128], strides = [1, 1]} : vector<16x512xf32> to vector<16x128xf32>
    %59 = arith.negf %58 : vector<16x128xf32>
    %60 = math.exp %59 : vector<16x128xf32>
    %cst_16 = arith.constant 1.000000e+00 : f32
    %61 = vector.broadcast %cst_16 : f32 to vector<16x128xf32>
    %62 = arith.addf %61, %60 : vector<16x128xf32>
    %63 = arith.divf %61, %62 : vector<16x128xf32>
    %64 = vector.extract_strided_slice %51 {offsets = [0, 256], sizes = [16, 128], strides = [1, 1]} : vector<16x512xf32> to vector<16x128xf32>
    %65 = math.tanh %64 : vector<16x128xf32>
    %66 = vector.extract_strided_slice %51 {offsets = [0, 384], sizes = [16, 128], strides = [1, 1]} : vector<16x512xf32> to vector<16x128xf32>
    %67 = arith.negf %66 : vector<16x128xf32>
    %68 = math.exp %67 : vector<16x128xf32>
    %cst_17 = arith.constant 1.000000e+00 : f32
    %69 = vector.broadcast %cst_17 : f32 to vector<16x128xf32>
    %70 = arith.addf %69, %68 : vector<16x128xf32>
    %71 = arith.divf %69, %70 : vector<16x128xf32>
    %72 = arith.mulf %63, %45 : vector<16x128xf32>
    %73 = arith.mulf %57, %65 : vector<16x128xf32>
    %74 = arith.addf %72, %73 : vector<16x128xf32>
    %75 = math.tanh %74 : vector<16x128xf32>
    %76 = arith.mulf %71, %75 : vector<16x128xf32>
    %77 = vector.broadcast %c1_i32 : i32 to vector<16x1xi32>
    %78 = arith.cmpi sgt, %0, %77 : vector<16x1xi32>
    %79 = arith.extui %78 : vector<16x1xi1> to vector<16x1xi32>
    %80 = arith.sitofp %79 : vector<16x1xi32> to vector<16x1xf32>
    %81 = arith.subf %76, %41 : vector<16x128xf32>
    %82 = vector.broadcast %80 : vector<16x1xf32> to vector<16x128xf32>
    %83 = arith.mulf %82, %81 : vector<16x128xf32>
    %84 = arith.addf %41, %83 : vector<16x128xf32>
    %85 = arith.subf %74, %45 : vector<16x128xf32>
    %86 = vector.broadcast %80 : vector<16x1xf32> to vector<16x128xf32>
    %87 = arith.mulf %86, %85 : vector<16x128xf32>
    %88 = arith.addf %45, %87 : vector<16x128xf32>
    %c2_i32 = arith.constant 2 : i32
    %89 = arith.index_cast %c2_i32 : i32 to index
    %c0_18 = arith.constant 0 : index
    %c0_19 = arith.constant 0 : index
    %90 = vector.load %arg1[%89, %c0_18, %c0_19] : memref<10x16x512xf32, #tpu.memory_space<vmem>>, vector<1x16x512xf32>
    %91 = vector.shape_cast %90 : vector<1x16x512xf32> to vector<16x512xf32>
    %c0_20 = arith.constant 0 : index
    %c0_21 = arith.constant 0 : index
    %92 = vector.load %arg2[%c0_20, %c0_21] : memref<128x512xf32, #tpu.memory_space<vmem>>, vector<128x512xf32>
    %cst_22 = arith.constant dense<0.000000e+00> : vector<16x512xf32>
    %93 = tpu.matmul %84, %92, %cst_22 {dimension_numbers = #tpu.dot_dimension_numbers<[1], [0], [0], [1], [0, 0, 1, 1], [], []>} : vector<16x128xf32>, vector<128x512xf32>, vector<16x512xf32> -> vector<16x512xf32>
    %94 = arith.addf %91, %93 : vector<16x512xf32>
    %95 = vector.extract_strided_slice %94 {offsets = [0, 0], sizes = [16, 128], strides = [1, 1]} : vector<16x512xf32> to vector<16x128xf32>
    %96 = arith.negf %95 : vector<16x128xf32>
    %97 = math.exp %96 : vector<16x128xf32>
    %cst_23 = arith.constant 1.000000e+00 : f32
    %98 = vector.broadcast %cst_23 : f32 to vector<16x128xf32>
    %99 = arith.addf %98, %97 : vector<16x128xf32>
    %100 = arith.divf %98, %99 : vector<16x128xf32>
    %101 = vector.extract_strided_slice %94 {offsets = [0, 128], sizes = [16, 128], strides = [1, 1]} : vector<16x512xf32> to vector<16x128xf32>
    %102 = arith.negf %101 : vector<16x128xf32>
    %103 = math.exp %102 : vector<16x128xf32>
    %cst_24 = arith.constant 1.000000e+00 : f32
    %104 = vector.broadcast %cst_24 : f32 to vector<16x128xf32>
    %105 = arith.addf %104, %103 : vector<16x128xf32>
    %106 = arith.divf %104, %105 : vector<16x128xf32>
    %107 = vector.extract_strided_slice %94 {offsets = [0, 256], sizes = [16, 128], strides = [1, 1]} : vector<16x512xf32> to vector<16x128xf32>
    %108 = math.tanh %107 : vector<16x128xf32>
    %109 = vector.extract_strided_slice %94 {offsets = [0, 384], sizes = [16, 128], strides = [1, 1]} : vector<16x512xf32> to vector<16x128xf32>
    %110 = arith.negf %109 : vector<16x128xf32>
    %111 = math.exp %110 : vector<16x128xf32>
    %cst_25 = arith.constant 1.000000e+00 : f32
    %112 = vector.broadcast %cst_25 : f32 to vector<16x128xf32>
    %113 = arith.addf %112, %111 : vector<16x128xf32>
    %114 = arith.divf %112, %113 : vector<16x128xf32>
    %115 = arith.mulf %106, %88 : vector<16x128xf32>
    %116 = arith.mulf %100, %108 : vector<16x128xf32>
    %117 = arith.addf %115, %116 : vector<16x128xf32>
    %118 = math.tanh %117 : vector<16x128xf32>
    %119 = arith.mulf %114, %118 : vector<16x128xf32>
    %120 = vector.broadcast %c2_i32 : i32 to vector<16x1xi32>
    %121 = arith.cmpi sgt, %0, %120 : vector<16x1xi32>
    %122 = arith.extui %121 : vector<16x1xi1> to vector<16x1xi32>
    %123 = arith.sitofp %122 : vector<16x1xi32> to vector<16x1xf32>
    %124 = arith.subf %119, %84 : vector<16x128xf32>
    %125 = vector.broadcast %123 : vector<16x1xf32> to vector<16x128xf32>
    %126 = arith.mulf %125, %124 : vector<16x128xf32>
    %127 = arith.addf %84, %126 : vector<16x128xf32>
    %128 = arith.subf %117, %88 : vector<16x128xf32>
    %129 = vector.broadcast %123 : vector<16x1xf32> to vector<16x128xf32>
    %130 = arith.mulf %129, %128 : vector<16x128xf32>
    %131 = arith.addf %88, %130 : vector<16x128xf32>
    %c3_i32 = arith.constant 3 : i32
    %132 = arith.index_cast %c3_i32 : i32 to index
    %c0_26 = arith.constant 0 : index
    %c0_27 = arith.constant 0 : index
    %133 = vector.load %arg1[%132, %c0_26, %c0_27] : memref<10x16x512xf32, #tpu.memory_space<vmem>>, vector<1x16x512xf32>
    %134 = vector.shape_cast %133 : vector<1x16x512xf32> to vector<16x512xf32>
    %c0_28 = arith.constant 0 : index
    %c0_29 = arith.constant 0 : index
    %135 = vector.load %arg2[%c0_28, %c0_29] : memref<128x512xf32, #tpu.memory_space<vmem>>, vector<128x512xf32>
    %cst_30 = arith.constant dense<0.000000e+00> : vector<16x512xf32>
    %136 = tpu.matmul %127, %135, %cst_30 {dimension_numbers = #tpu.dot_dimension_numbers<[1], [0], [0], [1], [0, 0, 1, 1], [], []>} : vector<16x128xf32>, vector<128x512xf32>, vector<16x512xf32> -> vector<16x512xf32>
    %137 = arith.addf %134, %136 : vector<16x512xf32>
    %138 = vector.extract_strided_slice %137 {offsets = [0, 0], sizes = [16, 128], strides = [1, 1]} : vector<16x512xf32> to vector<16x128xf32>
    %139 = arith.negf %138 : vector<16x128xf32>
    %140 = math.exp %139 : vector<16x128xf32>
    %cst_31 = arith.constant 1.000000e+00 : f32
    %141 = vector.broadcast %cst_31 : f32 to vector<16x128xf32>
    %142 = arith.addf %141, %140 : vector<16x128xf32>
    %143 = arith.divf %141, %142 : vector<16x128xf32>
    %144 = vector.extract_strided_slice %137 {offsets = [0, 128], sizes = [16, 128], strides = [1, 1]} : vector<16x512xf32> to vector<16x128xf32>
    %145 = arith.negf %144 : vector<16x128xf32>
    %146 = math.exp %145 : vector<16x128xf32>
    %cst_32 = arith.constant 1.000000e+00 : f32
    %147 = vector.broadcast %cst_32 : f32 to vector<16x128xf32>
    %148 = arith.addf %147, %146 : vector<16x128xf32>
    %149 = arith.divf %147, %148 : vector<16x128xf32>
    %150 = vector.extract_strided_slice %137 {offsets = [0, 256], sizes = [16, 128], strides = [1, 1]} : vector<16x512xf32> to vector<16x128xf32>
    %151 = math.tanh %150 : vector<16x128xf32>
    %152 = vector.extract_strided_slice %137 {offsets = [0, 384], sizes = [16, 128], strides = [1, 1]} : vector<16x512xf32> to vector<16x128xf32>
    %153 = arith.negf %152 : vector<16x128xf32>
    %154 = math.exp %153 : vector<16x128xf32>
    %cst_33 = arith.constant 1.000000e+00 : f32
    %155 = vector.broadcast %cst_33 : f32 to vector<16x128xf32>
    %156 = arith.addf %155, %154 : vector<16x128xf32>
    %157 = arith.divf %155, %156 : vector<16x128xf32>
    %158 = arith.mulf %149, %131 : vector<16x128xf32>
    %159 = arith.mulf %143, %151 : vector<16x128xf32>
    %160 = arith.addf %158, %159 : vector<16x128xf32>
    %161 = math.tanh %160 : vector<16x128xf32>
    %162 = arith.mulf %157, %161 : vector<16x128xf32>
    %163 = vector.broadcast %c3_i32 : i32 to vector<16x1xi32>
    %164 = arith.cmpi sgt, %0, %163 : vector<16x1xi32>
    %165 = arith.extui %164 : vector<16x1xi1> to vector<16x1xi32>
    %166 = arith.sitofp %165 : vector<16x1xi32> to vector<16x1xf32>
    %167 = arith.subf %162, %127 : vector<16x128xf32>
    %168 = vector.broadcast %166 : vector<16x1xf32> to vector<16x128xf32>
    %169 = arith.mulf %168, %167 : vector<16x128xf32>
    %170 = arith.addf %127, %169 : vector<16x128xf32>
    %171 = arith.subf %160, %131 : vector<16x128xf32>
    %172 = vector.broadcast %166 : vector<16x1xf32> to vector<16x128xf32>
    %173 = arith.mulf %172, %171 : vector<16x128xf32>
    %174 = arith.addf %131, %173 : vector<16x128xf32>
    %c4_i32 = arith.constant 4 : i32
    %175 = arith.index_cast %c4_i32 : i32 to index
    %c0_34 = arith.constant 0 : index
    %c0_35 = arith.constant 0 : index
    %176 = vector.load %arg1[%175, %c0_34, %c0_35] : memref<10x16x512xf32, #tpu.memory_space<vmem>>, vector<1x16x512xf32>
    %177 = vector.shape_cast %176 : vector<1x16x512xf32> to vector<16x512xf32>
    %c0_36 = arith.constant 0 : index
    %c0_37 = arith.constant 0 : index
    %178 = vector.load %arg2[%c0_36, %c0_37] : memref<128x512xf32, #tpu.memory_space<vmem>>, vector<128x512xf32>
    %cst_38 = arith.constant dense<0.000000e+00> : vector<16x512xf32>
    %179 = tpu.matmul %170, %178, %cst_38 {dimension_numbers = #tpu.dot_dimension_numbers<[1], [0], [0], [1], [0, 0, 1, 1], [], []>} : vector<16x128xf32>, vector<128x512xf32>, vector<16x512xf32> -> vector<16x512xf32>
    %180 = arith.addf %177, %179 : vector<16x512xf32>
    %181 = vector.extract_strided_slice %180 {offsets = [0, 0], sizes = [16, 128], strides = [1, 1]} : vector<16x512xf32> to vector<16x128xf32>
    %182 = arith.negf %181 : vector<16x128xf32>
    %183 = math.exp %182 : vector<16x128xf32>
    %cst_39 = arith.constant 1.000000e+00 : f32
    %184 = vector.broadcast %cst_39 : f32 to vector<16x128xf32>
    %185 = arith.addf %184, %183 : vector<16x128xf32>
    %186 = arith.divf %184, %185 : vector<16x128xf32>
    %187 = vector.extract_strided_slice %180 {offsets = [0, 128], sizes = [16, 128], strides = [1, 1]} : vector<16x512xf32> to vector<16x128xf32>
    %188 = arith.negf %187 : vector<16x128xf32>
    %189 = math.exp %188 : vector<16x128xf32>
    %cst_40 = arith.constant 1.000000e+00 : f32
    %190 = vector.broadcast %cst_40 : f32 to vector<16x128xf32>
    %191 = arith.addf %190, %189 : vector<16x128xf32>
    %192 = arith.divf %190, %191 : vector<16x128xf32>
    %193 = vector.extract_strided_slice %180 {offsets = [0, 256], sizes = [16, 128], strides = [1, 1]} : vector<16x512xf32> to vector<16x128xf32>
    %194 = math.tanh %193 : vector<16x128xf32>
    %195 = vector.extract_strided_slice %180 {offsets = [0, 384], sizes = [16, 128], strides = [1, 1]} : vector<16x512xf32> to vector<16x128xf32>
    %196 = arith.negf %195 : vector<16x128xf32>
    %197 = math.exp %196 : vector<16x128xf32>
    %cst_41 = arith.constant 1.000000e+00 : f32
    %198 = vector.broadcast %cst_41 : f32 to vector<16x128xf32>
    %199 = arith.addf %198, %197 : vector<16x128xf32>
    %200 = arith.divf %198, %199 : vector<16x128xf32>
    %201 = arith.mulf %192, %174 : vector<16x128xf32>
    %202 = arith.mulf %186, %194 : vector<16x128xf32>
    %203 = arith.addf %201, %202 : vector<16x128xf32>
    %204 = math.tanh %203 : vector<16x128xf32>
    %205 = arith.mulf %200, %204 : vector<16x128xf32>
    %206 = vector.broadcast %c4_i32 : i32 to vector<16x1xi32>
    %207 = arith.cmpi sgt, %0, %206 : vector<16x1xi32>
    %208 = arith.extui %207 : vector<16x1xi1> to vector<16x1xi32>
    %209 = arith.sitofp %208 : vector<16x1xi32> to vector<16x1xf32>
    %210 = arith.subf %205, %170 : vector<16x128xf32>
    %211 = vector.broadcast %209 : vector<16x1xf32> to vector<16x128xf32>
    %212 = arith.mulf %211, %210 : vector<16x128xf32>
    %213 = arith.addf %170, %212 : vector<16x128xf32>
    %214 = arith.subf %203, %174 : vector<16x128xf32>
    %215 = vector.broadcast %209 : vector<16x1xf32> to vector<16x128xf32>
    %216 = arith.mulf %215, %214 : vector<16x128xf32>
    %217 = arith.addf %174, %216 : vector<16x128xf32>
    %c5_i32 = arith.constant 5 : i32
    %218 = arith.index_cast %c5_i32 : i32 to index
    %c0_42 = arith.constant 0 : index
    %c0_43 = arith.constant 0 : index
    %219 = vector.load %arg1[%218, %c0_42, %c0_43] : memref<10x16x512xf32, #tpu.memory_space<vmem>>, vector<1x16x512xf32>
    %220 = vector.shape_cast %219 : vector<1x16x512xf32> to vector<16x512xf32>
    %c0_44 = arith.constant 0 : index
    %c0_45 = arith.constant 0 : index
    %221 = vector.load %arg2[%c0_44, %c0_45] : memref<128x512xf32, #tpu.memory_space<vmem>>, vector<128x512xf32>
    %cst_46 = arith.constant dense<0.000000e+00> : vector<16x512xf32>
    %222 = tpu.matmul %213, %221, %cst_46 {dimension_numbers = #tpu.dot_dimension_numbers<[1], [0], [0], [1], [0, 0, 1, 1], [], []>} : vector<16x128xf32>, vector<128x512xf32>, vector<16x512xf32> -> vector<16x512xf32>
    %223 = arith.addf %220, %222 : vector<16x512xf32>
    %224 = vector.extract_strided_slice %223 {offsets = [0, 0], sizes = [16, 128], strides = [1, 1]} : vector<16x512xf32> to vector<16x128xf32>
    %225 = arith.negf %224 : vector<16x128xf32>
    %226 = math.exp %225 : vector<16x128xf32>
    %cst_47 = arith.constant 1.000000e+00 : f32
    %227 = vector.broadcast %cst_47 : f32 to vector<16x128xf32>
    %228 = arith.addf %227, %226 : vector<16x128xf32>
    %229 = arith.divf %227, %228 : vector<16x128xf32>
    %230 = vector.extract_strided_slice %223 {offsets = [0, 128], sizes = [16, 128], strides = [1, 1]} : vector<16x512xf32> to vector<16x128xf32>
    %231 = arith.negf %230 : vector<16x128xf32>
    %232 = math.exp %231 : vector<16x128xf32>
    %cst_48 = arith.constant 1.000000e+00 : f32
    %233 = vector.broadcast %cst_48 : f32 to vector<16x128xf32>
    %234 = arith.addf %233, %232 : vector<16x128xf32>
    %235 = arith.divf %233, %234 : vector<16x128xf32>
    %236 = vector.extract_strided_slice %223 {offsets = [0, 256], sizes = [16, 128], strides = [1, 1]} : vector<16x512xf32> to vector<16x128xf32>
    %237 = math.tanh %236 : vector<16x128xf32>
    %238 = vector.extract_strided_slice %223 {offsets = [0, 384], sizes = [16, 128], strides = [1, 1]} : vector<16x512xf32> to vector<16x128xf32>
    %239 = arith.negf %238 : vector<16x128xf32>
    %240 = math.exp %239 : vector<16x128xf32>
    %cst_49 = arith.constant 1.000000e+00 : f32
    %241 = vector.broadcast %cst_49 : f32 to vector<16x128xf32>
    %242 = arith.addf %241, %240 : vector<16x128xf32>
    %243 = arith.divf %241, %242 : vector<16x128xf32>
    %244 = arith.mulf %235, %217 : vector<16x128xf32>
    %245 = arith.mulf %229, %237 : vector<16x128xf32>
    %246 = arith.addf %244, %245 : vector<16x128xf32>
    %247 = math.tanh %246 : vector<16x128xf32>
    %248 = arith.mulf %243, %247 : vector<16x128xf32>
    %249 = vector.broadcast %c5_i32 : i32 to vector<16x1xi32>
    %250 = arith.cmpi sgt, %0, %249 : vector<16x1xi32>
    %251 = arith.extui %250 : vector<16x1xi1> to vector<16x1xi32>
    %252 = arith.sitofp %251 : vector<16x1xi32> to vector<16x1xf32>
    %253 = arith.subf %248, %213 : vector<16x128xf32>
    %254 = vector.broadcast %252 : vector<16x1xf32> to vector<16x128xf32>
    %255 = arith.mulf %254, %253 : vector<16x128xf32>
    %256 = arith.addf %213, %255 : vector<16x128xf32>
    %257 = arith.subf %246, %217 : vector<16x128xf32>
    %258 = vector.broadcast %252 : vector<16x1xf32> to vector<16x128xf32>
    %259 = arith.mulf %258, %257 : vector<16x128xf32>
    %260 = arith.addf %217, %259 : vector<16x128xf32>
    %c6_i32 = arith.constant 6 : i32
    %261 = arith.index_cast %c6_i32 : i32 to index
    %c0_50 = arith.constant 0 : index
    %c0_51 = arith.constant 0 : index
    %262 = vector.load %arg1[%261, %c0_50, %c0_51] : memref<10x16x512xf32, #tpu.memory_space<vmem>>, vector<1x16x512xf32>
    %263 = vector.shape_cast %262 : vector<1x16x512xf32> to vector<16x512xf32>
    %c0_52 = arith.constant 0 : index
    %c0_53 = arith.constant 0 : index
    %264 = vector.load %arg2[%c0_52, %c0_53] : memref<128x512xf32, #tpu.memory_space<vmem>>, vector<128x512xf32>
    %cst_54 = arith.constant dense<0.000000e+00> : vector<16x512xf32>
    %265 = tpu.matmul %256, %264, %cst_54 {dimension_numbers = #tpu.dot_dimension_numbers<[1], [0], [0], [1], [0, 0, 1, 1], [], []>} : vector<16x128xf32>, vector<128x512xf32>, vector<16x512xf32> -> vector<16x512xf32>
    %266 = arith.addf %263, %265 : vector<16x512xf32>
    %267 = vector.extract_strided_slice %266 {offsets = [0, 0], sizes = [16, 128], strides = [1, 1]} : vector<16x512xf32> to vector<16x128xf32>
    %268 = arith.negf %267 : vector<16x128xf32>
    %269 = math.exp %268 : vector<16x128xf32>
    %cst_55 = arith.constant 1.000000e+00 : f32
    %270 = vector.broadcast %cst_55 : f32 to vector<16x128xf32>
    %271 = arith.addf %270, %269 : vector<16x128xf32>
    %272 = arith.divf %270, %271 : vector<16x128xf32>
    %273 = vector.extract_strided_slice %266 {offsets = [0, 128], sizes = [16, 128], strides = [1, 1]} : vector<16x512xf32> to vector<16x128xf32>
    %274 = arith.negf %273 : vector<16x128xf32>
    %275 = math.exp %274 : vector<16x128xf32>
    %cst_56 = arith.constant 1.000000e+00 : f32
    %276 = vector.broadcast %cst_56 : f32 to vector<16x128xf32>
    %277 = arith.addf %276, %275 : vector<16x128xf32>
    %278 = arith.divf %276, %277 : vector<16x128xf32>
    %279 = vector.extract_strided_slice %266 {offsets = [0, 256], sizes = [16, 128], strides = [1, 1]} : vector<16x512xf32> to vector<16x128xf32>
    %280 = math.tanh %279 : vector<16x128xf32>
    %281 = vector.extract_strided_slice %266 {offsets = [0, 384], sizes = [16, 128], strides = [1, 1]} : vector<16x512xf32> to vector<16x128xf32>
    %282 = arith.negf %281 : vector<16x128xf32>
    %283 = math.exp %282 : vector<16x128xf32>
    %cst_57 = arith.constant 1.000000e+00 : f32
    %284 = vector.broadcast %cst_57 : f32 to vector<16x128xf32>
    %285 = arith.addf %284, %283 : vector<16x128xf32>
    %286 = arith.divf %284, %285 : vector<16x128xf32>
    %287 = arith.mulf %278, %260 : vector<16x128xf32>
    %288 = arith.mulf %272, %280 : vector<16x128xf32>
    %289 = arith.addf %287, %288 : vector<16x128xf32>
    %290 = math.tanh %289 : vector<16x128xf32>
    %291 = arith.mulf %286, %290 : vector<16x128xf32>
    %292 = vector.broadcast %c6_i32 : i32 to vector<16x1xi32>
    %293 = arith.cmpi sgt, %0, %292 : vector<16x1xi32>
    %294 = arith.extui %293 : vector<16x1xi1> to vector<16x1xi32>
    %295 = arith.sitofp %294 : vector<16x1xi32> to vector<16x1xf32>
    %296 = arith.subf %291, %256 : vector<16x128xf32>
    %297 = vector.broadcast %295 : vector<16x1xf32> to vector<16x128xf32>
    %298 = arith.mulf %297, %296 : vector<16x128xf32>
    %299 = arith.addf %256, %298 : vector<16x128xf32>
    %300 = arith.subf %289, %260 : vector<16x128xf32>
    %301 = vector.broadcast %295 : vector<16x1xf32> to vector<16x128xf32>
    %302 = arith.mulf %301, %300 : vector<16x128xf32>
    %303 = arith.addf %260, %302 : vector<16x128xf32>
    %c7_i32 = arith.constant 7 : i32
    %304 = arith.index_cast %c7_i32 : i32 to index
    %c0_58 = arith.constant 0 : index
    %c0_59 = arith.constant 0 : index
    %305 = vector.load %arg1[%304, %c0_58, %c0_59] : memref<10x16x512xf32, #tpu.memory_space<vmem>>, vector<1x16x512xf32>
    %306 = vector.shape_cast %305 : vector<1x16x512xf32> to vector<16x512xf32>
    %c0_60 = arith.constant 0 : index
    %c0_61 = arith.constant 0 : index
    %307 = vector.load %arg2[%c0_60, %c0_61] : memref<128x512xf32, #tpu.memory_space<vmem>>, vector<128x512xf32>
    %cst_62 = arith.constant dense<0.000000e+00> : vector<16x512xf32>
    %308 = tpu.matmul %299, %307, %cst_62 {dimension_numbers = #tpu.dot_dimension_numbers<[1], [0], [0], [1], [0, 0, 1, 1], [], []>} : vector<16x128xf32>, vector<128x512xf32>, vector<16x512xf32> -> vector<16x512xf32>
    %309 = arith.addf %306, %308 : vector<16x512xf32>
    %310 = vector.extract_strided_slice %309 {offsets = [0, 0], sizes = [16, 128], strides = [1, 1]} : vector<16x512xf32> to vector<16x128xf32>
    %311 = arith.negf %310 : vector<16x128xf32>
    %312 = math.exp %311 : vector<16x128xf32>
    %cst_63 = arith.constant 1.000000e+00 : f32
    %313 = vector.broadcast %cst_63 : f32 to vector<16x128xf32>
    %314 = arith.addf %313, %312 : vector<16x128xf32>
    %315 = arith.divf %313, %314 : vector<16x128xf32>
    %316 = vector.extract_strided_slice %309 {offsets = [0, 128], sizes = [16, 128], strides = [1, 1]} : vector<16x512xf32> to vector<16x128xf32>
    %317 = arith.negf %316 : vector<16x128xf32>
    %318 = math.exp %317 : vector<16x128xf32>
    %cst_64 = arith.constant 1.000000e+00 : f32
    %319 = vector.broadcast %cst_64 : f32 to vector<16x128xf32>
    %320 = arith.addf %319, %318 : vector<16x128xf32>
    %321 = arith.divf %319, %320 : vector<16x128xf32>
    %322 = vector.extract_strided_slice %309 {offsets = [0, 256], sizes = [16, 128], strides = [1, 1]} : vector<16x512xf32> to vector<16x128xf32>
    %323 = math.tanh %322 : vector<16x128xf32>
    %324 = vector.extract_strided_slice %309 {offsets = [0, 384], sizes = [16, 128], strides = [1, 1]} : vector<16x512xf32> to vector<16x128xf32>
    %325 = arith.negf %324 : vector<16x128xf32>
    %326 = math.exp %325 : vector<16x128xf32>
    %cst_65 = arith.constant 1.000000e+00 : f32
    %327 = vector.broadcast %cst_65 : f32 to vector<16x128xf32>
    %328 = arith.addf %327, %326 : vector<16x128xf32>
    %329 = arith.divf %327, %328 : vector<16x128xf32>
    %330 = arith.mulf %321, %303 : vector<16x128xf32>
    %331 = arith.mulf %315, %323 : vector<16x128xf32>
    %332 = arith.addf %330, %331 : vector<16x128xf32>
    %333 = math.tanh %332 : vector<16x128xf32>
    %334 = arith.mulf %329, %333 : vector<16x128xf32>
    %335 = vector.broadcast %c7_i32 : i32 to vector<16x1xi32>
    %336 = arith.cmpi sgt, %0, %335 : vector<16x1xi32>
    %337 = arith.extui %336 : vector<16x1xi1> to vector<16x1xi32>
    %338 = arith.sitofp %337 : vector<16x1xi32> to vector<16x1xf32>
    %339 = arith.subf %334, %299 : vector<16x128xf32>
    %340 = vector.broadcast %338 : vector<16x1xf32> to vector<16x128xf32>
    %341 = arith.mulf %340, %339 : vector<16x128xf32>
    %342 = arith.addf %299, %341 : vector<16x128xf32>
    %343 = arith.subf %332, %303 : vector<16x128xf32>
    %344 = vector.broadcast %338 : vector<16x1xf32> to vector<16x128xf32>
    %345 = arith.mulf %344, %343 : vector<16x128xf32>
    %346 = arith.addf %303, %345 : vector<16x128xf32>
    %c8_i32 = arith.constant 8 : i32
    %347 = arith.index_cast %c8_i32 : i32 to index
    %c0_66 = arith.constant 0 : index
    %c0_67 = arith.constant 0 : index
    %348 = vector.load %arg1[%347, %c0_66, %c0_67] : memref<10x16x512xf32, #tpu.memory_space<vmem>>, vector<1x16x512xf32>
    %349 = vector.shape_cast %348 : vector<1x16x512xf32> to vector<16x512xf32>
    %c0_68 = arith.constant 0 : index
    %c0_69 = arith.constant 0 : index
    %350 = vector.load %arg2[%c0_68, %c0_69] : memref<128x512xf32, #tpu.memory_space<vmem>>, vector<128x512xf32>
    %cst_70 = arith.constant dense<0.000000e+00> : vector<16x512xf32>
    %351 = tpu.matmul %342, %350, %cst_70 {dimension_numbers = #tpu.dot_dimension_numbers<[1], [0], [0], [1], [0, 0, 1, 1], [], []>} : vector<16x128xf32>, vector<128x512xf32>, vector<16x512xf32> -> vector<16x512xf32>
    %352 = arith.addf %349, %351 : vector<16x512xf32>
    %353 = vector.extract_strided_slice %352 {offsets = [0, 0], sizes = [16, 128], strides = [1, 1]} : vector<16x512xf32> to vector<16x128xf32>
    %354 = arith.negf %353 : vector<16x128xf32>
    %355 = math.exp %354 : vector<16x128xf32>
    %cst_71 = arith.constant 1.000000e+00 : f32
    %356 = vector.broadcast %cst_71 : f32 to vector<16x128xf32>
    %357 = arith.addf %356, %355 : vector<16x128xf32>
    %358 = arith.divf %356, %357 : vector<16x128xf32>
    %359 = vector.extract_strided_slice %352 {offsets = [0, 128], sizes = [16, 128], strides = [1, 1]} : vector<16x512xf32> to vector<16x128xf32>
    %360 = arith.negf %359 : vector<16x128xf32>
    %361 = math.exp %360 : vector<16x128xf32>
    %cst_72 = arith.constant 1.000000e+00 : f32
    %362 = vector.broadcast %cst_72 : f32 to vector<16x128xf32>
    %363 = arith.addf %362, %361 : vector<16x128xf32>
    %364 = arith.divf %362, %363 : vector<16x128xf32>
    %365 = vector.extract_strided_slice %352 {offsets = [0, 256], sizes = [16, 128], strides = [1, 1]} : vector<16x512xf32> to vector<16x128xf32>
    %366 = math.tanh %365 : vector<16x128xf32>
    %367 = vector.extract_strided_slice %352 {offsets = [0, 384], sizes = [16, 128], strides = [1, 1]} : vector<16x512xf32> to vector<16x128xf32>
    %368 = arith.negf %367 : vector<16x128xf32>
    %369 = math.exp %368 : vector<16x128xf32>
    %cst_73 = arith.constant 1.000000e+00 : f32
    %370 = vector.broadcast %cst_73 : f32 to vector<16x128xf32>
    %371 = arith.addf %370, %369 : vector<16x128xf32>
    %372 = arith.divf %370, %371 : vector<16x128xf32>
    %373 = arith.mulf %364, %346 : vector<16x128xf32>
    %374 = arith.mulf %358, %366 : vector<16x128xf32>
    %375 = arith.addf %373, %374 : vector<16x128xf32>
    %376 = math.tanh %375 : vector<16x128xf32>
    %377 = arith.mulf %372, %376 : vector<16x128xf32>
    %378 = vector.broadcast %c8_i32 : i32 to vector<16x1xi32>
    %379 = arith.cmpi sgt, %0, %378 : vector<16x1xi32>
    %380 = arith.extui %379 : vector<16x1xi1> to vector<16x1xi32>
    %381 = arith.sitofp %380 : vector<16x1xi32> to vector<16x1xf32>
    %382 = arith.subf %377, %342 : vector<16x128xf32>
    %383 = vector.broadcast %381 : vector<16x1xf32> to vector<16x128xf32>
    %384 = arith.mulf %383, %382 : vector<16x128xf32>
    %385 = arith.addf %342, %384 : vector<16x128xf32>
    %386 = arith.subf %375, %346 : vector<16x128xf32>
    %387 = vector.broadcast %381 : vector<16x1xf32> to vector<16x128xf32>
    %388 = arith.mulf %387, %386 : vector<16x128xf32>
    %389 = arith.addf %346, %388 : vector<16x128xf32>
    %c9_i32 = arith.constant 9 : i32
    %390 = arith.index_cast %c9_i32 : i32 to index
    %c0_74 = arith.constant 0 : index
    %c0_75 = arith.constant 0 : index
    %391 = vector.load %arg1[%390, %c0_74, %c0_75] : memref<10x16x512xf32, #tpu.memory_space<vmem>>, vector<1x16x512xf32>
    %392 = vector.shape_cast %391 : vector<1x16x512xf32> to vector<16x512xf32>
    %c0_76 = arith.constant 0 : index
    %c0_77 = arith.constant 0 : index
    %393 = vector.load %arg2[%c0_76, %c0_77] : memref<128x512xf32, #tpu.memory_space<vmem>>, vector<128x512xf32>
    %cst_78 = arith.constant dense<0.000000e+00> : vector<16x512xf32>
    %394 = tpu.matmul %385, %393, %cst_78 {dimension_numbers = #tpu.dot_dimension_numbers<[1], [0], [0], [1], [0, 0, 1, 1], [], []>} : vector<16x128xf32>, vector<128x512xf32>, vector<16x512xf32> -> vector<16x512xf32>
    %395 = arith.addf %392, %394 : vector<16x512xf32>
    %396 = vector.extract_strided_slice %395 {offsets = [0, 0], sizes = [16, 128], strides = [1, 1]} : vector<16x512xf32> to vector<16x128xf32>
    %397 = arith.negf %396 : vector<16x128xf32>
    %398 = math.exp %397 : vector<16x128xf32>
    %cst_79 = arith.constant 1.000000e+00 : f32
    %399 = vector.broadcast %cst_79 : f32 to vector<16x128xf32>
    %400 = arith.addf %399, %398 : vector<16x128xf32>
    %401 = arith.divf %399, %400 : vector<16x128xf32>
    %402 = vector.extract_strided_slice %395 {offsets = [0, 128], sizes = [16, 128], strides = [1, 1]} : vector<16x512xf32> to vector<16x128xf32>
    %403 = arith.negf %402 : vector<16x128xf32>
    %404 = math.exp %403 : vector<16x128xf32>
    %cst_80 = arith.constant 1.000000e+00 : f32
    %405 = vector.broadcast %cst_80 : f32 to vector<16x128xf32>
    %406 = arith.addf %405, %404 : vector<16x128xf32>
    %407 = arith.divf %405, %406 : vector<16x128xf32>
    %408 = vector.extract_strided_slice %395 {offsets = [0, 256], sizes = [16, 128], strides = [1, 1]} : vector<16x512xf32> to vector<16x128xf32>
    %409 = math.tanh %408 : vector<16x128xf32>
    %410 = vector.extract_strided_slice %395 {offsets = [0, 384], sizes = [16, 128], strides = [1, 1]} : vector<16x512xf32> to vector<16x128xf32>
    %411 = arith.negf %410 : vector<16x128xf32>
    %412 = math.exp %411 : vector<16x128xf32>
    %cst_81 = arith.constant 1.000000e+00 : f32
    %413 = vector.broadcast %cst_81 : f32 to vector<16x128xf32>
    %414 = arith.addf %413, %412 : vector<16x128xf32>
    %415 = arith.divf %413, %414 : vector<16x128xf32>
    %416 = arith.mulf %407, %389 : vector<16x128xf32>
    %417 = arith.mulf %401, %409 : vector<16x128xf32>
    %418 = arith.addf %416, %417 : vector<16x128xf32>
    %419 = math.tanh %418 : vector<16x128xf32>
    %420 = arith.mulf %415, %419 : vector<16x128xf32>
    %421 = vector.broadcast %c9_i32 : i32 to vector<16x1xi32>
    %422 = arith.cmpi sgt, %0, %421 : vector<16x1xi32>
    %423 = arith.extui %422 : vector<16x1xi1> to vector<16x1xi32>
    %424 = arith.sitofp %423 : vector<16x1xi32> to vector<16x1xf32>
    %425 = arith.subf %420, %385 : vector<16x128xf32>
    %426 = vector.broadcast %424 : vector<16x1xf32> to vector<16x128xf32>
    %427 = arith.mulf %426, %425 : vector<16x128xf32>
    %428 = arith.addf %385, %427 : vector<16x128xf32>
    %429 = arith.subf %418, %389 : vector<16x128xf32>
    %430 = vector.broadcast %424 : vector<16x1xf32> to vector<16x128xf32>
    %431 = arith.mulf %430, %429 : vector<16x128xf32>
    %432 = arith.addf %389, %431 : vector<16x128xf32>
    %c10_i32 = arith.constant 10 : i32
    %c0_82 = arith.constant 0 : index
    %c0_83 = arith.constant 0 : index
    %433 = vector.load %arg4[%c0_82, %c0_83] : memref<16x128xf32, #tpu.memory_space<vmem>>, vector<16x128xf32>
    tpu.vector_store %arg4[%c0_82, %c0_83], %428 {strides = array<i32>} : memref<16x128xf32, #tpu.memory_space<vmem>>, vector<16x128xf32>,
    return
  }
  func.func @transform_0(%arg0: i32) -> (i32, i32, i32) {
    %c0_i32 = arith.constant 0 : i32
    %c0_i32_0 = arith.constant 0 : i32
    %c0_i32_1 = arith.constant 0 : i32
    return %c0_i32, %arg0, %c0_i32_0 : i32, i32, i32
  }
  func.func @transform_1(%arg0: i32) -> (i32, i32) {
    %c0_i32 = arith.constant 0 : i32
    %c0_i32_0 = arith.constant 0 : i32
    %c0_i32_1 = arith.constant 0 : i32
    return %c0_i32, %c0_i32_0 : i32, i32
  }
  func.func @transform_2(%arg0: i32) -> (i32, i32) {
    %c0_i32 = arith.constant 0 : i32
    %c0_i32_0 = arith.constant 0 : i32
    return %arg0, %c0_i32 : i32, i32
  }
  func.func @transform_3(%arg0: i32) -> (i32, i32) {
    %c0_i32 = arith.constant 0 : i32
    %c0_i32_0 = arith.constant 0 : i32
    return %arg0, %c0_i32 : i32, i32
  }
}

module attributes {stable_mosaic.version = 11 : i64} {
  func.func @_encode_project_kernel(%arg0: i32, %arg1: memref<160x16xbf16, #tpu.memory_space<vmem>>, %arg2: memref<16x32xbf16, #tpu.memory_space<vmem>>, %arg3: memref<1x32xf32, #tpu.memory_space<vmem>>, %arg4: memref<32x512xbf16, #tpu.memory_space<vmem>>, %arg5: memref<1x512xf32, #tpu.memory_space<vmem>>, %arg6: memref<160x512xf32, #tpu.memory_space<vmem>>) attributes {dimension_semantics = [#tpu.dimension_semantics<parallel>], iteration_bounds = array<i64: 1>, scalar_prefetch = 0 : i64, scratch_operands = 0 : i64, tpu.core_type = #tpu.core_type<tc>, window_params = [{transform_indices = @transform_0, window_bounds = array<i64: 160, 16>}, {pipeline_mode = #tpu.pipeline_mode<synchronous>, transform_indices = @transform_1, window_bounds = array<i64: 16, 32>}, {pipeline_mode = #tpu.pipeline_mode<synchronous>, transform_indices = @transform_2, window_bounds = array<i64: 1, 32>}, {pipeline_mode = #tpu.pipeline_mode<synchronous>, transform_indices = @transform_3, window_bounds = array<i64: 32, 512>}, {pipeline_mode = #tpu.pipeline_mode<synchronous>, transform_indices = @transform_4, window_bounds = array<i64: 1, 512>}, {transform_indices = @transform_5, window_bounds = array<i64: 160, 512>}]} {
    %c0 = arith.constant 0 : index
    %c0_0 = arith.constant 0 : index
    %0 = vector.load %arg1[%c0, %c0_0] : memref<160x16xbf16, #tpu.memory_space<vmem>>, vector<160x16xbf16>
    %c0_1 = arith.constant 0 : index
    %c0_2 = arith.constant 0 : index
    %1 = vector.load %arg2[%c0_1, %c0_2] : memref<16x32xbf16, #tpu.memory_space<vmem>>, vector<16x32xbf16>
    %cst = arith.constant dense<0.000000e+00> : vector<160x32xf32>
    %2 = tpu.matmul %0, %1, %cst {dimension_numbers = #tpu.dot_dimension_numbers<[1], [0], [0], [1], [0, 0, 1, 1], [], []>} : vector<160x16xbf16>, vector<16x32xbf16>, vector<160x32xf32> -> vector<160x32xf32>
    %c0_3 = arith.constant 0 : index
    %c0_4 = arith.constant 0 : index
    %3 = vector.load %arg3[%c0_3, %c0_4] : memref<1x32xf32, #tpu.memory_space<vmem>>, vector<1x32xf32>
    %4 = vector.broadcast %3 : vector<1x32xf32> to vector<160x32xf32>
    %5 = arith.addf %2, %4 : vector<160x32xf32>
    %6 = arith.mulf %5, %5 : vector<160x32xf32>
    %7 = arith.mulf %5, %6 : vector<160x32xf32>
    %cst_5 = arith.constant 4.471500e-02 : f32
    %8 = vector.broadcast %cst_5 : f32 to vector<160x32xf32>
    %9 = arith.mulf %8, %7 : vector<160x32xf32>
    %10 = arith.addf %5, %9 : vector<160x32xf32>
    %cst_6 = arith.constant 0.797884583 : f32
    %11 = vector.broadcast %cst_6 : f32 to vector<160x32xf32>
    %12 = arith.mulf %11, %10 : vector<160x32xf32>
    %13 = math.tanh %12 : vector<160x32xf32>
    %cst_7 = arith.constant 1.000000e+00 : f32
    %14 = vector.broadcast %cst_7 : f32 to vector<160x32xf32>
    %15 = arith.addf %14, %13 : vector<160x32xf32>
    %cst_8 = arith.constant 5.000000e-01 : f32
    %16 = vector.broadcast %cst_8 : f32 to vector<160x32xf32>
    %17 = arith.mulf %16, %15 : vector<160x32xf32>
    %18 = arith.mulf %5, %17 : vector<160x32xf32>
    %19 = arith.truncf %18 : vector<160x32xf32> to vector<160x32xbf16>
    %c0_9 = arith.constant 0 : index
    %c0_10 = arith.constant 0 : index
    %20 = vector.load %arg4[%c0_9, %c0_10] : memref<32x512xbf16, #tpu.memory_space<vmem>>, vector<32x512xbf16>
    %cst_11 = arith.constant dense<0.000000e+00> : vector<160x512xf32>
    %21 = tpu.matmul %19, %20, %cst_11 {dimension_numbers = #tpu.dot_dimension_numbers<[1], [0], [0], [1], [0, 0, 1, 1], [], []>} : vector<160x32xbf16>, vector<32x512xbf16>, vector<160x512xf32> -> vector<160x512xf32>
    %c0_12 = arith.constant 0 : index
    %c0_13 = arith.constant 0 : index
    %22 = vector.load %arg5[%c0_12, %c0_13] : memref<1x512xf32, #tpu.memory_space<vmem>>, vector<1x512xf32>
    %23 = vector.broadcast %22 : vector<1x512xf32> to vector<160x512xf32>
    %24 = arith.addf %21, %23 : vector<160x512xf32>
    %c0_14 = arith.constant 0 : index
    %c0_15 = arith.constant 0 : index
    %25 = vector.load %arg6[%c0_14, %c0_15] : memref<160x512xf32, #tpu.memory_space<vmem>>, vector<160x512xf32>
    tpu.vector_store %arg6[%c0_14, %c0_15], %24 {strides = array<i32>} : memref<160x512xf32, #tpu.memory_space<vmem>>, vector<160x512xf32>,
    return
  }
  func.func @transform_0(%arg0: i32) -> (i32, i32) {
    %c0_i32 = arith.constant 0 : i32
    %c0_i32_0 = arith.constant 0 : i32
    return %arg0, %c0_i32 : i32, i32
  }
  func.func @transform_1(%arg0: i32) -> (i32, i32) {
    %c0_i32 = arith.constant 0 : i32
    %c0_i32_0 = arith.constant 0 : i32
    %c0_i32_1 = arith.constant 0 : i32
    return %c0_i32, %c0_i32_0 : i32, i32
  }
  func.func @transform_2(%arg0: i32) -> (i32, i32) {
    %c0_i32 = arith.constant 0 : i32
    %c0_i32_0 = arith.constant 0 : i32
    %c0_i32_1 = arith.constant 0 : i32
    return %c0_i32, %c0_i32_0 : i32, i32
  }
  func.func @transform_3(%arg0: i32) -> (i32, i32) {
    %c0_i32 = arith.constant 0 : i32
    %c0_i32_0 = arith.constant 0 : i32
    %c0_i32_1 = arith.constant 0 : i32
    return %c0_i32, %c0_i32_0 : i32, i32
  }
  func.func @transform_4(%arg0: i32) -> (i32, i32) {
    %c0_i32 = arith.constant 0 : i32
    %c0_i32_0 = arith.constant 0 : i32
    %c0_i32_1 = arith.constant 0 : i32
    return %c0_i32, %c0_i32_0 : i32, i32
  }
  func.func @transform_5(%arg0: i32) -> (i32, i32) {
    %c0_i32 = arith.constant 0 : i32
    %c0_i32_0 = arith.constant 0 : i32
    return %arg0, %c0_i32 : i32, i32
  }
}

</mosaic_0001>

<bundles_post_ra>
// kernel: _forward_core.2
= control target key start
LH: loop header
LB: loop body
LE: loop exit
PB: predicated region body
PF: predicated region fallthrough
CT: control target
= control target key end

     0   :  { %10 = vsyncpa [#allocation3], 0  ;;  %s1890_s0 = inlined_call_operand.hbm [shape: bf16[160,16], index: 0, kind: input, shape index: {}]   ;;  %s1891_s1 = inlined_call_operand.hbm [shape: bf16[16,32], index: 1, kind: input, shape index: {}]   ;;  %s1892_s2 = inlined_call_operand.hbm [shape: f32[1,32], index: 2, kind: input, shape index: {}]   ;;  %s1893_s3 = inlined_call_operand.hbm [shape: bf16[32,512], index: 3, kind: input, shape index: {}]   ;;  %s1894_s4 = inlined_call_operand.hbm [shape: f32[1,512], index: 4, kind: input, shape index: {}]   ;;  %s1895_s5 = inlined_call_operand.vmem [shape: f32[160,512], index: 5, kind: output, shape index: {}]  }
   0x1   :  { %11 = vsyncpa [#allocation5], 0 }
   0x2   :  { %12 = vsyncpa [#allocation8], 0  ;;  %s1232_s18 = smov [#allocation4]   ;;  %s1233_s20 = smov [#allocation7]  }
   0x3   :  { %s30_s19 = sshll.u32 %s1232_s18, 4  ;;  %s52_s21 = sshll.u32 %s1233_s20, 4  ;;  %s31_s19 = int_to_ptr.vmem [resolvable:$true] %s30_s19  ;;  %s1272_s21 = int_to_ptr.vmem [resolvable:$true] %s52_s21 }
   0x4   :  { %s1116_s24 = scalar_lea.hbm %s1891_s1, 128 }
   0x5   :  { %p1117_p0 = scmp.ne.s32.totalorder %s1891_s1, %s1116_s24  ;;  %p1120_p1 = scmp.lt.u32.totalorder %s1116_s24, %s1891_s1 }
   0x7   :  { %p1122_p2 = pnand %p1120_p1, %p1117_p0 }
   0x9   :  { %1125 = shalt.err (!%p1122_p2)
}
   0xa   :  { %s1126_s29 = scalar_lea.vmem %s31_s19, 128  ;;  %p1131_p4 = scmp.lt.s32.totalorder %s31_s19, %s31_s19 }
   0xb   :  { %p1127_p3 = scmp.ne.s32.totalorder %s31_s19, %s1126_s29  ;;  %p1132_p5 = scmp.lt.s32.totalorder %s1126_s29, %s1126_s29 }
   0xd   :  { %p1133_p6 = por %p1132_p5, %p1131_p4 }
   0xf   :  { %p1134_p7 = pnand %p1133_p6, %p1127_p3 }
  0x11   :  { %1137 = shalt.err (!%p1134_p7)
}
  0x12   :  { %s1234_s30 = smov 64   ;;  %s1235_s6 = smov 4  }
  0x13   :  { %36 = dma.hbm_to_vmem [thread:$0]  %s1891_s1, 128, %s31_s19, [#allocation5], %s1234_s30, %s1234_s30, %s1235_s6  }
  0x14   :  { %s1138_s11 = scalar_lea.hbm %s1893_s3, 1024 }
  0x15   :  { %p1139_p8 = scmp.ne.s32.totalorder %s1893_s3, %s1138_s11  ;;  %p1142_p9 = scmp.lt.u32.totalorder %s1138_s11, %s1893_s3 }
  0x17   :  { %p1144_p10 = pnand %p1142_p9, %p1139_p8 }
  0x19   :  { %1147 = shalt.err (!%p1144_p10)
}
  0x1a   :  { %s1148_s16 = scalar_lea.vmem %s1272_s21, 1024  ;;  %p1153_p12 = scmp.lt.s32.totalorder %s1272_s21, %s1272_s21 }
  0x1b   :  { %p1149_p11 = scmp.ne.s32.totalorder %s1272_s21, %s1148_s16  ;;  %p1154_p13 = scmp.lt.s32.totalorder %s1148_s16, %s1148_s16 }
  0x1d   :  { %p1155_p0 = por %p1154_p13, %p1153_p12 }
  0x1f   :  { %p1156_p1 = pnand %p1155_p0, %p1149_p11 }
  0x21   :  { %1159 = shalt.err (!%p1156_p1)
}
  0x22   :  { %s1236_s1 = smov 256   ;;  %s1237_s17 = smov 16  }
  0x23   :  { %58 = dma.hbm_to_vmem [thread:$0]  %s1893_s3, 1024, %s1272_s21, [#allocation8], %s1236_s1, %s1236_s1, %s1237_s17  }
  0x24   :  { %s1238_s20 = smov [#allocation2]   ;;  %s1239_s23 = smov [#allocation6]  }
  0x25   :  { %s18_s22 = sshll.u32 %s1238_s20, 4  ;;  %s43_s24 = sshll.u32 %s1239_s23, 4  ;;  %s19_s22 = int_to_ptr.vmem [resolvable:$true] %s18_s22  ;;  %s44_s24 = int_to_ptr.vmem [resolvable:$true] %s43_s24 }
  0x26   :  { %s1160_s27 = scalar_lea.hbm %s1890_s0, 1280 }
  0x27   :  { %p1161_p2 = scmp.ne.s32.totalorder %s1890_s0, %s1160_s27  ;;  %p1164_p3 = scmp.lt.u32.totalorder %s1160_s27, %s1890_s0 }
  0x29   :  { %p1166_p4 = pnand %p1164_p3, %p1161_p2 }
  0x2b   :  { %1169 = shalt.err (!%p1166_p4)
}
  0x2c   :  { %s1170_s3 = scalar_lea.vmem %s19_s22, 1280  ;;  %p1175_p6 = scmp.lt.s32.totalorder %s19_s22, %s19_s22 }
  0x2d   :  { %p1171_p5 = scmp.ne.s32.totalorder %s19_s22, %s1170_s3  ;;  %p1176_p7 = scmp.lt.s32.totalorder %s1170_s3, %s1170_s3 }
  0x2f   :  { %p1177_p8 = por %p1176_p7, %p1175_p6 }
  0x31   :  { %p1178_p9 = pnand %p1177_p8, %p1171_p5 }
  0x33   :  { %1181 = shalt.err (!%p1178_p9)
}
  0x34   :  { %24 = dma.hbm_to_vmem [thread:$0]  %s1890_s0, 1280, %s19_s22, [#allocation3], %s1234_s30, %s1234_s30, %s1235_s6  }
  0x35   :  { %s1182_s12 = scalar_lea.hbm %s1892_s2, 16 }
  0x36   :  { %p1183_p10 = scmp.ne.s32.totalorder %s1892_s2, %s1182_s12  ;;  %p1186_p11 = scmp.lt.u32.totalorder %s1182_s12, %s1892_s2 }
  0x38   :  { %p1188_p12 = pnand %p1186_p11, %p1183_p10 }
  0x3a   :  { %1191 = shalt.err (!%p1188_p12)
}
  0x3b   :  { %s1192_s1 = scalar_lea.vmem %s44_s24, 16  ;;  %s1196_s17 = scalar_lea.vmem %s44_s24, 32 }
  0x3c   :  { %p1193_p13 = scmp.ne.s32.totalorder %s44_s24, %s1192_s1  ;;  %p1197_p0 = scmp.lt.s32.totalorder %s44_s24, %s44_s24 }
  0x3d   :  { %p1198_p1 = scmp.lt.s32.totalorder %s1196_s17, %s1192_s1 }
  0x3f   :  { %p1199_p2 = por %p1198_p1, %p1197_p0 }
  0x41   :  { %p1200_p3 = pnand %p1199_p2, %p1193_p13 }
  0x43   :  { %1203 = shalt.err (!%p1200_p3)
}
  0x44   :  { %46 = dma.hbm_to_vmem [thread:$0]  %s1892_s2, 16, %s44_s24, [#allocation5]  }
  0x45   :  { %s1240_s6 = smov [#allocation9]   ;;  %s1204_s22 = scalar_lea.hbm %s1894_s4, 64 }
  0x46   :  { %s65_s18 = sshll.u32 %s1240_s6, 4  ;;  %p1205_p4 = scmp.ne.s32.totalorder %s1894_s4, %s1204_s22  ;;  %s66_s18 = int_to_ptr.vmem [resolvable:$true] %s65_s18 }
  0x47   :  { %p1208_p5 = scmp.lt.u32.totalorder %s1204_s22, %s1894_s4 }
  0x49   :  { %p1210_p6 = pnand %p1208_p5, %p1205_p4 }
  0x4b   :  { %1213 = shalt.err (!%p1210_p6)
}
  0x4c   :  { %s1214_s28 = scalar_lea.vmem %s66_s18, 64  ;;  %p1219_p8 = scmp.lt.s32.totalorder %s66_s18, %s66_s18 }
  0x4d   :  { %p1215_p7 = scmp.ne.s32.totalorder %s66_s18, %s1214_s28  ;;  %p1220_p9 = scmp.lt.s32.totalorder %s1214_s28, %s1214_s28 }
  0x4f   :  { %p1221_p10 = por %p1220_p9, %p1219_p8 }
  0x51   :  { %p1222_p11 = pnand %p1221_p10, %p1215_p7 }
  0x53   :  { %1225 = shalt.err (!%p1222_p11)
}
  0x54   :  { %68 = dma.hbm_to_vmem [thread:$0]  %s1894_s4, 64, %s66_s18, [#allocation8]  }
  0x55   :  { %1226 = dma.done.wait [#allocation3], 1280  }
  0x56   :  { %1227 = vsyncadd [#allocation3], 4294966016 }
  0x57   :  { %1228 = dma.done.wait [#allocation5], 144  }
  0x58   :  { %1229 = vsyncadd [#allocation5], 4294967152 }
  0x59   :  { %1230 = dma.done.wait [#allocation8], 1088  }
  0x5a   :  { %1231 = vsyncadd [#allocation8], 4294966208  ;;  %v1053_v0 = vld [vmem:[#allocation4] sm:$0xff]   ;;  %vm170_vm0 = vcmask 130048   ;;  %v1054_v1 = vld [vmem:[#allocation2] sm:$0xff]   ;;  %v1241_v19 = vmov 0  }
  0x5b   :  { %1019 = vmatprep.subr.bf16.mxu0 %v1053_v0  ;;  %v1055_v2 = vld [vmem:[#allocation2 + $0x8] sm:$0xff]   ;;  %1041 = vmatprep.subr.bf16.mxu1 %v1053_v0  ;;  %v1056_v3 = vld [vmem:[#allocation2 + $0x10] sm:$0xff]   ;;  %v1057_v5 = vld [vmem:[#allocation2 + $0x18] sm:$0xff]   ;;  %vm574_vm1 = vcmask 261120  }
  0x5c   :  { %1020 = vmatpush3.bf16.msra.mxu0 %v1053_v0  ;;  %1021 = vmatprep.mubr.msk.bf16.mxu0 %vm170_vm0, %v1054_v1  ;;  %v1060_v4 = vld [vmem:[#allocation2 + $0x30] sm:$0xff]   ;;  %v1061_v6 = vld [vmem:[#allocation2 + $0x38] sm:$0xff]   ;;  %v1062_v7 = vld [vmem:[#allocation2 + $0x40] sm:$0xff]  }
  0x5d   :  { %1042 = vmatpush3.bf16.msra.mxu1 %v1053_v0  ;;  %1033 = vmatprep.mubr.msk.bf16.mxu1 %vm170_vm0, %v1060_v4  ;;  %v1058_v8 = vld [vmem:[#allocation2 + $0x20] sm:$0xff]   ;;  %v1063_v9 = vld [vmem:[#allocation2 + $0x48] sm:$0xff]   ;;  %v1357_v20 = vld [vmem:[#allocation6] ss:$0 sm:$0xff] }
  0x5e   :  { %v1059_v10 = vld [vmem:[#allocation2 + $0x28] sm:$0xff]   ;;  %v1064_v13 = vld [vmem:[#allocation7 + $0x8] ss:$16 sps:$4 sm:$0xff]  }
  0x5f   :  { %1022 = vmatmul.mubr.msk.bf16.vlgmr.msra.gmra.mrb[0].mxu0 %vm170_vm0, %v1055_v2  ;;  %v1066_v11 = vld [vmem:[#allocation7 + $0xc] ss:$16 sps:$4 sm:$0xff]   ;;  %v1069_v12 = vld [vmem:[#allocation7 + $0x4] ss:$16 sps:$4 sm:$0xff]   ;;  %v1067_v14 = vld [vmem:[#allocation7] ss:$16 sps:$4 sm:$0xff]  }
  0x60   :  { %1025 = vmatprep.mubr.msk.bf16.mxu0 %vm170_vm0, %v1056_v3  ;;  %1034 = vmatmul.mubr.msk.bf16.vlgmr.msra.gmra.mrb[0].mxu1 %vm170_vm0, %v1061_v6  ;;  %v1072_v15 = vld [vmem:[#allocation7 + $0x2c] ss:$16 sps:$4 sm:$0xff]   ;;  %v1070_v16 = vld [vmem:[#allocation7 + $0x28] ss:$16 sps:$4 sm:$0xff]   ;;  %v1075_v17 = vld [vmem:[#allocation7 + $0x24] ss:$16 sps:$4 sm:$0xff]  }
  0x61   :  { %1037 = vmatprep.mubr.msk.bf16.mxu1 %vm170_vm0, %v1062_v7  ;;  %738 = vmatprep.subr.bf16.mxu0 %v1066_v11  ;;  %v1073_v18 = vld [vmem:[#allocation7 + $0x20] ss:$16 sps:$4 sm:$0xff]  }
  0x62   :  { %605 = vmatprep.subr.bf16.mxu1 %v1069_v12  ;;  %739 = vmatpush1.bf16.msra.mxu0 %v1064_v13 }
  0x63   :  { %606 = vmatpush1.bf16.msra.mxu1 %v1067_v14  ;;  %740 = vmatprep.subr.bf16.mxu0 %v1072_v15 }
  0x64   :  { %607 = vmatprep.subr.bf16.mxu1 %v1075_v17 }
  0x66   :  { %741 = vmatpush1.bf16.msra.mxu0 %v1070_v16 }
  0x67   :  { %1026 = vmatmul.mubr.msk.bf16.gmra.mrb[4].mxu0 %vm170_vm0, %v1057_v5  ;;  %608 = vmatpush1.bf16.msra.mxu1 %v1073_v18 }
  0x68   :  { %1029 = vmatprep.mubr.msk.bf16.mxu0 %vm170_vm0, %v1058_v8  ;;  %1038 = vmatmul.mubr.msk.bf16.gmra.mrb[4].mxu1 %vm170_vm0, %v1063_v9 }
  0x69   :  { %637 = vmatprep.mubr.bf16.mxu1 %v1241_v19 }
  0x6f   :  { %1030 = vmatmul.mubr.msk.bf16.gmra.mrb[8].mxu0 %vm170_vm0, %v1059_v10 }
  0x70   :  { %770 = vmatprep.mubr.bf16.mxu0 %v1241_v19 }
 0x132   :  { %v1023_v21 = vpop.f32.mrb[0].mxu0 }
 0x133   :  { %v1360_v22 = vadd.f32 %v1023_v21, %v1357_v20  ;;  %v235_v23 = vpop.f32.mrb[1].mxu0  ;;  %v1035_v31 = vpop.f32.mrb[0].mxu1 }
 0x134   :  { %v1363_v24 = vadd.f32 %v1357_v20, %v235_v23  ;;  %v1024_v25 = vpop.f32.mrb[2].mxu0  ;;  %v1379_v34 = vadd.f32 %v1035_v31, %v1357_v20  ;;  %v283_v35 = vpop.f32.mrb[1].mxu1 }
 0x135   :  { %v316_v26 = vmul.f32 %v1360_v22, %v1360_v22  ;;  %v1368_v27 = vadd.f32 %v1024_v25, %v1357_v20  ;;  %v238_v28 = vpop.f32.mrb[3].mxu0  ;;  %v1385_v38 = vadd.f32 %v1357_v20, %v283_v35  ;;  %v1036_v39 = vpop.f32.mrb[2].mxu1 }
 0x136   :  { %v314_v29 = vmul.f32 %v1363_v24, %v1363_v24  ;;  %v1373_v30 = vadd.f32 %v1357_v20, %v238_v28  ;;  %v328_v42 = vmul.f32 %v1379_v34, %v1379_v34  ;;  %v286_v43 = vpop.f32.mrb[3].mxu1  ;;  %v1394_v48 = vadd.f32 %v1036_v39, %v1357_v20 }
 0x137   :  { %v336_v32 = vmul.f32 %v316_v26, %v1360_v22  ;;  %v317_v33 = vmul.f32 %v1368_v27, %v1368_v27  ;;  %v326_v47 = vmul.f32 %v1385_v38, %v1385_v38  ;;  %v1435_v23 = vadd.f32 %v1357_v20, %v286_v43 }
 0x138   :  { %v334_v36 = vmul.f32 %v314_v29, %v1363_v24  ;;  %v315_v37 = vmul.f32 %v1373_v30, %v1373_v30  ;;  %v348_v53 = vmul.f32 %v328_v42, %v1379_v34 }
 0x139   :  { %v356_v40 = vmul.f32 0.044715, %v336_v32  ;;  %v337_v41 = vmul.f32 %v317_v33, %v1368_v27  ;;  %v346_v58 = vmul.f32 %v326_v47, %v1385_v38 }
 0x13a   :  { %v354_v44 = vmul.f32 0.044715, %v334_v36  ;;  %v335_v45 = vmul.f32 %v315_v37, %v1373_v30  ;;  %v1027_v46 = vpop.f32.mrb[4].mxu0  ;;  %v368_v15 = vmul.f32 0.044715, %v348_v53 }
 0x13b   :  { %v376_v49 = vadd.f32 %v356_v40, %v1360_v22  ;;  %v357_v50 = vmul.f32 0.044715, %v337_v41  ;;  %v1398_v51 = vadd.f32 %v1027_v46, %v1357_v20  ;;  %v251_v52 = vpop.f32.mrb[5].mxu0  ;;  %v1418_v4 = vpop.f32.mrb[4].mxu1  ;;  %v366_v31 = vmul.f32 0.044715, %v346_v58 }
 0x13c   :  { %v374_v54 = vadd.f32 %v354_v44, %v1363_v24  ;;  %v355_v55 = vmul.f32 0.044715, %v335_v45  ;;  %v1403_v56 = vadd.f32 %v1357_v20, %v251_v52  ;;  %v1028_v57 = vpop.f32.mrb[6].mxu0  ;;  %v1423_v8 = vpop.f32.mrb[5].mxu1  ;;  %v388_v37 = vadd.f32 %v368_v15, %v1379_v34 }
 0x13d   :  { %v396_v59 = vmul.f32 0.7978846, %v376_v49  ;;  %v377_v60 = vadd.f32 %v357_v50, %v1368_v27  ;;  %v320_v61 = vmul.f32 %v1398_v51, %v1398_v51  ;;  %v1410_v62 = vadd.f32 %v1028_v57, %v1357_v20  ;;  %v254_v63 = vpop.f32.mrb[7].mxu0  ;;  %v1428_v12 = vpop.f32.mrb[6].mxu1 }
 0x13e   :  { %v394_v0 = vmul.f32 0.7978846, %v374_v54  ;;  %v375_v1 = vadd.f32 %v355_v55, %v1373_v30  ;;  %v318_v2 = vmul.f32 %v1403_v56, %v1403_v56  ;;  %v1416_v3 = vadd.f32 %v1357_v20, %v254_v63  ;;  %v1431_v16 = vpop.f32.mrb[7].mxu1 }
 0x13f   :  { %1076 = vtanh.f32 %v396_v59  ;;  %v397_v5 = vmul.f32 0.7978846, %v377_v60  ;;  %v340_v6 = vmul.f32 %v320_v61, %v1398_v51  ;;  %v321_v7 = vmul.f32 %v1410_v62, %v1410_v62 }
 0x140   :  { %1078 = vtanh.f32 %v394_v0  ;;  %v395_v9 = vmul.f32 0.7978846, %v375_v1  ;;  %v338_v10 = vmul.f32 %v318_v2, %v1403_v56  ;;  %v319_v11 = vmul.f32 %v1416_v3, %v1416_v3 }
 0x141   :  { %1080 = vtanh.f32 %v397_v5  ;;  %v360_v13 = vmul.f32 0.044715, %v340_v6  ;;  %v341_v14 = vmul.f32 %v321_v7, %v1410_v62  ;;  %v408_v60 = vmul.f32 0.7978846, %v388_v37 }
 0x142   :  { %1082 = vtanh.f32 %v395_v9  ;;  %v358_v17 = vmul.f32 0.044715, %v338_v10  ;;  %v339_v18 = vmul.f32 %v319_v11, %v1416_v3  ;;  %v1031_v21 = vpop.f32.mrb[8].mxu0  ;;  %v386_v9 = vadd.f32 %v366_v31, %v1385_v38 }
 0x143   :  { %v380_v25 = vadd.f32 %v360_v13, %v1398_v51  ;;  %v361_v26 = vmul.f32 0.044715, %v341_v14  ;;  %v1439_v28 = vadd.f32 %v1031_v21, %v1357_v20  ;;  %v267_v29 = vpop.f32.mrb[9].mxu0 }
 0x144   :  { %v378_v32 = vadd.f32 %v358_v17, %v1403_v56  ;;  %v359_v33 = vmul.f32 0.044715, %v339_v18  ;;  %v1443_v35 = vadd.f32 %v1357_v20, %v267_v29  ;;  %v1032_v36 = vpop.f32.mrb[10].mxu0 }
 0x145   :  { %v400_v39 = vmul.f32 0.7978846, %v380_v25  ;;  %v381_v40 = vadd.f32 %v361_v26, %v1410_v62  ;;  %v324_v41 = vmul.f32 %v1439_v28, %v1439_v28  ;;  %v1450_v42 = vadd.f32 %v1032_v36, %v1357_v20  ;;  %v270_v43 = vpop.f32.mrb[11].mxu0 }
 0x146   :  { %v398_v44 = vmul.f32 0.7978846, %v378_v32  ;;  %v379_v45 = vadd.f32 %v359_v33, %v1416_v3  ;;  %v322_v46 = vmul.f32 %v1443_v35, %v1443_v35  ;;  %v1456_v47 = vadd.f32 %v1357_v20, %v270_v43 }
 0x147   :  { %1084 = vtanh.f32 %v400_v39  ;;  %v401_v49 = vmul.f32 0.7978846, %v381_v40  ;;  %v344_v50 = vmul.f32 %v324_v41, %v1439_v28  ;;  %v325_v52 = vmul.f32 %v1450_v42, %v1450_v42 }
 0x148   :  { %1086 = vtanh.f32 %v398_v44  ;;  %v399_v53 = vmul.f32 0.7978846, %v379_v45  ;;  %v342_v54 = vmul.f32 %v322_v46, %v1443_v35  ;;  %v323_v55 = vmul.f32 %v1456_v47, %v1456_v47 }
 0x149   :  { %v1077_v57 = vpop.eup %1076  ;;  %1088 = vtanh.f32 %v401_v49  ;;  %v364_v58 = vmul.f32 0.044715, %v344_v50  ;;  %v345_v59 = vmul.f32 %v325_v52, %v1450_v42  ;;  %v406_v39 = vmul.f32 0.7978846, %v386_v9 }
 0x14a   :  { %v1079_v61 = vpop.eup %1078  ;;  %v436_v63 = vadd.f32 1.0, %v1077_v57  ;;  %1090 = vtanh.f32 %v399_v53  ;;  %v362_v0 = vmul.f32 0.044715, %v342_v54  ;;  %v343_v1 = vmul.f32 %v323_v55, %v1456_v47 }
 0x14b   :  { %v1081_v2 = vpop.eup %1080  ;;  %v434_v5 = vadd.f32 1.0, %v1079_v61  ;;  %v384_v6 = vadd.f32 %v364_v58, %v1439_v28  ;;  %v365_v7 = vmul.f32 0.044715, %v345_v59  ;;  %1092 = vtanh.f32 %v408_v60 }
 0x14c   :  { %v1083_v10 = vpop.eup %1082  ;;  %v437_v11 = vadd.f32 1.0, %v1081_v2  ;;  %v382_v13 = vadd.f32 %v362_v0, %v1443_v35  ;;  %v363_v14 = vmul.f32 0.044715, %v343_v1  ;;  %v456_v25 = vmul.f32 0.5, %v436_v63 }
 0x14d   :  { %v454_v15 = vmul.f32 0.5, %v434_v5  ;;  %v435_v17 = vadd.f32 1.0, %v1083_v10  ;;  %v404_v18 = vmul.f32 0.7978846, %v384_v6  ;;  %v385_v21 = vadd.f32 %v365_v7, %v1450_v42 }
 0x14e   :  { %v402_v26 = vmul.f32 0.7978846, %v382_v13  ;;  %v383_v29 = vadd.f32 %v363_v14, %v1456_v47  ;;  %v457_v32 = vmul.f32 0.5, %v437_v11  ;;  %v329_v43 = vmul.f32 %v1394_v48, %v1394_v48 }
 0x14f   :  { %v455_v33 = vmul.f32 0.5, %v435_v17  ;;  %1094 = vtanh.f32 %v404_v18  ;;  %v405_v31 = vmul.f32 0.7978846, %v385_v21  ;;  %v474_v36 = vmul.f32 %v454_v15, %v1363_v24 }
 0x150   :  { %1096 = vtanh.f32 %v402_v26  ;;  %v403_v37 = vmul.f32 0.7978846, %v383_v29  ;;  %v327_v44 = vmul.f32 %v1435_v23, %v1435_v23  ;;  %v1479_v49 = vadd.f32 %v1418_v4, %v1357_v20 }
 0x151   :  { %v1085_v40 = vpop.eup %1084  ;;  %v475_v41 = vmul.f32 %v455_v33, %v1373_v30  ;;  %1098 = vtanh.f32 %v405_v31  ;;  %v1483_v24 = vadd.f32 %v1357_v20, %v1423_v8  ;;  %v349_v53 = vmul.f32 %v329_v43, %v1394_v48 }
 0x152   :  { %v1087_v45 = vpop.eup %1086  ;;  %v440_v46 = vadd.f32 1.0, %v1085_v40  ;;  %1100 = vtanh.f32 %v403_v37  ;;  %v347_v58 = vmul.f32 %v327_v44, %v1435_v23  ;;  %v332_v59 = vmul.f32 %v1479_v49, %v1479_v49 }
 0x153   :  { %v1089_v50 = vpop.eup %1088  ;;  %v494_v30 = vpack.c.bf16 %v475_v41, %v474_v36  ;;  %v438_v52 = vadd.f32 1.0, %v1087_v45  ;;  %1102 = vtanh.f32 %v406_v39  ;;  %v369_v60 = vmul.f32 0.044715, %v349_v53 }
 0x154   :  { %v1091_v54 = vpop.eup %1090  ;;  %v460_v55 = vmul.f32 0.5, %v440_v46  ;;  %v441_v57 = vadd.f32 1.0, %v1089_v50  ;;  %v330_v8 = vmul.f32 %v1483_v24, %v1483_v24  ;;  %v476_v63 = vmul.f32 %v456_v25, %v1360_v22 }
 0x155   :  { %v439_v4 = vadd.f32 1.0, %v1091_v54  ;;  %988 = vmatmul.mubr.msk.bf16.vlgmr.msra.gmra.mrb[8].mxu1 %vm574_vm1, %v494_v30  ;;  %998 = vmatmul.mubr.msk.bf16.vlgmr.msra.gmra.mrb[12].mxu0 %vm574_vm1, %v494_v30  ;;  %v1093_v61 = vpop.eup %1092  ;;  %v477_v0 = vmul.f32 %v457_v32, %v1368_v27  ;;  %v367_v1 = vmul.f32 0.044715, %v347_v58  ;;  %v458_v2 = vmul.f32 0.5, %v438_v52 }
 0x156   :  { %647 = vmatprep.mubr.bf16.mxu1 %v1241_v19  ;;  %780 = vmatprep.mubr.bf16.mxu0 %v1241_v19  ;;  %v389_v6 = vadd.f32 %v369_v60, %v1394_v48  ;;  %v352_v7 = vmul.f32 %v332_v59, %v1479_v49  ;;  %v480_v9 = vmul.f32 %v460_v55, %v1398_v51  ;;  %v461_v10 = vmul.f32 0.5, %v441_v57 }
 0x157   :  { %v459_v5 = vmul.f32 0.5, %v439_v4  ;;  %v387_v11 = vadd.f32 %v367_v1, %v1435_v23  ;;  %v350_v22 = vmul.f32 %v330_v8, %v1483_v24  ;;  %v448_v27 = vadd.f32 1.0, %v1093_v61 }
 0x158   :  { %v409_v14 = vmul.f32 0.7978846, %v389_v6  ;;  %v372_v15 = vmul.f32 0.044715, %v352_v7  ;;  %v1504_v17 = vadd.f32 %v1428_v12, %v1357_v20  ;;  %v478_v45 = vmul.f32 %v458_v2, %v1403_v56 }
 0x159   :  { %v1095_v13 = vpop.eup %1094  ;;  %v479_v21 = vmul.f32 %v459_v5, %v1416_v3  ;;  %v407_v26 = vmul.f32 0.7978846, %v387_v11  ;;  %v370_v29 = vmul.f32 0.044715, %v350_v22  ;;  %v481_v46 = vmul.f32 %v461_v10, %v1410_v62 }
 0x15a   :  { %v1097_v18 = vpop.eup %1096  ;;  %v444_v25 = vadd.f32 1.0, %v1095_v13  ;;  %1104 = vtanh.f32 %v409_v14  ;;  %v392_v33 = vadd.f32 %v372_v15, %v1479_v49  ;;  %v333_v31 = vmul.f32 %v1504_v17, %v1504_v17 }
 0x15b   :  { %v1099_v51 = vpop.eup %1098  ;;  %v442_v32 = vadd.f32 1.0, %v1097_v18  ;;  %1106 = vtanh.f32 %v407_v26  ;;  %v390_v12 = vadd.f32 %v370_v29, %v1483_v24  ;;  %v303_v59 = vadd.f32 %v1357_v20, %v1431_v16 }
 0x15c   :  { %v1101_v36 = vpop.eup %1100  ;;  %v464_v37 = vmul.f32 0.5, %v444_v25  ;;  %v445_v39 = vadd.f32 1.0, %v1099_v51  ;;  %v412_v43 = vmul.f32 0.7978846, %v392_v33  ;;  %v353_v44 = vmul.f32 %v333_v31, %v1504_v17 }
 0x15d   :  { %v1103_v40 = vpop.eup %1102  ;;  %v462_v41 = vmul.f32 0.5, %v442_v32  ;;  %v443_v3 = vadd.f32 1.0, %v1101_v36  ;;  %v410_v58 = vmul.f32 0.7978846, %v390_v12  ;;  %v495_v62 = vpack.c.bf16 %v477_v0, %v476_v63 }
 0x15e   :  { %v484_v50 = vmul.f32 %v464_v37, %v1439_v28  ;;  %v465_v30 = vmul.f32 0.5, %v445_v39  ;;  %v446_v53 = vadd.f32 1.0, %v1103_v40  ;;  %1108 = vtanh.f32 %v412_v43 }
 0x15f   :  { %v463_v52 = vmul.f32 0.5, %v443_v3  ;;  %v373_v54 = vmul.f32 0.044715, %v353_v44  ;;  %v482_v55 = vmul.f32 %v462_v41, %v1443_v35  ;;  %v496_v60 = vpack.c.bf16 %v479_v21, %v478_v45  ;;  %989 = vmatmul.mubr.msk.bf16.gmra.mrb[12].mxu1 %vm574_vm1, %v495_v62  ;;  %999 = vmatmul.mubr.msk.bf16.gmra.mrb[16].mxu0 %vm574_vm1, %v495_v62  ;;  %v512_v3 = vld [vmem:[#allocation9] sm:$0xf] }
 0x160   :  { %v485_v57 = vmul.f32 %v465_v30, %v1450_v42  ;;  %v331_v28 = vmul.f32 %v303_v59, %v303_v59  ;;  %v497_v8 = vpack.c.bf16 %v481_v46, %v480_v9  ;;  %v468_v42 = vmul.f32 0.5, %v448_v27  ;;  %657 = vmatprep.mubr.bf16.mxu1 %v1241_v19  ;;  %790 = vmatprep.mubr.bf16.mxu0 %v1241_v19 }
 0x161   :  { %v483_v4 = vmul.f32 %v463_v52, %v1456_v47  ;;  %v393_v56 = vadd.f32 %v373_v54, %v1504_v17  ;;  %1110 = vtanh.f32 %v410_v58  ;;  %v466_v16 = vmul.f32 0.5, %v446_v53 }
 0x162   :  { %v499_v61 = vpack.c.bf16 %v485_v57, %v484_v50  ;;  %v351_v2 = vmul.f32 %v331_v28, %v303_v59  ;;  %v488_v6 = vmul.f32 %v468_v42, %v1379_v34 }
 0x163   :  { %v413_v1 = vmul.f32 0.7978846, %v393_v56  ;;  %v498_v35 = vpack.c.bf16 %v483_v4, %v482_v55  ;;  %v486_v11 = vmul.f32 %v466_v16, %v1385_v38 }
 0x164   :  { %v1105_v20 = vpop.eup %1104  ;;  %v371_v0 = vmul.f32 0.044715, %v351_v2 }
 0x165   :  { %1112 = vtanh.f32 %v413_v1  ;;  %v1107_v47 = vpop.eup %1106  ;;  %v449_v63 = vadd.f32 1.0, %v1105_v20 }
 0x166   :  { %v447_v5 = vadd.f32 1.0, %v1107_v47  ;;  %v391_v9 = vadd.f32 %v371_v0, %v303_v59 }
 0x167   :  { %v469_v7 = vmul.f32 0.5, %v449_v63  ;;  %990 = vmatmul.mubr.msk.bf16.gmra.mrb[16].mxu1 %vm574_vm1, %v496_v60  ;;  %1000 = vmatmul.mubr.msk.bf16.gmra.mrb[20].mxu0 %vm574_vm1, %v496_v60 }
 0x168   :  { %v1109_v10 = vpop.eup %1108  ;;  %v467_v22 = vmul.f32 0.5, %v447_v5  ;;  %v411_v14 = vmul.f32 0.7978846, %v391_v9  ;;  %667 = vmatprep.mubr.bf16.mxu1 %v1241_v19  ;;  %800 = vmatprep.mubr.bf16.mxu0 %v1241_v19 }
 0x169   :  { %v489_v13 = vmul.f32 %v469_v7, %v1394_v48  ;;  %v452_v27 = vadd.f32 1.0, %v1109_v10 }
 0x16a   :  { %v487_v15 = vmul.f32 %v467_v22, %v1435_v23  ;;  %1114 = vtanh.f32 %v411_v14 }
 0x16b   :  { %v501_v34 = vpack.c.bf16 %v489_v13, %v488_v6  ;;  %v1111_v21 = vpop.eup %1110  ;;  %v472_v38 = vmul.f32 0.5, %v452_v27 }
 0x16c   :  { %v500_v18 = vpack.c.bf16 %v487_v15, %v486_v11  ;;  %v450_v48 = vadd.f32 1.0, %v1111_v21 }
 0x16d   :  { %v492_v29 = vmul.f32 %v472_v38, %v1479_v49 }
 0x16e   :  { %v470_v32 = vmul.f32 0.5, %v450_v48 }
 0x16f   :  { %v1113_v25 = vpop.eup %1112  ;;  %991 = vmatmul.mubr.msk.bf16.gmra.mrb[20].mxu1 %vm574_vm1, %v497_v8  ;;  %1001 = vmatmul.mubr.msk.bf16.gmra.mrb[24].mxu0 %vm574_vm1, %v497_v8 }
 0x170   :  { %v453_v26 = vadd.f32 1.0, %v1113_v25  ;;  %677 = vmatprep.mubr.bf16.mxu1 %v1241_v19  ;;  %810 = vmatprep.mubr.bf16.mxu0 %v1241_v19  ;;  %v490_v37 = vmul.f32 %v470_v32, %v1483_v24  ;;  %v514_v24 = vlaneseq }
 0x172   :  { %v473_v51 = vmul.f32 0.5, %v453_v26 }
 0x174   :  { %v493_v23 = vmul.f32 %v473_v51, %v1504_v17  ;;  %v1115_v33 = vpop.eup %1114  ;;  %v515_v17 = vshrl.u32 %v514_v24, 7 }
 0x175   :  { %v451_v36 = vadd.f32 1.0, %v1115_v33 }
 0x176   :  { %v503_v31 = vpack.c.bf16 %v493_v23, %v492_v29  ;;  %v516_v40 = vsub.s32 0, %v515_v17  ;;  %v524_v41 = vsub.s32 2, %v515_v17  ;;  %v520_v43 = vsub.s32 1, %v515_v17 }
 0x177   :  { %v471_v39 = vmul.f32 0.5, %v451_v36  ;;  %992 = vmatmul.mubr.msk.bf16.gmra.mrb[24].mxu1 %vm574_vm1, %v498_v35  ;;  %1002 = vmatmul.mubr.msk.bf16.gmra.mrb[28].mxu0 %vm574_vm1, %v498_v35  ;;  %v528_v44 = vsub.s32 3, %v515_v17 }
 0x178   :  { %687 = vmatprep.mubr.bf16.mxu1 %v1241_v19  ;;  %820 = vmatprep.mubr.bf16.mxu0 %v1241_v19  ;;  %v1562_v45 = vrot.slane %v512_v3, %v516_v40  ;;  %v1564_v46 = vrot.slane %v512_v3, %v524_v41  ;;  %v1566_v50 = vrot.slane %v512_v3, %v520_v43 }
 0x179   :  { %v491_v12 = vmul.f32 %v471_v39, %v303_v59  ;;  %v1568_v30 = vrot.slane %v512_v3, %v528_v44 }
 0x17b   :  { %v502_v49 = vpack.c.bf16 %v491_v12, %v490_v37 }
 0x17f   :  { %993 = vmatmul.mubr.msk.bf16.gmra.mrb[28].mxu1 %vm574_vm1, %v499_v61  ;;  %1003 = vmatmul.mubr.msk.bf16.gmra.mrb[32].mxu0 %vm574_vm1, %v499_v61 }
 0x180   :  { %697 = vmatprep.mubr.bf16.mxu1 %v1241_v19  ;;  %830 = vmatprep.mubr.bf16.mxu0 %v1241_v19 }
 0x187   :  { %994 = vmatmul.mubr.msk.bf16.gmra.mrb[32].mxu1 %vm574_vm1, %v500_v18  ;;  %1004 = vmatmul.mubr.msk.bf16.gmra.mrb[36].mxu0 %vm574_vm1, %v500_v18 }
 0x188   :  { %707 = vmatprep.mubr.bf16.mxu1 %v1241_v19  ;;  %840 = vmatprep.mubr.bf16.mxu0 %v1241_v19 }
 0x18f   :  { %995 = vmatmul.mubr.msk.bf16.gmra.mrb[36].mxu1 %vm574_vm1, %v501_v34  ;;  %1005 = vmatmul.mubr.msk.bf16.gmra.mrb[40].mxu0 %vm574_vm1, %v501_v34 }
 0x190   :  { %717 = vmatprep.mubr.bf16.mxu1 %v1241_v19  ;;  %850 = vmatprep.mubr.bf16.mxu0 %v1241_v19 }
 0x197   :  { %996 = vmatmul.mubr.msk.bf16.gmra.mrb[40].mxu1 %vm574_vm1, %v502_v49  ;;  %1006 = vmatmul.mubr.msk.bf16.gmra.mrb[44].mxu0 %vm574_vm1, %v502_v49 }
 0x198   :  { %727 = vmatprep.mubr.bf16.mxu1 %v1241_v19  ;;  %860 = vmatprep.mubr.bf16.mxu0 %v1241_v19 }
 0x19f   :  { %997 = vmatmul.mubr.msk.bf16.gmra.mrb[44].mxu1 %vm574_vm1, %v503_v31  ;;  %1007 = vmatmul.mubr.msk.bf16.gmra.mrb[48].mxu0 %vm574_vm1, %v503_v31 }
 0x228   :  { %v639_v19 = vpop.f32.mrb[8].mxu1  ;;  %v772_v52 = vpop.f32.mrb[12].mxu0 }
 0x229   :  { %v640_v53 = vadd.f32 %v639_v19, %v1562_v45  ;;  %v773_v54 = vadd.f32 %v772_v52, %v1564_v46  ;;  %v641_v55 = vpop.f32.mrb[9].mxu1  ;;  %v774_v57 = vpop.f32.mrb[13].mxu0 }
 0x22a   :  { %v642_v58 = vadd.f32 %v641_v55, %v1566_v50  ;;  %v775_v59 = vadd.f32 %v774_v57, %v1568_v30  ;;  %v643_v4 = vpop.f32.mrb[10].mxu1  ;;  %v776_v56 = vpop.f32.mrb[14].mxu0 }
 0x22b   :  { %871 = vst [vmem:[%s1895_s5] sm:$0xff] %v640_v53  ;;  %873 = vst [vmem:[%s1895_s5 + $0x10] sm:$0xff] %v773_v54  ;;  %v644_v62 = vadd.f32 %v643_v4, %v1562_v45  ;;  %v777_v60 = vadd.f32 %v776_v56, %v1564_v46  ;;  %v645_v28 = vpop.f32.mrb[11].mxu1  ;;  %v778_v8 = vpop.f32.mrb[15].mxu0 }
 0x22c   :  { %872 = vst [vmem:[%s1895_s5 + $0x8] sm:$0xff] %v642_v58  ;;  %874 = vst [vmem:[%s1895_s5 + $0x18] sm:$0xff] %v775_v59  ;;  %v646_v61 = vadd.f32 %v645_v28, %v1566_v50  ;;  %v779_v1 = vadd.f32 %v778_v8, %v1568_v30 }
 0x22d   :  { %875 = vst [vmem:[%s1895_s5 + $0x20] sm:$0xff] %v644_v62  ;;  %877 = vst [vmem:[%s1895_s5 + $0x30] sm:$0xff] %v777_v60 }
 0x22e   :  { %876 = vst [vmem:[%s1895_s5 + $0x28] sm:$0xff] %v646_v61  ;;  %878 = vst [vmem:[%s1895_s5 + $0x38] sm:$0xff] %v779_v1 }
 0x232   :  { %v649_v35 = vpop.f32.mrb[12].mxu1  ;;  %v782_v42 = vpop.f32.mrb[16].mxu0 }
 0x233   :  { %v650_v2 = vadd.f32 %v649_v35, %v1562_v45  ;;  %v783_v20 = vadd.f32 %v782_v42, %v1564_v46  ;;  %v651_v16 = vpop.f32.mrb[13].mxu1  ;;  %v784_v47 = vpop.f32.mrb[17].mxu0 }
 0x234   :  { %v652_v63 = vadd.f32 %v651_v16, %v1566_v50  ;;  %v785_v0 = vadd.f32 %v784_v47, %v1568_v30  ;;  %v653_v5 = vpop.f32.mrb[14].mxu1  ;;  %v786_v6 = vpop.f32.mrb[18].mxu0 }
 0x235   :  { %879 = vst [vmem:[%s1895_s5 + $0x40] sm:$0xff] %v650_v2  ;;  %881 = vst [vmem:[%s1895_s5 + $0x50] sm:$0xff] %v783_v20  ;;  %v654_v7 = vadd.f32 %v653_v5, %v1562_v45  ;;  %v787_v9 = vadd.f32 %v786_v6, %v1564_v46  ;;  %v655_v10 = vpop.f32.mrb[15].mxu1  ;;  %v788_v11 = vpop.f32.mrb[19].mxu0 }
 0x236   :  { %880 = vst [vmem:[%s1895_s5 + $0x48] sm:$0xff] %v652_v63  ;;  %882 = vst [vmem:[%s1895_s5 + $0x58] sm:$0xff] %v785_v0  ;;  %v656_v22 = vadd.f32 %v655_v10, %v1566_v50  ;;  %v789_v13 = vadd.f32 %v788_v11, %v1568_v30 }
 0x237   :  { %883 = vst [vmem:[%s1895_s5 + $0x60] sm:$0xff] %v654_v7  ;;  %885 = vst [vmem:[%s1895_s5 + $0x70] sm:$0xff] %v787_v9 }
 0x238   :  { %884 = vst [vmem:[%s1895_s5 + $0x68] sm:$0xff] %v656_v22  ;;  %886 = vst [vmem:[%s1895_s5 + $0x78] sm:$0xff] %v789_v13 }
 0x23a   :  { %v659_v27 = vpop.f32.mrb[16].mxu1  ;;  %v792_v14 = vpop.f32.mrb[20].mxu0 }
 0x23b   :  { %v660_v15 = vadd.f32 %v659_v27, %v1562_v45  ;;  %v793_v34 = vadd.f32 %v792_v14, %v1564_v46  ;;  %v661_v18 = vpop.f32.mrb[17].mxu1  ;;  %v794_v21 = vpop.f32.mrb[21].mxu0 }
 0x23c   :  { %v662_v38 = vadd.f32 %v661_v18, %v1566_v50  ;;  %v795_v25 = vadd.f32 %v794_v21, %v1568_v30  ;;  %v663_v26 = vpop.f32.mrb[18].mxu1  ;;  %v796_v48 = vpop.f32.mrb[22].mxu0 }
 0x23d   :  { %887 = vst [vmem:[%s1895_s5 + $0x80] sm:$0xff] %v660_v15  ;;  %889 = vst [vmem:[%s1895_s5 + $0x90] sm:$0xff] %v793_v34  ;;  %v664_v29 = vadd.f32 %v663_v26, %v1562_v45  ;;  %v797_v51 = vadd.f32 %v796_v48, %v1564_v46  ;;  %v665_v23 = vpop.f32.mrb[19].mxu1  ;;  %v798_v32 = vpop.f32.mrb[23].mxu0 }
 0x23e   :  { %888 = vst [vmem:[%s1895_s5 + $0x88] sm:$0xff] %v662_v38  ;;  %890 = vst [vmem:[%s1895_s5 + $0x98] sm:$0xff] %v795_v25  ;;  %v666_v33 = vadd.f32 %v665_v23, %v1566_v50  ;;  %v799_v31 = vadd.f32 %v798_v32, %v1568_v30 }
 0x23f   :  { %891 = vst [vmem:[%s1895_s5 + $0xa0] sm:$0xff] %v664_v29  ;;  %893 = vst [vmem:[%s1895_s5 + $0xb0] sm:$0xff] %v797_v51 }
 0x240   :  { %892 = vst [vmem:[%s1895_s5 + $0xa8] sm:$0xff] %v666_v33  ;;  %894 = vst [vmem:[%s1895_s5 + $0xb8] sm:$0xff] %v799_v31 }
 0x242   :  { %v669_v36 = vpop.f32.mrb[20].mxu1  ;;  %v802_v37 = vpop.f32.mrb[24].mxu0 }
 0x243   :  { %v670_v39 = vadd.f32 %v669_v36, %v1562_v45  ;;  %v803_v12 = vadd.f32 %v802_v37, %v1564_v46  ;;  %v671_v49 = vpop.f32.mrb[21].mxu1  ;;  %v804_v24 = vpop.f32.mrb[25].mxu0 }
 0x244   :  { %v672_v17 = vadd.f32 %v671_v49, %v1566_v50  ;;  %v805_v40 = vadd.f32 %v804_v24, %v1568_v30  ;;  %v673_v41 = vpop.f32.mrb[22].mxu1  ;;  %v806_v3 = vpop.f32.mrb[26].mxu0 }
 0x245   :  { %895 = vst [vmem:[%s1895_s5 + $0xc0] sm:$0xff] %v670_v39  ;;  %897 = vst [vmem:[%s1895_s5 + $0xd0] sm:$0xff] %v803_v12  ;;  %v674_v43 = vadd.f32 %v673_v41, %v1562_v45  ;;  %v807_v44 = vadd.f32 %v806_v3, %v1564_v46  ;;  %v675_v19 = vpop.f32.mrb[23].mxu1  ;;  %v808_v52 = vpop.f32.mrb[27].mxu0 }
 0x246   :  { %896 = vst [vmem:[%s1895_s5 + $0xc8] sm:$0xff] %v672_v17  ;;  %898 = vst [vmem:[%s1895_s5 + $0xd8] sm:$0xff] %v805_v40  ;;  %v676_v53 = vadd.f32 %v675_v19, %v1566_v50  ;;  %v809_v54 = vadd.f32 %v808_v52, %v1568_v30 }
 0x247   :  { %899 = vst [vmem:[%s1895_s5 + $0xe0] sm:$0xff] %v674_v43  ;;  %901 = vst [vmem:[%s1895_s5 + $0xf0] sm:$0xff] %v807_v44 }
 0x248   :  { %900 = vst [vmem:[%s1895_s5 + $0xe8] sm:$0xff] %v676_v53  ;;  %902 = vst [vmem:[%s1895_s5 + $0xf8] sm:$0xff] %v809_v54 }
 0x24a   :  { %v679_v55 = vpop.f32.mrb[24].mxu1  ;;  %v812_v57 = vpop.f32.mrb[28].mxu0 }
 0x24b   :  { %v680_v58 = vadd.f32 %v679_v55, %v1562_v45  ;;  %v813_v59 = vadd.f32 %v812_v57, %v1564_v46  ;;  %v681_v4 = vpop.f32.mrb[25].mxu1  ;;  %v814_v56 = vpop.f32.mrb[29].mxu0 }
 0x24c   :  { %v682_v62 = vadd.f32 %v681_v4, %v1566_v50  ;;  %v815_v60 = vadd.f32 %v814_v56, %v1568_v30  ;;  %v683_v28 = vpop.f32.mrb[26].mxu1  ;;  %v816_v8 = vpop.f32.mrb[30].mxu0 }
 0x24d   :  { %903 = vst [vmem:[%s1895_s5 + $0x100] sm:$0xff] %v680_v58  ;;  %905 = vst [vmem:[%s1895_s5 + $0x110] sm:$0xff] %v813_v59  ;;  %v684_v61 = vadd.f32 %v683_v28, %v1562_v45  ;;  %v817_v1 = vadd.f32 %v816_v8, %v1564_v46  ;;  %v685_v35 = vpop.f32.mrb[27].mxu1  ;;  %v818_v42 = vpop.f32.mrb[31].mxu0 }
 0x24e   :  { %904 = vst [vmem:[%s1895_s5 + $0x108] sm:$0xff] %v682_v62  ;;  %906 = vst [vmem:[%s1895_s5 + $0x118] sm:$0xff] %v815_v60  ;;  %v686_v2 = vadd.f32 %v685_v35, %v1566_v50  ;;  %v819_v20 = vadd.f32 %v818_v42, %v1568_v30 }
 0x24f   :  { %907 = vst [vmem:[%s1895_s5 + $0x120] sm:$0xff] %v684_v61  ;;  %909 = vst [vmem:[%s1895_s5 + $0x130] sm:$0xff] %v817_v1 }
 0x250   :  { %908 = vst [vmem:[%s1895_s5 + $0x128] sm:$0xff] %v686_v2  ;;  %910 = vst [vmem:[%s1895_s5 + $0x138] sm:$0xff] %v819_v20 }
 0x252   :  { %v689_v16 = vpop.f32.mrb[28].mxu1  ;;  %v822_v47 = vpop.f32.mrb[32].mxu0 }
 0x253   :  { %v690_v63 = vadd.f32 %v689_v16, %v1562_v45  ;;  %v823_v0 = vadd.f32 %v822_v47, %v1564_v46  ;;  %v691_v5 = vpop.f32.mrb[29].mxu1  ;;  %v824_v6 = vpop.f32.mrb[33].mxu0 }
 0x254   :  { %v692_v7 = vadd.f32 %v691_v5, %v1566_v50  ;;  %v825_v9 = vadd.f32 %v824_v6, %v1568_v30  ;;  %v693_v10 = vpop.f32.mrb[30].mxu1  ;;  %v826_v11 = vpop.f32.mrb[34].mxu0 }
 0x255   :  { %911 = vst [vmem:[%s1895_s5 + $0x140] sm:$0xff] %v690_v63  ;;  %913 = vst [vmem:[%s1895_s5 + $0x150] sm:$0xff] %v823_v0  ;;  %v694_v22 = vadd.f32 %v693_v10, %v1562_v45  ;;  %v827_v13 = vadd.f32 %v826_v11, %v1564_v46  ;;  %v695_v27 = vpop.f32.mrb[31].mxu1  ;;  %v828_v14 = vpop.f32.mrb[35].mxu0 }
 0x256   :  { %912 = vst [vmem:[%s1895_s5 + $0x148] sm:$0xff] %v692_v7  ;;  %914 = vst [vmem:[%s1895_s5 + $0x158] sm:$0xff] %v825_v9  ;;  %v696_v15 = vadd.f32 %v695_v27, %v1566_v50  ;;  %v829_v34 = vadd.f32 %v828_v14, %v1568_v30 }
 0x257   :  { %915 = vst [vmem:[%s1895_s5 + $0x160] sm:$0xff] %v694_v22  ;;  %917 = vst [vmem:[%s1895_s5 + $0x170] sm:$0xff] %v827_v13 }
 0x258   :  { %916 = vst [vmem:[%s1895_s5 + $0x168] sm:$0xff] %v696_v15  ;;  %918 = vst [vmem:[%s1895_s5 + $0x178] sm:$0xff] %v829_v34 }
 0x25a   :  { %v699_v18 = vpop.f32.mrb[32].mxu1  ;;  %v832_v21 = vpop.f32.mrb[36].mxu0 }
 0x25b   :  { %v700_v38 = vadd.f32 %v699_v18, %v1562_v45  ;;  %v833_v25 = vadd.f32 %v832_v21, %v1564_v46  ;;  %v701_v26 = vpop.f32.mrb[33].mxu1  ;;  %v834_v48 = vpop.f32.mrb[37].mxu0 }
 0x25c   :  { %v702_v29 = vadd.f32 %v701_v26, %v1566_v50  ;;  %v835_v51 = vadd.f32 %v834_v48, %v1568_v30  ;;  %v703_v23 = vpop.f32.mrb[34].mxu1  ;;  %v836_v32 = vpop.f32.mrb[38].mxu0 }
 0x25d   :  { %919 = vst [vmem:[%s1895_s5 + $0x180] sm:$0xff] %v700_v38  ;;  %921 = vst [vmem:[%s1895_s5 + $0x190] sm:$0xff] %v833_v25  ;;  %v704_v33 = vadd.f32 %v703_v23, %v1562_v45  ;;  %v837_v31 = vadd.f32 %v836_v32, %v1564_v46  ;;  %v705_v36 = vpop.f32.mrb[35].mxu1  ;;  %v838_v37 = vpop.f32.mrb[39].mxu0 }
 0x25e   :  { %920 = vst [vmem:[%s1895_s5 + $0x188] sm:$0xff] %v702_v29  ;;  %922 = vst [vmem:[%s1895_s5 + $0x198] sm:$0xff] %v835_v51  ;;  %v706_v39 = vadd.f32 %v705_v36, %v1566_v50  ;;  %v839_v12 = vadd.f32 %v838_v37, %v1568_v30 }
 0x25f   :  { %923 = vst [vmem:[%s1895_s5 + $0x1a0] sm:$0xff] %v704_v33  ;;  %925 = vst [vmem:[%s1895_s5 + $0x1b0] sm:$0xff] %v837_v31 }
 0x260   :  { %924 = vst [vmem:[%s1895_s5 + $0x1a8] sm:$0xff] %v706_v39  ;;  %926 = vst [vmem:[%s1895_s5 + $0x1b8] sm:$0xff] %v839_v12 }
 0x262   :  { %v709_v49 = vpop.f32.mrb[36].mxu1  ;;  %v842_v24 = vpop.f32.mrb[40].mxu0 }
 0x263   :  { %v710_v17 = vadd.f32 %v709_v49, %v1562_v45  ;;  %v843_v40 = vadd.f32 %v842_v24, %v1564_v46  ;;  %v711_v41 = vpop.f32.mrb[37].mxu1  ;;  %v844_v3 = vpop.f32.mrb[41].mxu0 }
 0x264   :  { %v712_v43 = vadd.f32 %v711_v41, %v1566_v50  ;;  %v845_v44 = vadd.f32 %v844_v3, %v1568_v30  ;;  %v713_v19 = vpop.f32.mrb[38].mxu1  ;;  %v846_v52 = vpop.f32.mrb[42].mxu0 }
 0x265   :  { %927 = vst [vmem:[%s1895_s5 + $0x1c0] sm:$0xff] %v710_v17  ;;  %929 = vst [vmem:[%s1895_s5 + $0x1d0] sm:$0xff] %v843_v40  ;;  %v714_v53 = vadd.f32 %v713_v19, %v1562_v45  ;;  %v847_v54 = vadd.f32 %v846_v52, %v1564_v46  ;;  %v715_v55 = vpop.f32.mrb[39].mxu1  ;;  %v848_v57 = vpop.f32.mrb[43].mxu0 }
 0x266   :  { %928 = vst [vmem:[%s1895_s5 + $0x1c8] sm:$0xff] %v712_v43  ;;  %930 = vst [vmem:[%s1895_s5 + $0x1d8] sm:$0xff] %v845_v44  ;;  %v716_v58 = vadd.f32 %v715_v55, %v1566_v50  ;;  %v849_v59 = vadd.f32 %v848_v57, %v1568_v30 }
 0x267   :  { %931 = vst [vmem:[%s1895_s5 + $0x1e0] sm:$0xff] %v714_v53  ;;  %933 = vst [vmem:[%s1895_s5 + $0x1f0] sm:$0xff] %v847_v54 }
 0x268   :  { %932 = vst [vmem:[%s1895_s5 + $0x1e8] sm:$0xff] %v716_v58  ;;  %934 = vst [vmem:[%s1895_s5 + $0x1f8] sm:$0xff] %v849_v59 }
 0x26a   :  { %v719_v4 = vpop.f32.mrb[40].mxu1  ;;  %v852_v56 = vpop.f32.mrb[44].mxu0 }
 0x26b   :  { %v720_v62 = vadd.f32 %v719_v4, %v1562_v45  ;;  %v853_v60 = vadd.f32 %v852_v56, %v1564_v46  ;;  %v721_v28 = vpop.f32.mrb[41].mxu1  ;;  %v854_v8 = vpop.f32.mrb[45].mxu0 }
 0x26c   :  { %v722_v61 = vadd.f32 %v721_v28, %v1566_v50  ;;  %v855_v1 = vadd.f32 %v854_v8, %v1568_v30  ;;  %v723_v35 = vpop.f32.mrb[42].mxu1  ;;  %v856_v42 = vpop.f32.mrb[46].mxu0 }
 0x26d   :  { %935 = vst [vmem:[%s1895_s5 + $0x200] sm:$0xff] %v720_v62  ;;  %937 = vst [vmem:[%s1895_s5 + $0x210] sm:$0xff] %v853_v60  ;;  %v724_v2 = vadd.f32 %v723_v35, %v1562_v45  ;;  %v857_v20 = vadd.f32 %v856_v42, %v1564_v46  ;;  %v725_v16 = vpop.f32.mrb[43].mxu1  ;;  %v858_v47 = vpop.f32.mrb[47].mxu0 }
 0x26e   :  { %936 = vst [vmem:[%s1895_s5 + $0x208] sm:$0xff] %v722_v61  ;;  %938 = vst [vmem:[%s1895_s5 + $0x218] sm:$0xff] %v855_v1  ;;  %v726_v63 = vadd.f32 %v725_v16, %v1566_v50  ;;  %v859_v0 = vadd.f32 %v858_v47, %v1568_v30 }
 0x26f   :  { %939 = vst [vmem:[%s1895_s5 + $0x220] sm:$0xff] %v724_v2  ;;  %941 = vst [vmem:[%s1895_s5 + $0x230] sm:$0xff] %v857_v20 }
 0x270   :  { %940 = vst [vmem:[%s1895_s5 + $0x228] sm:$0xff] %v726_v63  ;;  %942 = vst [vmem:[%s1895_s5 + $0x238] sm:$0xff] %v859_v0 }
 0x272   :  { %v729_v5 = vpop.f32.mrb[44].mxu1  ;;  %v862_v6 = vpop.f32.mrb[48].mxu0 }
 0x273   :  { %v730_v7 = vadd.f32 %v729_v5, %v1562_v45  ;;  %v863_v9 = vadd.f32 %v862_v6, %v1564_v46  ;;  %v731_v10 = vpop.f32.mrb[45].mxu1  ;;  %v864_v11 = vpop.f32.mrb[49].mxu0 }
 0x274   :  { %v732_v22 = vadd.f32 %v731_v10, %v1566_v50  ;;  %v865_v13 = vadd.f32 %v864_v11, %v1568_v30  ;;  %v733_v27 = vpop.f32.mrb[46].mxu1  ;;  %v866_v14 = vpop.f32.mrb[50].mxu0 }
 0x275   :  { %943 = vst [vmem:[%s1895_s5 + $0x240] sm:$0xff] %v730_v7  ;;  %945 = vst [vmem:[%s1895_s5 + $0x250] sm:$0xff] %v863_v9  ;;  %v734_v15 = vadd.f32 %v733_v27, %v1562_v45  ;;  %v867_v34 = vadd.f32 %v866_v14, %v1564_v46  ;;  %v735_v18 = vpop.f32.mrb[47].mxu1  ;;  %v868_v21 = vpop.f32.mrb[51].mxu0 }
 0x276   :  { %944 = vst [vmem:[%s1895_s5 + $0x248] sm:$0xff] %v732_v22  ;;  %946 = vst [vmem:[%s1895_s5 + $0x258] sm:$0xff] %v865_v13  ;;  %v736_v38 = vadd.f32 %v735_v18, %v1566_v50  ;;  %v869_v25 = vadd.f32 %v868_v21, %v1568_v30 }
 0x277   :  { %947 = vst [vmem:[%s1895_s5 + $0x260] sm:$0xff] %v734_v15  ;;  %949 = vst [vmem:[%s1895_s5 + $0x270] sm:$0xff] %v867_v34 }
 0x278   :  { %948 = vst [vmem:[%s1895_s5 + $0x268] sm:$0xff] %v736_v38  ;;  %950 = vst [vmem:[%s1895_s5 + $0x278] sm:$0xff] %v869_v25 }
 0x279   :  { %955 = vsyncpa [#allocation3], 1 }
 0x27a   :  { %956 = vsyncpa [#allocation5], 1 }
 0x27b   :  { %957 = vsyncpa [#allocation8], 1 }

// kernel: _forward_core.3
= control target key start
LH: loop header
LB: loop body
LE: loop exit
PB: predicated region body
PF: predicated region fallthrough
CT: control target
= control target key end

     0   :  { %v3706_v7 = vmov 0.0   ;;  %v3707_v13 = vmov 0   ;;  %s4853_s0 = inlined_call_operand.vmem [shape: f32[10,16,512], index: 0, kind: input, shape index: {}]   ;;  %s4854_s1 = inlined_call_operand.vmem [shape: f32[128,512], index: 1, kind: input, shape index: {}]   ;;  %s4855_s2 = inlined_call_operand.vmem [shape: s32[16,1], index: 2, kind: input, shape index: {}]   ;;  %s4856_s3 = inlined_call_operand.hbm [shape: f32[16,128], index: 3, kind: output, shape index: {}]  }
   0x1   :  { %v26_v0 = vld [vmem:[%s4854_s1 + $0x8] sm:$0xff]  ;;  %v25_v2 = vld [vmem:[%s4854_s1] sm:$0xff]  ;;  %153 = vmatprep.mubr.f32.mxu0 %v3706_v7  ;;  %230 = vmatprep.mubr.f32.mxu1 %v3706_v7  ;;  %v28_v20 = vld [vmem:[%s4854_s1 + $0x18] sm:$0xff] }
   0x2   :  { %v30_v1 = vld [vmem:[%s4854_s1 + $0x28] sm:$0xff]  ;;  %v29_v4 = vld [vmem:[%s4854_s1 + $0x20] sm:$0xff]  ;;  %3355 = vset.pattern.permute.xlu0 %v3707_v13  ;;  %3356 = vset.pattern.permute.xlu1 %v3707_v13  ;;  %v32_v21 = vld [vmem:[%s4854_s1 + $0x38] sm:$0xff] }
   0x3   :  { %v3740_v3 = vpack.c.bf16 %v30_v1, %v26_v0  ;;  %v34_v5 = vld [vmem:[%s4854_s1 + $0x48] sm:$0xff]  ;;  %v3753_v8 = vpack.c.bf16 %v29_v4, %v25_v2  ;;  %v33_v10 = vld [vmem:[%s4854_s1 + $0x40] sm:$0xff]  ;;  %v3794_v23 = vpack.c.bf16 %v32_v21, %v28_v20  ;;  %v27_v24 = vld [vmem:[%s4854_s1 + $0x10] sm:$0xff] }
   0x4   :  { %v38_v6 = vld [vmem:[%s4854_s1 + $0x68] sm:$0xff]  ;;  %v37_v11 = vld [vmem:[%s4854_s1 + $0x60] sm:$0xff]  ;;  %v31_v25 = vld [vmem:[%s4854_s1 + $0x30] sm:$0xff] }
   0x5   :  { %v3755_v9 = vpack.c.bf16 %v38_v6, %v34_v5  ;;  %v42_v12 = vld [vmem:[%s4854_s1 + $0x88] sm:$0xff]  ;;  %2711 = vmatprep.subr.bf16.mxu0 %v3740_v3  ;;  %v3771_v15 = vpack.c.bf16 %v37_v11, %v33_v10  ;;  %v41_v16 = vld [vmem:[%s4854_s1 + $0x80] sm:$0xff]  ;;  %v3802_v26 = vpack.c.bf16 %v31_v25, %v27_v24  ;;  %2743 = vmatprep.subr.bf16.mxu1 %v3794_v23  ;;  %v36_v28 = vld [vmem:[%s4854_s1 + $0x58] sm:$0xff] }
   0x6   :  { %v46_v14 = vld [vmem:[%s4854_s1 + $0xa8] sm:$0xff]  ;;  %2713 = vmatpush1.bf16.msra.mxu0 %v3753_v8  ;;  %v45_v17 = vld [vmem:[%s4854_s1 + $0xa0] sm:$0xff]  ;;  %v40_v29 = vld [vmem:[%s4854_s1 + $0x78] sm:$0xff] }
   0x7   :  { %2715 = vmatprep.subr.bf16.mxu0 %v3755_v9  ;;  %v3780_v18 = vpack.c.bf16 %v46_v14, %v42_v12  ;;  %v50_v19 = vld [vmem:[%s4854_s1 + $0xc8] sm:$0xff]  ;;  %v3805_v27 = vpack.c.bf16 %v45_v17, %v41_v16  ;;  %v35_v30 = vld [vmem:[%s4854_s1 + $0x50] sm:$0xff]  ;;  %v49_v32 = vld [vmem:[%s4854_s1 + $0xc0] sm:$0xff]  ;;  %2745 = vmatpush1.bf16.msra.mxu1 %v3802_v26  ;;  %v3827_v34 = vpack.c.bf16 %v40_v29, %v36_v28 }
   0x8   :  { %v54_v22 = vld [vmem:[%s4854_s1 + $0xe8] sm:$0xff]  ;;  %v53_v33 = vld [vmem:[%s4854_s1 + $0xe0] sm:$0xff]  ;;  %v39_v35 = vld [vmem:[%s4854_s1 + $0x70] sm:$0xff] }
   0x9   :  { %v3818_v31 = vpack.c.bf16 %v54_v22, %v50_v19  ;;  %v58_v36 = vld [vmem:[%s4854_s1 + $0x108] sm:$0xff]  ;;  %v3838_v38 = vpack.c.bf16 %v39_v35, %v35_v30  ;;  %v44_v39 = vld [vmem:[%s4854_s1 + $0x98] sm:$0xff]  ;;  %2747 = vmatprep.subr.bf16.mxu1 %v3827_v34  ;;  %v43_v41 = vld [vmem:[%s4854_s1 + $0x90] sm:$0xff]  ;;  %v3854_v43 = vpack.c.bf16 %v53_v33, %v49_v32 }
   0xa   :  { %2717 = vmatpush1.bf16.msra.mxu0 %v3771_v15  ;;  %v62_v37 = vld [vmem:[%s4854_s1 + $0x128] sm:$0xff]  ;;  %v48_v40 = vld [vmem:[%s4854_s1 + $0xb8] sm:$0xff]  ;;  %v47_v42 = vld [vmem:[%s4854_s1 + $0xb0] sm:$0xff] }
   0xb   :  { %2719 = vmatprep.subr.bf16.mxu0 %v3780_v18  ;;  %v57_v44 = vld [vmem:[%s4854_s1 + $0x100] sm:$0xff]  ;;  %v3862_v46 = vpack.c.bf16 %v48_v40, %v44_v39  ;;  %v3865_v47 = vpack.c.bf16 %v62_v37, %v58_v36  ;;  %2749 = vmatpush1.bf16.msra.mxu1 %v3838_v38  ;;  %v66_v48 = vld [vmem:[%s4854_s1 + $0x148] sm:$0xff]  ;;  %v3871_v49 = vpack.c.bf16 %v47_v42, %v43_v41  ;;  %v52_v50 = vld [vmem:[%s4854_s1 + $0xd8] sm:$0xff] }
   0xc   :  { %v61_v45 = vld [vmem:[%s4854_s1 + $0x120] sm:$0xff]  ;;  %v56_v51 = vld [vmem:[%s4854_s1 + $0xf8] sm:$0xff]  ;;  %v70_v52 = vld [vmem:[%s4854_s1 + $0x168] sm:$0xff] }
   0xd   :  { %2751 = vmatprep.subr.bf16.mxu1 %v3862_v46  ;;  %v3883_v53 = vpack.c.bf16 %v56_v51, %v52_v50  ;;  %v51_v54 = vld [vmem:[%s4854_s1 + $0xd0] sm:$0xff]  ;;  %v3892_v56 = vpack.c.bf16 %v61_v45, %v57_v44  ;;  %v60_v57 = vld [vmem:[%s4854_s1 + $0x118] sm:$0xff]  ;;  %v3901_v59 = vpack.c.bf16 %v70_v52, %v66_v48  ;;  %v65_v60 = vld [vmem:[%s4854_s1 + $0x140] sm:$0xff] }
   0xe   :  { %2721 = vmatpush1.bf16.msra.mxu0 %v3805_v27  ;;  %v55_v55 = vld [vmem:[%s4854_s1 + $0xf0] sm:$0xff]  ;;  %v64_v58 = vld [vmem:[%s4854_s1 + $0x138] sm:$0xff]  ;;  %v69_v61 = vld [vmem:[%s4854_s1 + $0x160] sm:$0xff] }
   0xf   :  { %2723 = vmatprep.subr.bf16.mxu0 %v3818_v31  ;;  %2753 = vmatpush1.bf16.msra.mxu1 %v3871_v49  ;;  %v74_v62 = vld [vmem:[%s4854_s1 + $0x188] sm:$0xff]  ;;  %v3913_v63 = vpack.c.bf16 %v55_v55, %v51_v54  ;;  %v3919_v1 = vpack.c.bf16 %v64_v58, %v60_v57  ;;  %v59_v2 = vld [vmem:[%s4854_s1 + $0x110] sm:$0xff]  ;;  %v68_v5 = vld [vmem:[%s4854_s1 + $0x158] sm:$0xff]  ;;  %v3934_v10 = vpack.c.bf16 %v69_v61, %v65_v60 }
  0x10   :  { %v78_v0 = vld [vmem:[%s4854_s1 + $0x1a8] sm:$0xff]  ;;  %2755 = vmatprep.subr.bf16.mxu1 %v3883_v53  ;;  %v63_v4 = vld [vmem:[%s4854_s1 + $0x130] sm:$0xff]  ;;  %v72_v6 = vld [vmem:[%s4854_s1 + $0x178] sm:$0xff] }
  0x11   :  { %v73_v11 = vld [vmem:[%s4854_s1 + $0x180] sm:$0xff]  ;;  %v82_v13 = vld [vmem:[%s4854_s1 + $0x1c8] sm:$0xff]  ;;  %v3946_v14 = vpack.c.bf16 %v78_v0, %v74_v62  ;;  %v3952_v17 = vpack.c.bf16 %v63_v4, %v59_v2  ;;  %v3965_v21 = vpack.c.bf16 %v72_v6, %v68_v5  ;;  %v67_v22 = vld [vmem:[%s4854_s1 + $0x150] sm:$0xff] }
  0x12   :  { %2725 = vmatpush1.bf16.msra.mxu0 %v3854_v43  ;;  %v77_v12 = vld [vmem:[%s4854_s1 + $0x1a0] sm:$0xff]  ;;  %v86_v16 = vld [vmem:[%s4854_s1 + $0x1e8] sm:$0xff]  ;;  %v71_v24 = vld [vmem:[%s4854_s1 + $0x170] sm:$0xff] }
  0x13   :  { %2727 = vmatprep.subr.bf16.mxu0 %v3865_v47  ;;  %2757 = vmatpush1.bf16.msra.mxu1 %v3913_v63  ;;  %v3957_v19 = vld [vmem:[%s4855_s2] sm:$0xff]  ;;  %v3962_v20 = vld [vmem:[%s4855_s2 + $0x8] sm:$0xff] }
  0x14   :  { %2759 = vmatprep.subr.bf16.mxu1 %v3919_v1  ;;  %vm299_vm0 = vcmp.gt.s32.totalorder %v3957_v19, 0  ;;  %vm300_vm1 = vcmp.gt.s32.totalorder %v3962_v20, 0 }
  0x16   :  { %2729 = vmatpush1.bf16.msra.mxu0 %v3892_v56 }
  0x17   :  { %2731 = vmatprep.subr.bf16.mxu0 %v3901_v59 }
  0x18   :  { %8 = vsyncpa [#allocation3], 0  ;;  %v76_v25 = vld [vmem:[%s4854_s1 + $0x198] sm:$0xff]  ;;  %v2564_v29 = vsel %vm299_vm0, 1.0, %v3706_v7  ;;  %v3983_v30 = vpack.c.bf16 %v77_v12, %v73_v11  ;;  %v3986_v32 = vpack.c.bf16 %v86_v16, %v82_v13  ;;  %v81_v33 = vld [vmem:[%s4854_s1 + $0x1c0] sm:$0xff]  ;;  %2761 = vmatpush1.bf16.msra.mxu1 %v3952_v17  ;;  %v3995_v36 = vpack.c.bf16 %v71_v24, %v67_v22 }
  0x19   :  { %v80_v28 = vld [vmem:[%s4854_s1 + $0x1b8] sm:$0xff]  ;;  %307 = vperm.xlu0 %3355, %v2564_v29   ;;  %v85_v35 = vld [vmem:[%s4854_s1 + $0x1e0] sm:$0xff]  ;;  %v2565_v37 = vsel %vm300_vm1, 1.0, %v3706_v7  ;;  %2763 = vmatprep.subr.bf16.mxu1 %v3965_v21  ;;  %v75_v40 = vld [vmem:[%s4854_s1 + $0x190] sm:$0xff]  ;;  %vm789_vm2 = vcmp.gt.s32.totalorder %v3957_v19, 2  ;;  %vm1036_vm3 = vcmp.gt.s32.totalorder %v3957_v19, 3 }
  0x1a   :  { %2733 = vmatpush1.bf16.msra.mxu0 %v3934_v10  ;;  %v3999_v39 = vpack.c.bf16 %v80_v28, %v76_v25  ;;  %v79_v41 = vld [vmem:[%s4854_s1 + $0x1b0] sm:$0xff]  ;;  %v84_v42 = vld [vmem:[%s4854_s1 + $0x1d8] sm:$0xff]  ;;  %v4015_v45 = vpack.c.bf16 %v85_v35, %v81_v33  ;;  %v2596_v50 = vsel %vm789_vm2, 1.0, %v3706_v7  ;;  %v2612_v57 = vsel %vm1036_vm3, 1.0, %v3706_v7  ;;  %v17_v28 = vld [vmem:[%s4853_s0] sm:$0xff] }
  0x1b   :  { %2735 = vmatprep.subr.bf16.mxu0 %v3946_v14  ;;  %v88_v44 = vld [vmem:[%s4854_s1 + $0x1f8] sm:$0xff]  ;;  %v4019_v48 = vpack.c.bf16 %v79_v41, %v75_v40  ;;  %v83_v52 = vld [vmem:[%s4854_s1 + $0x1d0] sm:$0xff]  ;;  %vm1283_vm4 = vcmp.gt.s32.totalorder %v3957_v19, 4  ;;  %vm1530_vm5 = vcmp.gt.s32.totalorder %v3957_v19, 5  ;;  %vm1777_vm6 = vcmp.gt.s32.totalorder %v3957_v19, 6  ;;  %v18_v29 = vld [vmem:[%s4853_s0 + $0x8] sm:$0xff] }
  0x1c   :  { %2765 = vmatpush1.bf16.msra.mxu1 %v3995_v36  ;;  %v4023_v51 = vpack.c.bf16 %v88_v44, %v84_v42  ;;  %v87_v54 = vld [vmem:[%s4854_s1 + $0x1f0] sm:$0xff]  ;;  %v2628_v58 = vsel %vm1283_vm4, 1.0, %v3706_v7  ;;  %v2644_v60 = vsel %vm1530_vm5, 1.0, %v3706_v7  ;;  %v2660_v61 = vsel %vm1777_vm6, 1.0, %v3706_v7  ;;  %v22_v42 = vld [vmem:[%s4853_s0 + $0x28] sm:$0xff] }
  0x1d   :  { %312 = vperm.xlu0 %3355, %v2565_v37   ;;  %2767 = vmatprep.subr.bf16.mxu1 %v3999_v39  ;;  %v4034_v55 = vpack.c.bf16 %v87_v54, %v83_v52  ;;  %vm2024_vm7 = vcmp.gt.s32.totalorder %v3957_v19, 7  ;;  %vm2271_vm8 = vcmp.gt.s32.totalorder %v3957_v19, 8  ;;  %vm2518_vm9 = vcmp.gt.s32.totalorder %v3957_v19, 9  ;;  %v20_v52 = vld [vmem:[%s4853_s0 + $0x18] sm:$0xff] }
  0x1e   :  { %2737 = vmatpush1.bf16.msra.mxu0 %v3983_v30  ;;  %v2676_v62 = vsel %vm2024_vm7, 1.0, %v3706_v7  ;;  %vm2519_vm10 = vcmp.gt.s32.totalorder %v3962_v20, 9  ;;  %v2692_v0 = vsel %vm2271_vm8, 1.0, %v3706_v7  ;;  %v2708_v2 = vsel %vm2518_vm9, 1.0, %v3706_v7 }
  0x1f   :  { %2739 = vmatprep.subr.bf16.mxu0 %v3986_v32  ;;  %v2709_v4 = vsel %vm2519_vm10, 1.0, %v3706_v7  ;;  %vm542_vm11 = vcmp.gt.s32.totalorder %v3957_v19, 1  ;;  %vm543_vm12 = vcmp.gt.s32.totalorder %v3962_v20, 1  ;;  %vm790_vm13 = vcmp.gt.s32.totalorder %v3962_v20, 2 }
  0x20   :  { %2769 = vmatpush1.bf16.msra.mxu1 %v4019_v48  ;;  %v3357_v5 = vpack.i.bf16 %v2709_v4, %v2708_v2  ;;  %v2580_v6 = vsel %vm542_vm11, 1.0, %v3706_v7  ;;  %v2581_v11 = vsel %vm543_vm12, 1.0, %v3706_v7  ;;  %v2597_v12 = vsel %vm790_vm13, 1.0, %v3706_v7  ;;  %v24_v4 = vld [vmem:[%s4853_s0 + $0x38] sm:$0xff] }
  0x21   :  { %799 = vperm.xlu0 %3355, %v2596_v50   ;;  %2771 = vmatprep.subr.bf16.mxu1 %v4023_v51  ;;  %vm1037_vm14 = vcmp.gt.s32.totalorder %v3962_v20, 3  ;;  %vm1284_vm15 = vcmp.gt.s32.totalorder %v3962_v20, 4  ;;  %vm1531_vm0 = vcmp.gt.s32.totalorder %v3962_v20, 5  ;;  %vm1778_vm1 = vcmp.gt.s32.totalorder %v3962_v20, 6 }
  0x22   :  { %2741 = vmatpush1.bf16.msra.mxu0 %v4015_v45  ;;  %552 = vperm.xlu1 %3356, %v2580_v6   ;;  %v2613_v13 = vsel %vm1037_vm14, 1.0, %v3706_v7  ;;  %v2629_v16 = vsel %vm1284_vm15, 1.0, %v3706_v7  ;;  %v2645_v19 = vsel %vm1531_vm0, 1.0, %v3706_v7  ;;  %v2661_v22 = vsel %vm1778_vm1, 1.0, %v3706_v7 }
  0x23   :  { %2775 = vmatprep.subr.bf16.mxu0 %v3740_v3  ;;  %vm2025_vm2 = vcmp.gt.s32.totalorder %v3962_v20, 7  ;;  %vm2272_vm3 = vcmp.gt.s32.totalorder %v3962_v20, 8  ;;  %v21_v20 = vld [vmem:[%s4853_s0 + $0x20] sm:$0xff] }
  0x24   :  { %2773 = vmatpush1.bf16.msra.mxu1 %v4034_v55  ;;  %v2677_v24 = vsel %vm2025_vm2, 1.0, %v3706_v7  ;;  %v2693_v25 = vsel %vm2272_vm3, 1.0, %v3706_v7 }
  0x25   :  { %154 = vmatmul.mubr.f32.vlgmr.msra.gmra.mrb[0].mxu0 %v3706_v7  ;;  %1046 = vperm.xlu0 %3355, %v2612_v57  }
  0x26   :  { %159 = vmatprep.mubr.f32.mxu0 %v3706_v7  ;;  %2777 = vmatpush1.bf16.msra.mxu0 %v3753_v8 }
  0x27   :  { %2807 = vmatprep.subr.bf16.mxu1 %v3794_v23  ;;  %2779 = vmatprep.subr.bf16.mxu0 %v3755_v9 }
  0x28   :  { %231 = vmatmul.mubr.f32.vlgmr.msra.gmra.mrb[0].mxu1 %v3706_v7  ;;  %557 = vperm.xlu1 %3356, %v2581_v11  }
  0x29   :  { %160 = vmatmul.mubr.f32.gmra.mrb[2].mxu0 %v3706_v7  ;;  %1293 = vperm.xlu0 %3355, %v2628_v58  }
  0x2a   :  { %236 = vmatprep.mubr.f32.mxu1 %v3706_v7  ;;  %2809 = vmatpush1.bf16.msra.mxu1 %v3802_v26 }
  0x2b   :  { %2811 = vmatprep.subr.bf16.mxu1 %v3827_v34  ;;  %2781 = vmatpush1.bf16.msra.mxu0 %v3771_v15 }
  0x2c   :  { %2783 = vmatprep.subr.bf16.mxu0 %v3780_v18  ;;  %396 = vmatprep.mubr.f32.mxu0 %v3706_v7 }
  0x2d   :  { %237 = vmatmul.mubr.f32.gmra.mrb[2].mxu1 %v3706_v7  ;;  %1540 = vperm.xlu0 %3355, %v2644_v60  }
  0x2e   :  { %2813 = vmatpush1.bf16.msra.mxu1 %v3838_v38  ;;  %473 = vmatprep.mubr.f32.mxu1 %v3706_v7 }
  0x2f   :  { %2815 = vmatprep.subr.bf16.mxu1 %v3862_v46  ;;  %2785 = vmatpush1.bf16.msra.mxu0 %v3805_v27 }
  0x30   :  { %2787 = vmatprep.subr.bf16.mxu0 %v3818_v31  ;;  %804 = vperm.xlu1 %3356, %v2597_v12  }
  0x31   :  { %1787 = vperm.xlu0 %3355, %v2660_v61  }
  0x32   :  { %2817 = vmatpush1.bf16.msra.mxu1 %v3871_v49 }
  0x33   :  { %2819 = vmatprep.subr.bf16.mxu1 %v3883_v53  ;;  %2789 = vmatpush1.bf16.msra.mxu0 %v3854_v43 }
  0x34   :  { %2791 = vmatprep.subr.bf16.mxu0 %v3865_v47  ;;  %1051 = vperm.xlu1 %3356, %v2613_v13  }
  0x35   :  { %2034 = vperm.xlu0 %3355, %v2676_v62  }
  0x36   :  { %2821 = vmatpush1.bf16.msra.mxu1 %v3913_v63 }
  0x37   :  { %2823 = vmatprep.subr.bf16.mxu1 %v3919_v1  ;;  %2793 = vmatpush1.bf16.msra.mxu0 %v3892_v56 }
  0x38   :  { %2795 = vmatprep.subr.bf16.mxu0 %v3901_v59  ;;  %1298 = vperm.xlu1 %3356, %v2629_v16  }
  0x39   :  { %2281 = vperm.xlu0 %3355, %v2692_v0  }
  0x3a   :  { %2825 = vmatpush1.bf16.msra.mxu1 %v3952_v17 }
  0x3b   :  { %2827 = vmatprep.subr.bf16.mxu1 %v3965_v21  ;;  %2797 = vmatpush1.bf16.msra.mxu0 %v3934_v10 }
  0x3c   :  { %2799 = vmatprep.subr.bf16.mxu0 %v3946_v14  ;;  %1545 = vperm.xlu1 %3356, %v2645_v19   ;;  %v23_v19 = vld [vmem:[%s4853_s0 + $0x30] sm:$0xff] }
  0x3d   :  { %3358 = vperm.xlu0 %3355, %v3357_v5   ;;  %v19_v5 = vld [vmem:[%s4853_s0 + $0x10] sm:$0xff] }
  0x3e   :  { %2829 = vmatpush1.bf16.msra.mxu1 %v3995_v36 }
  0x3f   :  { %2831 = vmatprep.subr.bf16.mxu1 %v3999_v39  ;;  %2801 = vmatpush1.bf16.msra.mxu0 %v3983_v30 }
  0x40   :  { %2803 = vmatprep.subr.bf16.mxu0 %v3986_v32  ;;  %1792 = vperm.xlu1 %3356, %v2661_v22  }
  0x42   :  { %2833 = vmatpush1.bf16.msra.mxu1 %v4019_v48 }
  0x43   :  { %2835 = vmatprep.subr.bf16.mxu1 %v4023_v51  ;;  %2805 = vmatpush1.bf16.msra.mxu0 %v4015_v45 }
  0x44   :  { %2839 = vmatprep.subr.bf16.mxu0 %v3740_v3  ;;  %2039 = vperm.xlu1 %3356, %v2677_v24  }
  0x46   :  { %2837 = vmatpush1.bf16.msra.mxu1 %v4034_v55 }
  0x47   :  { %2871 = vmatprep.subr.bf16.mxu1 %v3794_v23 }
  0x48   :  { %2286 = vperm.xlu1 %3356, %v2693_v25  }
  0xf8   :  { %v155_v33 = vpop.f32.mrb[0].mxu0 }
  0xf9   :  { %v243_v35 = vadd.f32 %v155_v33, %v17_v28  ;;  %v157_v37 = vpop.f32.mrb[1].mxu0 }
  0xfa   :  { %v244_v40 = vadd.f32 %v157_v37, %v18_v29 }
  0xfb   :  { %v2558_v41 = vmul.f32 -1.442695, %v243_v35  ;;  %v232_v58 = vpop.f32.mrb[0].mxu1 }
  0xfc   :  { %v2560_v44 = vmul.f32 -1.442695, %v244_v40  ;;  %v161_v50 = vpop.f32.mrb[2].mxu0  ;;  %v234_v61 = vpop.f32.mrb[1].mxu1  ;;  %v245_v16 = vadd.f32 %v232_v58, %v19_v5 }
  0xfd   :  { %3362 = vpow2.f32 %v2558_v41  ;;  %v247_v54 = vadd.f32 %v161_v50, %v21_v20  ;;  %v163_v57 = vpop.f32.mrb[3].mxu0  ;;  %v246_v0 = vadd.f32 %v234_v61, %v20_v52 }
  0xfe   :  { %3364 = vpow2.f32 %v2560_v44  ;;  %v248_v60 = vadd.f32 %v163_v57, %v22_v42 }
  0xff   :  { %v2559_v62 = vmul.f32 -1.442695, %v247_v54  ;;  %v2562_v12 = vmul.f32 -1.442695, %v246_v0 }
 0x100   :  { %v2561_v2 = vmul.f32 -1.442695, %v248_v60  ;;  %v238_v6 = vpop.f32.mrb[2].mxu1 }
 0x101   :  { %3366 = vpow2.f32 %v2559_v62  ;;  %v240_v11 = vpop.f32.mrb[3].mxu1  ;;  %v249_v29 = vadd.f32 %v238_v6, %v23_v19 }
 0x102   :  { %3368 = vpow2.f32 %v2561_v2  ;;  %v250_v13 = vadd.f32 %v240_v11, %v24_v4 }
 0x103   :  { %3370 = vpow2.f32 %v2562_v12 }
 0x104   :  { %v2563_v22 = vmul.f32 -1.442695, %v250_v13  ;;  %3372 = vtanh.f32 %v245_v16  ;;  %v4143_v13 = vpop.permute.xlu0 %307 }
 0x106   :  { %3374 = vpow2.f32 %v2563_v22 }
 0x107   :  { %v3363_v24 = vpop.eup %3362 }
 0x108   :  { %v3365_v25 = vpop.eup %3364  ;;  %v257_v28 = vadd.f32 1.0, %v3363_v24 }
 0x109   :  { %v269_v33 = vadd.f32 1.0, %v3365_v25 }
 0x10a   :  { %3376 = vrcp.f32 %v257_v28  ;;  %v4150_v28 = vpop.permute.xlu0 %312 }
 0x10b   :  { %v3367_v35 = vpop.eup %3366  ;;  %3378 = vrcp.f32 %v269_v33  ;;  %v2566_v33 = vld [vmem:[%s4853_s0 + $0x40] sm:$0xff] }
 0x10c   :  { %v3369_v37 = vpop.eup %3368  ;;  %v258_v40 = vadd.f32 1.0, %v3367_v35  ;;  %3380 = vtanh.f32 %v249_v29  ;;  %v2567_v35 = vld [vmem:[%s4853_s0 + $0x48] sm:$0xff] }
 0x10d   :  { %v270_v20 = vadd.f32 1.0, %v3369_v37  ;;  %v3371_v41 = vpop.eup %3370 }
 0x10e   :  { %3382 = vrcp.f32 %v258_v40  ;;  %v3373_v42 = vpop.eup %3372  ;;  %v283_v52 = vadd.f32 1.0, %v3371_v41 }
 0x10f   :  { %3384 = vrcp.f32 %v270_v20 }
 0x110   :  { %v3375_v44 = vpop.eup %3374  ;;  %3386 = vrcp.f32 %v283_v52 }
 0x111   :  { %v284_v0 = vadd.f32 1.0, %v3375_v44 }
 0x114   :  { %v3377_v50 = vpop.eup %3376 }
 0x115   :  { %v3379_v54 = vpop.eup %3378  ;;  %v291_v57 = vmul.f32 %v3377_v50, %v3373_v42  ;;  %v2570_v50 = vld [vmem:[%s4853_s0 + $0x60] sm:$0xff] }
 0x116   :  { %v3381_v58 = vpop.eup %3380  ;;  %v289_v60 = vmul.f32 0.0, %v3379_v54  ;;  %v2571_v54 = vld [vmem:[%s4853_s0 + $0x68] sm:$0xff] }
 0x118   :  { %v3383_v61 = vpop.eup %3382  ;;  %v4137_v62 = vadd.f32 %v291_v57, %v289_v60 }
 0x119   :  { %v3385_v2 = vpop.eup %3384  ;;  %v292_v4 = vmul.f32 %v3383_v61, %v3381_v58  ;;  %v2569_v61 = vld [vmem:[%s4853_s0 + $0x58] sm:$0xff] }
 0x11a   :  { %v290_v5 = vmul.f32 0.0, %v3385_v2  ;;  %3388 = vtanh.f32 %v4137_v62  ;;  %v3387_v11 = vpop.eup %3386 }
 0x11b   :  { %3390 = vrcp.f32 %v284_v0 }
 0x11c   :  { %v4140_v6 = vadd.f32 %v292_v4, %v290_v5 }
 0x11e   :  { %3392 = vtanh.f32 %v4140_v6 }
 0x124   :  { %v3389_v12 = vpop.eup %3388 }
 0x125   :  { %v297_v16 = vmul.f32 %v3389_v12, %v3387_v11  ;;  %v3391_v19 = vpop.eup %3390 }
 0x127   :  { %v4146_v22 = vmul.f32 %v4143_v13, %v297_v16 }
 0x128   :  { %v3393_v24 = vpop.eup %3392 }
 0x129   :  { %397 = vmatmul.mubr.f32.vlgmr.msra.gmra.mrb[4].mxu0 %v4146_v22  ;;  %474 = vmatmul.mubr.f32.vlgmr.msra.gmra.mrb[4].mxu1 %v4146_v22  ;;  %v298_v25 = vmul.f32 %v3393_v24, %v3391_v19  ;;  %v2573_v19 = vld [vmem:[%s4853_s0 + $0x78] sm:$0xff]  ;;  %v2568_v24 = vld [vmem:[%s4853_s0 + $0x50] sm:$0xff] }
 0x12a   :  { %402 = vmatprep.mubr.f32.mxu0 %v3706_v7  ;;  %479 = vmatprep.mubr.f32.mxu1 %v3706_v7 }
 0x12b   :  { %v4155_v29 = vmul.f32 %v4150_v28, %v298_v25  ;;  %2841 = vmatpush1.bf16.msra.mxu0 %v3753_v8  ;;  %2873 = vmatpush1.bf16.msra.mxu1 %v3802_v26 }
 0x12c   :  { %2843 = vmatprep.subr.bf16.mxu0 %v3755_v9  ;;  %2875 = vmatprep.subr.bf16.mxu1 %v3827_v34 }
 0x12d   :  { %403 = vmatmul.mubr.f32.gmra.mrb[6].mxu0 %v4155_v29  ;;  %480 = vmatmul.mubr.f32.gmra.mrb[6].mxu1 %v4155_v29 }
 0x12e   :  { %643 = vmatprep.mubr.f32.mxu0 %v3706_v7  ;;  %720 = vmatprep.mubr.f32.mxu1 %v3706_v7 }
 0x12f   :  { %2845 = vmatpush1.bf16.msra.mxu0 %v3771_v15  ;;  %2877 = vmatpush1.bf16.msra.mxu1 %v3838_v38 }
 0x130   :  { %2847 = vmatprep.subr.bf16.mxu0 %v3780_v18  ;;  %2879 = vmatprep.subr.bf16.mxu1 %v3862_v46 }
 0x133   :  { %2849 = vmatpush1.bf16.msra.mxu0 %v3805_v27  ;;  %2881 = vmatpush1.bf16.msra.mxu1 %v3871_v49 }
 0x134   :  { %2851 = vmatprep.subr.bf16.mxu0 %v3818_v31  ;;  %2883 = vmatprep.subr.bf16.mxu1 %v3883_v53 }
 0x137   :  { %2853 = vmatpush1.bf16.msra.mxu0 %v3854_v43  ;;  %2885 = vmatpush1.bf16.msra.mxu1 %v3913_v63 }
 0x138   :  { %2855 = vmatprep.subr.bf16.mxu0 %v3865_v47  ;;  %2887 = vmatprep.subr.bf16.mxu1 %v3919_v1 }
 0x13b   :  { %2857 = vmatpush1.bf16.msra.mxu0 %v3892_v56  ;;  %2889 = vmatpush1.bf16.msra.mxu1 %v3952_v17 }
 0x13c   :  { %2859 = vmatprep.subr.bf16.mxu0 %v3901_v59  ;;  %2891 = vmatprep.subr.bf16.mxu1 %v3965_v21 }
 0x13f   :  { %2861 = vmatpush1.bf16.msra.mxu0 %v3934_v10  ;;  %2893 = vmatpush1.bf16.msra.mxu1 %v3995_v36 }
 0x140   :  { %2863 = vmatprep.subr.bf16.mxu0 %v3946_v14  ;;  %2895 = vmatprep.subr.bf16.mxu1 %v3999_v39 }
 0x143   :  { %2865 = vmatpush1.bf16.msra.mxu0 %v3983_v30  ;;  %2897 = vmatpush1.bf16.msra.mxu1 %v4019_v48 }
 0x144   :  { %2867 = vmatprep.subr.bf16.mxu0 %v3986_v32  ;;  %2899 = vmatprep.subr.bf16.mxu1 %v4023_v51 }
 0x147   :  { %2869 = vmatpush1.bf16.msra.mxu0 %v4015_v45  ;;  %2901 = vmatpush1.bf16.msra.mxu1 %v4034_v55 }
 0x148   :  { %2903 = vmatprep.subr.bf16.mxu0 %v3740_v3  ;;  %2935 = vmatprep.subr.bf16.mxu1 %v3794_v23 }
 0x1fc   :  { %v398_v37 = vpop.f32.mrb[4].mxu0  ;;  %v475_v40 = vpop.f32.mrb[4].mxu1 }
 0x1fd   :  { %v486_v20 = vadd.f32 %v2566_v33, %v398_v37  ;;  %v400_v41 = vpop.f32.mrb[5].mxu0  ;;  %v477_v42 = vpop.f32.mrb[5].mxu1  ;;  %v2572_v37 = vld [vmem:[%s4853_s0 + $0x70] sm:$0xff] }
 0x1fe   :  { %v487_v44 = vadd.f32 %v2567_v35, %v400_v41  ;;  %v489_v12 = vadd.f32 %v2569_v61, %v477_v42  ;;  %v488_v35 = vadd.f32 %v2568_v24, %v475_v40 }
 0x1ff   :  { %v2574_v52 = vmul.f32 -1.442695, %v486_v20 }
 0x200   :  { %v2576_v57 = vmul.f32 -1.442695, %v487_v44  ;;  %v404_v58 = vpop.f32.mrb[6].mxu0  ;;  %v481_v60 = vpop.f32.mrb[6].mxu1  ;;  %v2578_v25 = vmul.f32 -1.442695, %v489_v12 }
 0x201   :  { %3394 = vpow2.f32 %v2574_v52  ;;  %v490_v0 = vadd.f32 %v2570_v50, %v404_v58  ;;  %v406_v2 = vpop.f32.mrb[7].mxu0  ;;  %v483_v4 = vpop.f32.mrb[7].mxu1  ;;  %v492_v52 = vadd.f32 %v2572_v37, %v481_v60 }
 0x202   :  { %3396 = vpow2.f32 %v2576_v57  ;;  %v491_v5 = vadd.f32 %v2571_v54, %v406_v2  ;;  %v493_v33 = vadd.f32 %v2573_v19, %v483_v4  ;;  %v319_v4 = vmul.f32 %v4143_v13, %v4137_v62 }
 0x203   :  { %v2575_v11 = vmul.f32 -1.442695, %v490_v0 }
 0x204   :  { %v2577_v16 = vmul.f32 -1.442695, %v491_v5  ;;  %v2579_v44 = vmul.f32 -1.442695, %v493_v33  ;;  %v320_v33 = vmul.f32 %v4150_v28, %v4140_v6 }
 0x205   :  { %3398 = vpow2.f32 %v2575_v11 }
 0x206   :  { %3400 = vpow2.f32 %v2577_v16 }
 0x207   :  { %3402 = vpow2.f32 %v2578_v25 }
 0x208   :  { %3404 = vtanh.f32 %v488_v35 }
 0x20b   :  { %v3395_v20 = vpop.eup %3394 }
 0x20c   :  { %v3397_v41 = vpop.eup %3396  ;;  %v500_v42 = vadd.f32 1.0, %v3395_v20  ;;  %v553_v20 = vpop.permute.xlu1 %552 }
 0x20d   :  { %v512_v50 = vadd.f32 1.0, %v3397_v41 }
 0x20e   :  { %3406 = vrcp.f32 %v500_v42 }
 0x20f   :  { %v3399_v54 = vpop.eup %3398  ;;  %3408 = vrcp.f32 %v512_v50 }
 0x210   :  { %v3401_v57 = vpop.eup %3400  ;;  %v501_v58 = vadd.f32 1.0, %v3399_v54  ;;  %3410 = vpow2.f32 %v2579_v44  ;;  %v558_v54 = vpop.permute.xlu1 %557 }
 0x211   :  { %3412 = vtanh.f32 %v492_v52  ;;  %v513_v40 = vadd.f32 1.0, %v3401_v57  ;;  %v3403_v61 = vpop.eup %3402 }
 0x212   :  { %3414 = vrcp.f32 %v501_v58  ;;  %v3405_v0 = vpop.eup %3404  ;;  %v526_v11 = vadd.f32 1.0, %v3403_v61 }
 0x213   :  { %3416 = vrcp.f32 %v513_v40 }
 0x214   :  { %3418 = vrcp.f32 %v526_v11 }
 0x218   :  { %v3407_v2 = vpop.eup %3406 }
 0x219   :  { %v3409_v5 = vpop.eup %3408  ;;  %v534_v12 = vmul.f32 %v3407_v2, %v3405_v0 }
 0x21a   :  { %v3411_v60 = vpop.eup %3410  ;;  %v532_v16 = vmul.f32 %v3409_v5, %v319_v4 }
 0x21b   :  { %v3413_v19 = vpop.eup %3412  ;;  %v527_v37 = vadd.f32 1.0, %v3411_v60 }
 0x21c   :  { %v3415_v24 = vpop.eup %3414  ;;  %v536_v25 = vadd.f32 %v534_v12, %v532_v16 }
 0x21d   :  { %v3417_v35 = vpop.eup %3416  ;;  %v535_v41 = vmul.f32 %v3415_v24, %v3413_v19 }
 0x21e   :  { %3420 = vtanh.f32 %v536_v25  ;;  %v564_v42 = vsub.f32 %v536_v25, %v319_v4  ;;  %v533_v44 = vmul.f32 %v3417_v35, %v320_v33  ;;  %v3419_v6 = vpop.eup %3418 }
 0x21f   :  { %3422 = vrcp.f32 %v527_v37 }
 0x220   :  { %v566_v62 = vmul.f32 %v564_v42, %v553_v20  ;;  %v537_v13 = vadd.f32 %v535_v41, %v533_v44  ;;  %v2587_v42 = vld [vmem:[%s4853_s0 + $0xa8] sm:$0xff] }
 0x222   :  { %v4221_v50 = vadd.f32 %v566_v62, %v319_v4  ;;  %3424 = vtanh.f32 %v537_v13  ;;  %v565_v52 = vsub.f32 %v537_v13, %v320_v33 }
 0x224   :  { %v567_v57 = vmul.f32 %v565_v52, %v558_v54  ;;  %v2585_v52 = vld [vmem:[%s4853_s0 + $0x98] sm:$0xff] }
 0x226   :  { %v4223_v58 = vadd.f32 %v567_v57, %v320_v33 }
 0x228   :  { %v3421_v28 = vpop.eup %3420 }
 0x229   :  { %v540_v40 = vmul.f32 %v3421_v28, %v3419_v6  ;;  %v3423_v61 = vpop.eup %3422 }
 0x22b   :  { %v548_v0 = vsub.f32 %v540_v40, %v4146_v22 }
 0x22c   :  { %v3425_v2 = vpop.eup %3424 }
 0x22d   :  { %v560_v5 = vmul.f32 %v553_v20, %v548_v0  ;;  %v541_v11 = vmul.f32 %v3425_v2, %v3423_v61  ;;  %v2586_v20 = vld [vmem:[%s4853_s0 + $0xa0] sm:$0xff]  ;;  %v2589_v2 = vld [vmem:[%s4853_s0 + $0xb8] sm:$0xff] }
 0x22f   :  { %v4227_v12 = vadd.f32 %v560_v5, %v4146_v22  ;;  %v549_v4 = vsub.f32 %v541_v11, %v4155_v29  ;;  %v2582_v22 = vld [vmem:[%s4853_s0 + $0x80] sm:$0xff]  ;;  %v2584_v5 = vld [vmem:[%s4853_s0 + $0x90] sm:$0xff] }
 0x231   :  { %v561_v60 = vmul.f32 %v558_v54, %v549_v4  ;;  %644 = vmatmul.mubr.f32.vlgmr.msra.gmra.mrb[8].mxu0 %v4227_v12  ;;  %721 = vmatmul.mubr.f32.vlgmr.msra.gmra.mrb[8].mxu1 %v4227_v12 }
 0x232   :  { %649 = vmatprep.mubr.f32.mxu0 %v3706_v7  ;;  %726 = vmatprep.mubr.f32.mxu1 %v3706_v7 }
 0x233   :  { %v4235_v16 = vadd.f32 %v561_v60, %v4155_v29  ;;  %2905 = vmatpush1.bf16.msra.mxu0 %v3753_v8  ;;  %2937 = vmatpush1.bf16.msra.mxu1 %v3802_v26  ;;  %v2583_v29 = vld [vmem:[%s4853_s0 + $0x88] sm:$0xff] }
 0x234   :  { %2907 = vmatprep.subr.bf16.mxu0 %v3755_v9  ;;  %2939 = vmatprep.subr.bf16.mxu1 %v3827_v34 }
 0x235   :  { %650 = vmatmul.mubr.f32.gmra.mrb[10].mxu0 %v4235_v16  ;;  %727 = vmatmul.mubr.f32.gmra.mrb[10].mxu1 %v4235_v16 }
 0x236   :  { %890 = vmatprep.mubr.f32.mxu0 %v3706_v7  ;;  %967 = vmatprep.mubr.f32.mxu1 %v3706_v7 }
 0x237   :  { %2909 = vmatpush1.bf16.msra.mxu0 %v3771_v15  ;;  %2941 = vmatpush1.bf16.msra.mxu1 %v3838_v38 }
 0x238   :  { %2911 = vmatprep.subr.bf16.mxu0 %v3780_v18  ;;  %2943 = vmatprep.subr.bf16.mxu1 %v3862_v46 }
 0x23b   :  { %2913 = vmatpush1.bf16.msra.mxu0 %v3805_v27  ;;  %2945 = vmatpush1.bf16.msra.mxu1 %v3871_v49 }
 0x23c   :  { %2915 = vmatprep.subr.bf16.mxu0 %v3818_v31  ;;  %2947 = vmatprep.subr.bf16.mxu1 %v3883_v53 }
 0x23f   :  { %2917 = vmatpush1.bf16.msra.mxu0 %v3854_v43  ;;  %2949 = vmatpush1.bf16.msra.mxu1 %v3913_v63 }
 0x240   :  { %2919 = vmatprep.subr.bf16.mxu0 %v3865_v47  ;;  %2951 = vmatprep.subr.bf16.mxu1 %v3919_v1 }
 0x243   :  { %2921 = vmatpush1.bf16.msra.mxu0 %v3892_v56  ;;  %2953 = vmatpush1.bf16.msra.mxu1 %v3952_v17 }
 0x244   :  { %2923 = vmatprep.subr.bf16.mxu0 %v3901_v59  ;;  %2955 = vmatprep.subr.bf16.mxu1 %v3965_v21 }
 0x247   :  { %2925 = vmatpush1.bf16.msra.mxu0 %v3934_v10  ;;  %2957 = vmatpush1.bf16.msra.mxu1 %v3995_v36 }
 0x248   :  { %2927 = vmatprep.subr.bf16.mxu0 %v3946_v14  ;;  %2959 = vmatprep.subr.bf16.mxu1 %v3999_v39 }
 0x24b   :  { %2929 = vmatpush1.bf16.msra.mxu0 %v3983_v30  ;;  %2961 = vmatpush1.bf16.msra.mxu1 %v4019_v48 }
 0x24c   :  { %2931 = vmatprep.subr.bf16.mxu0 %v3986_v32  ;;  %2963 = vmatprep.subr.bf16.mxu1 %v4023_v51 }
 0x24f   :  { %2933 = vmatpush1.bf16.msra.mxu0 %v4015_v45  ;;  %2965 = vmatpush1.bf16.msra.mxu1 %v4034_v55 }
 0x250   :  { %2967 = vmatprep.subr.bf16.mxu0 %v3740_v3  ;;  %2999 = vmatprep.subr.bf16.mxu1 %v3794_v23 }
 0x304   :  { %v645_v19 = vpop.f32.mrb[8].mxu0  ;;  %v722_v24 = vpop.f32.mrb[8].mxu1 }
 0x305   :  { %v733_v25 = vadd.f32 %v2582_v22, %v645_v19  ;;  %v647_v33 = vpop.f32.mrb[9].mxu0  ;;  %v724_v35 = vpop.f32.mrb[9].mxu1  ;;  %v735_v60 = vadd.f32 %v2584_v5, %v722_v24  ;;  %v2588_v22 = vld [vmem:[%s4853_s0 + $0xb0] sm:$0xff] }
 0x306   :  { %v734_v37 = vadd.f32 %v2583_v29, %v647_v33  ;;  %v736_v61 = vadd.f32 %v2585_v52, %v724_v35 }
 0x307   :  { %v2590_v41 = vmul.f32 -1.442695, %v733_v25 }
 0x308   :  { %v2592_v44 = vmul.f32 -1.442695, %v734_v37  ;;  %v651_v62 = vpop.f32.mrb[10].mxu0  ;;  %v728_v13 = vpop.f32.mrb[10].mxu1  ;;  %v2594_v11 = vmul.f32 -1.442695, %v736_v61 }
 0x309   :  { %3426 = vpow2.f32 %v2590_v41  ;;  %v737_v54 = vadd.f32 %v2586_v20, %v651_v62  ;;  %v653_v57 = vpop.f32.mrb[11].mxu0  ;;  %v730_v6 = vpop.f32.mrb[11].mxu1  ;;  %v739_v37 = vadd.f32 %v2588_v22, %v728_v13 }
 0x30a   :  { %3428 = vpow2.f32 %v2592_v44  ;;  %v738_v28 = vadd.f32 %v2587_v42, %v653_v57  ;;  %v740_v4 = vadd.f32 %v2589_v2, %v730_v6  ;;  %v800_v22 = vpop.permute.xlu0 %799 }
 0x30b   :  { %v2591_v40 = vmul.f32 -1.442695, %v737_v54 }
 0x30c   :  { %v2593_v0 = vmul.f32 -1.442695, %v738_v28  ;;  %v2595_v33 = vmul.f32 -1.442695, %v740_v4 }
 0x30d   :  { %3430 = vpow2.f32 %v2591_v40 }
 0x30e   :  { %3432 = vpow2.f32 %v2593_v0 }
 0x30f   :  { %3434 = vpow2.f32 %v2594_v11 }
 0x310   :  { %3436 = vtanh.f32 %v735_v60 }
 0x313   :  { %v3427_v29 = vpop.eup %3426 }
 0x314   :  { %v3429_v19 = vpop.eup %3428  ;;  %v747_v25 = vadd.f32 1.0, %v3427_v29 }
 0x315   :  { %v759_v35 = vadd.f32 1.0, %v3429_v19 }
 0x316   :  { %3438 = vrcp.f32 %v747_v25 }
 0x317   :  { %v3431_v20 = vpop.eup %3430  ;;  %3440 = vrcp.f32 %v759_v35  ;;  %v805_v35 = vpop.permute.xlu1 %804 }
 0x318   :  { %v3433_v41 = vpop.eup %3432  ;;  %v748_v42 = vadd.f32 1.0, %v3431_v20  ;;  %3442 = vpow2.f32 %v2595_v33 }
 0x319   :  { %3444 = vtanh.f32 %v739_v37  ;;  %v760_v24 = vadd.f32 1.0, %v3433_v41  ;;  %v3435_v44 = vpop.eup %3434 }
 0x31a   :  { %3446 = vrcp.f32 %v748_v42  ;;  %v3437_v62 = vpop.eup %3436  ;;  %v773_v6 = vadd.f32 1.0, %v3435_v44 }
 0x31b   :  { %3448 = vrcp.f32 %v760_v24 }
 0x31c   :  { %3450 = vrcp.f32 %v773_v6 }
 0x320   :  { %v3439_v52 = vpop.eup %3438 }
 0x321   :  { %v3441_v54 = vpop.eup %3440  ;;  %v781_v57 = vmul.f32 %v3439_v52, %v3437_v62 }
 0x322   :  { %v3443_v28 = vpop.eup %3442  ;;  %v779_v40 = vmul.f32 %v3441_v54, %v4221_v50 }
 0x323   :  { %v3445_v13 = vpop.eup %3444  ;;  %v774_v11 = vadd.f32 1.0, %v3443_v28 }
 0x324   :  { %v3447_v61 = vpop.eup %3446  ;;  %v783_v0 = vadd.f32 %v781_v57, %v779_v40 }
 0x325   :  { %v3449_v2 = vpop.eup %3448  ;;  %v782_v5 = vmul.f32 %v3447_v61, %v3445_v13 }
 0x326   :  { %3452 = vtanh.f32 %v783_v0  ;;  %v811_v4 = vsub.f32 %v783_v0, %v4221_v50  ;;  %v780_v60 = vmul.f32 %v3449_v2, %v4223_v58  ;;  %v3451_v41 = vpop.eup %3450 }
 0x327   :  { %3454 = vrcp.f32 %v774_v11  ;;  %v2602_v11 = vld [vmem:[%s4853_s0 + $0xe0] sm:$0xff] }
 0x328   :  { %v813_v29 = vmul.f32 %v811_v4, %v800_v22  ;;  %v784_v19 = vadd.f32 %v782_v5, %v780_v60  ;;  %v2603_v60 = vld [vmem:[%s4853_s0 + $0xe8] sm:$0xff] }
 0x32a   :  { %3456 = vtanh.f32 %v784_v19  ;;  %v812_v25 = vsub.f32 %v784_v19, %v4223_v58  ;;  %v4302_v33 = vadd.f32 %v813_v29, %v4221_v50 }
 0x32c   :  { %v814_v37 = vmul.f32 %v812_v25, %v805_v35  ;;  %v2601_v25 = vld [vmem:[%s4853_s0 + $0xd8] sm:$0xff] }
 0x32e   :  { %v4305_v20 = vadd.f32 %v814_v37, %v4223_v58 }
 0x330   :  { %v3453_v42 = vpop.eup %3452 }
 0x331   :  { %v787_v24 = vmul.f32 %v3453_v42, %v3451_v41  ;;  %v3455_v44 = vpop.eup %3454 }
 0x333   :  { %v795_v62 = vsub.f32 %v787_v24, %v4227_v12 }
 0x334   :  { %v3457_v52 = vpop.eup %3456 }
 0x335   :  { %v807_v54 = vmul.f32 %v800_v22, %v795_v62  ;;  %v788_v57 = vmul.f32 %v3457_v52, %v3455_v44  ;;  %v2605_v52 = vld [vmem:[%s4853_s0 + $0xf8] sm:$0xff] }
 0x337   :  { %v4309_v6 = vadd.f32 %v807_v54, %v4227_v12  ;;  %v796_v50 = vsub.f32 %v788_v57, %v4235_v16  ;;  %v2598_v12 = vld [vmem:[%s4853_s0 + $0xc0] sm:$0xff]  ;;  %v2600_v54 = vld [vmem:[%s4853_s0 + $0xd0] sm:$0xff] }
 0x339   :  { %891 = vmatmul.mubr.f32.vlgmr.msra.gmra.mrb[12].mxu0 %v4309_v6  ;;  %968 = vmatmul.mubr.f32.vlgmr.msra.gmra.mrb[12].mxu1 %v4309_v6  ;;  %v808_v58 = vmul.f32 %v805_v35, %v796_v50 }
 0x33a   :  { %896 = vmatprep.mubr.f32.mxu0 %v3706_v7  ;;  %973 = vmatprep.mubr.f32.mxu1 %v3706_v7 }
 0x33b   :  { %v4317_v28 = vadd.f32 %v808_v58, %v4235_v16  ;;  %2969 = vmatpush1.bf16.msra.mxu0 %v3753_v8  ;;  %3001 = vmatpush1.bf16.msra.mxu1 %v3802_v26  ;;  %v2599_v16 = vld [vmem:[%s4853_s0 + $0xc8] sm:$0xff] }
 0x33c   :  { %2971 = vmatprep.subr.bf16.mxu0 %v3755_v9  ;;  %3003 = vmatprep.subr.bf16.mxu1 %v3827_v34 }
 0x33d   :  { %897 = vmatmul.mubr.f32.gmra.mrb[14].mxu0 %v4317_v28  ;;  %974 = vmatmul.mubr.f32.gmra.mrb[14].mxu1 %v4317_v28 }
 0x33e   :  { %1137 = vmatprep.mubr.f32.mxu0 %v3706_v7  ;;  %1214 = vmatprep.mubr.f32.mxu1 %v3706_v7 }
 0x33f   :  { %2973 = vmatpush1.bf16.msra.mxu0 %v3771_v15  ;;  %3005 = vmatpush1.bf16.msra.mxu1 %v3838_v38 }
 0x340   :  { %2975 = vmatprep.subr.bf16.mxu0 %v3780_v18  ;;  %3007 = vmatprep.subr.bf16.mxu1 %v3862_v46 }
 0x343   :  { %2977 = vmatpush1.bf16.msra.mxu0 %v3805_v27  ;;  %3009 = vmatpush1.bf16.msra.mxu1 %v3871_v49 }
 0x344   :  { %2979 = vmatprep.subr.bf16.mxu0 %v3818_v31  ;;  %3011 = vmatprep.subr.bf16.mxu1 %v3883_v53 }
 0x347   :  { %2981 = vmatpush1.bf16.msra.mxu0 %v3854_v43  ;;  %3013 = vmatpush1.bf16.msra.mxu1 %v3913_v63 }
 0x348   :  { %2983 = vmatprep.subr.bf16.mxu0 %v3865_v47  ;;  %3015 = vmatprep.subr.bf16.mxu1 %v3919_v1 }
 0x34b   :  { %2985 = vmatpush1.bf16.msra.mxu0 %v3892_v56  ;;  %3017 = vmatpush1.bf16.msra.mxu1 %v3952_v17 }
 0x34c   :  { %2987 = vmatprep.subr.bf16.mxu0 %v3901_v59  ;;  %3019 = vmatprep.subr.bf16.mxu1 %v3965_v21 }
 0x34f   :  { %2989 = vmatpush1.bf16.msra.mxu0 %v3934_v10  ;;  %3021 = vmatpush1.bf16.msra.mxu1 %v3995_v36 }
 0x350   :  { %2991 = vmatprep.subr.bf16.mxu0 %v3946_v14  ;;  %3023 = vmatprep.subr.bf16.mxu1 %v3999_v39 }
 0x353   :  { %2993 = vmatpush1.bf16.msra.mxu0 %v3983_v30  ;;  %3025 = vmatpush1.bf16.msra.mxu1 %v4019_v48 }
 0x354   :  { %2995 = vmatprep.subr.bf16.mxu0 %v3986_v32  ;;  %3027 = vmatprep.subr.bf16.mxu1 %v4023_v51 }
 0x357   :  { %2997 = vmatpush1.bf16.msra.mxu0 %v4015_v45  ;;  %3029 = vmatpush1.bf16.msra.mxu1 %v4034_v55 }
 0x358   :  { %3031 = vmatprep.subr.bf16.mxu0 %v3740_v3  ;;  %3063 = vmatprep.subr.bf16.mxu1 %v3794_v23 }
 0x40c   :  { %v892_v40 = vpop.f32.mrb[12].mxu0  ;;  %v969_v13 = vpop.f32.mrb[12].mxu1 }
 0x40d   :  { %v980_v61 = vadd.f32 %v2598_v12, %v892_v40  ;;  %v894_v0 = vpop.f32.mrb[13].mxu0  ;;  %v971_v2 = vpop.f32.mrb[13].mxu1  ;;  %v982_v58 = vadd.f32 %v2600_v54, %v969_v13  ;;  %v2604_v12 = vld [vmem:[%s4853_s0 + $0xf0] sm:$0xff] }
 0x40e   :  { %v981_v5 = vadd.f32 %v2599_v16, %v894_v0  ;;  %v983_v44 = vadd.f32 %v2601_v25, %v971_v2 }
 0x40f   :  { %v2606_v4 = vmul.f32 -1.442695, %v980_v61 }
 0x410   :  { %v2608_v22 = vmul.f32 -1.442695, %v981_v5  ;;  %v898_v29 = vpop.f32.mrb[14].mxu0  ;;  %v975_v19 = vpop.f32.mrb[14].mxu1  ;;  %v2610_v57 = vmul.f32 -1.442695, %v983_v44 }
 0x411   :  { %3458 = vpow2.f32 %v2606_v4  ;;  %v984_v35 = vadd.f32 %v2602_v11, %v898_v29  ;;  %v900_v37 = vpop.f32.mrb[15].mxu0  ;;  %v977_v41 = vpop.f32.mrb[15].mxu1  ;;  %v986_v5 = vadd.f32 %v2604_v12, %v975_v19 }
 0x412   :  { %3460 = vpow2.f32 %v2608_v22  ;;  %v985_v42 = vadd.f32 %v2603_v60, %v900_v37  ;;  %v987_v50 = vadd.f32 %v2605_v52, %v977_v41  ;;  %v1047_v12 = vpop.permute.xlu0 %1046 }
 0x413   :  { %v2607_v24 = vmul.f32 -1.442695, %v984_v35 }
 0x414   :  { %v2609_v62 = vmul.f32 -1.442695, %v985_v42  ;;  %v2611_v0 = vmul.f32 -1.442695, %v987_v50 }
 0x415   :  { %3462 = vpow2.f32 %v2607_v24 }
 0x416   :  { %3464 = vpow2.f32 %v2609_v62 }
 0x417   :  { %3466 = vpow2.f32 %v2610_v57 }
 0x418   :  { %3468 = vtanh.f32 %v982_v58 }
 0x41b   :  { %v3459_v16 = vpop.eup %3458 }
 0x41c   :  { %v3461_v40 = vpop.eup %3460  ;;  %v994_v61 = vadd.f32 1.0, %v3459_v16 }
 0x41d   :  { %v1006_v2 = vadd.f32 1.0, %v3461_v40 }
 0x41e   :  { %3470 = vrcp.f32 %v994_v61 }
 0x41f   :  { %v3463_v11 = vpop.eup %3462  ;;  %3472 = vrcp.f32 %v1006_v2  ;;  %v1052_v2 = vpop.permute.xlu1 %1051 }
 0x420   :  { %v3465_v4 = vpop.eup %3464  ;;  %v995_v60 = vadd.f32 1.0, %v3463_v11  ;;  %3474 = vpow2.f32 %v2611_v0 }
 0x421   :  { %3476 = vtanh.f32 %v986_v5  ;;  %v1007_v13 = vadd.f32 1.0, %v3465_v4  ;;  %v3467_v22 = vpop.eup %3466 }
 0x422   :  { %3478 = vrcp.f32 %v995_v60  ;;  %v3469_v29 = vpop.eup %3468  ;;  %v1020_v41 = vadd.f32 1.0, %v3467_v22 }
 0x423   :  { %3480 = vrcp.f32 %v1007_v13 }
 0x424   :  { %3482 = vrcp.f32 %v1020_v41 }
 0x428   :  { %v3471_v25 = vpop.eup %3470 }
 0x429   :  { %v3473_v35 = vpop.eup %3472  ;;  %v1028_v37 = vmul.f32 %v3471_v25, %v3469_v29 }
 0x42a   :  { %v3475_v42 = vpop.eup %3474  ;;  %v1026_v24 = vmul.f32 %v3473_v35, %v4302_v33 }
 0x42b   :  { %v3477_v19 = vpop.eup %3476  ;;  %v1021_v57 = vadd.f32 1.0, %v3475_v42 }
 0x42c   :  { %v3479_v44 = vpop.eup %3478  ;;  %v1030_v62 = vadd.f32 %v1028_v37, %v1026_v24 }
 0x42d   :  { %v3481_v52 = vpop.eup %3480  ;;  %v1029_v54 = vmul.f32 %v3479_v44, %v3477_v19 }
 0x42e   :  { %3484 = vtanh.f32 %v1030_v62  ;;  %v1058_v50 = vsub.f32 %v1030_v62, %v4302_v33  ;;  %v1027_v58 = vmul.f32 %v3481_v52, %v4305_v20  ;;  %v3483_v4 = vpop.eup %3482 }
 0x42f   :  { %3486 = vrcp.f32 %v1021_v57  ;;  %v2618_v57 = vld [vmem:[%s4853_s0 + $0x120] sm:$0xff] }
 0x430   :  { %v1060_v16 = vmul.f32 %v1058_v50, %v1047_v12  ;;  %v1031_v40 = vadd.f32 %v1029_v54, %v1027_v58  ;;  %v2619_v58 = vld [vmem:[%s4853_s0 + $0x128] sm:$0xff] }
 0x432   :  { %3488 = vtanh.f32 %v1031_v40  ;;  %v1059_v61 = vsub.f32 %v1031_v40, %v4305_v20  ;;  %v4384_v0 = vadd.f32 %v1060_v16, %v4302_v33 }
 0x434   :  { %v1061_v5 = vmul.f32 %v1059_v61, %v1052_v2  ;;  %v2617_v61 = vld [vmem:[%s4853_s0 + $0x118] sm:$0xff] }
 0x436   :  { %v4387_v11 = vadd.f32 %v1061_v5, %v4305_v20 }
 0x438   :  { %v3485_v60 = vpop.eup %3484 }
 0x439   :  { %v1034_v13 = vmul.f32 %v3485_v60, %v3483_v4  ;;  %v3487_v22 = vpop.eup %3486 }
 0x43b   :  { %v1042_v29 = vsub.f32 %v1034_v13, %v4309_v6 }
 0x43c   :  { %v3489_v25 = vpop.eup %3488 }
 0x43d   :  { %v1054_v35 = vmul.f32 %v1047_v12, %v1042_v29  ;;  %v1035_v37 = vmul.f32 %v3489_v25, %v3487_v22  ;;  %v2621_v25 = vld [vmem:[%s4853_s0 + $0x138] sm:$0xff] }
 0x43f   :  { %v4391_v41 = vadd.f32 %v1054_v35, %v4309_v6  ;;  %v1043_v33 = vsub.f32 %v1035_v37, %v4317_v28  ;;  %v2614_v6 = vld [vmem:[%s4853_s0 + $0x100] sm:$0xff]  ;;  %v2616_v35 = vld [vmem:[%s4853_s0 + $0x110] sm:$0xff] }
 0x441   :  { %1138 = vmatmul.mubr.f32.vlgmr.msra.gmra.mrb[16].mxu0 %v4391_v41  ;;  %1215 = vmatmul.mubr.f32.vlgmr.msra.gmra.mrb[16].mxu1 %v4391_v41  ;;  %v1055_v20 = vmul.f32 %v1052_v2, %v1043_v33 }
 0x442   :  { %1143 = vmatprep.mubr.f32.mxu0 %v3706_v7  ;;  %1220 = vmatprep.mubr.f32.mxu1 %v3706_v7 }
 0x443   :  { %v4399_v42 = vadd.f32 %v1055_v20, %v4317_v28  ;;  %3033 = vmatpush1.bf16.msra.mxu0 %v3753_v8  ;;  %3065 = vmatpush1.bf16.msra.mxu1 %v3802_v26  ;;  %v2615_v28 = vld [vmem:[%s4853_s0 + $0x108] sm:$0xff] }
 0x444   :  { %3035 = vmatprep.subr.bf16.mxu0 %v3755_v9  ;;  %3067 = vmatprep.subr.bf16.mxu1 %v3827_v34 }
 0x445   :  { %1144 = vmatmul.mubr.f32.gmra.mrb[18].mxu0 %v4399_v42  ;;  %1221 = vmatmul.mubr.f32.gmra.mrb[18].mxu1 %v4399_v42 }
 0x446   :  { %1384 = vmatprep.mubr.f32.mxu0 %v3706_v7  ;;  %1461 = vmatprep.mubr.f32.mxu1 %v3706_v7 }
 0x447   :  { %3037 = vmatpush1.bf16.msra.mxu0 %v3771_v15  ;;  %3069 = vmatpush1.bf16.msra.mxu1 %v3838_v38 }
 0x448   :  { %3039 = vmatprep.subr.bf16.mxu0 %v3780_v18  ;;  %3071 = vmatprep.subr.bf16.mxu1 %v3862_v46 }
 0x44b   :  { %3041 = vmatpush1.bf16.msra.mxu0 %v3805_v27  ;;  %3073 = vmatpush1.bf16.msra.mxu1 %v3871_v49 }
 0x44c   :  { %3043 = vmatprep.subr.bf16.mxu0 %v3818_v31  ;;  %3075 = vmatprep.subr.bf16.mxu1 %v3883_v53 }
 0x44f   :  { %3045 = vmatpush1.bf16.msra.mxu0 %v3854_v43  ;;  %3077 = vmatpush1.bf16.msra.mxu1 %v3913_v63 }
 0x450   :  { %3047 = vmatprep.subr.bf16.mxu0 %v3865_v47  ;;  %3079 = vmatprep.subr.bf16.mxu1 %v3919_v1 }
 0x453   :  { %3049 = vmatpush1.bf16.msra.mxu0 %v3892_v56  ;;  %3081 = vmatpush1.bf16.msra.mxu1 %v3952_v17 }
 0x454   :  { %3051 = vmatprep.subr.bf16.mxu0 %v3901_v59  ;;  %3083 = vmatprep.subr.bf16.mxu1 %v3965_v21 }
 0x457   :  { %3053 = vmatpush1.bf16.msra.mxu0 %v3934_v10  ;;  %3085 = vmatpush1.bf16.msra.mxu1 %v3995_v36 }
 0x458   :  { %3055 = vmatprep.subr.bf16.mxu0 %v3946_v14  ;;  %3087 = vmatprep.subr.bf16.mxu1 %v3999_v39 }
 0x45b   :  { %3057 = vmatpush1.bf16.msra.mxu0 %v3983_v30  ;;  %3089 = vmatpush1.bf16.msra.mxu1 %v4019_v48 }
 0x45c   :  { %3059 = vmatprep.subr.bf16.mxu0 %v3986_v32  ;;  %3091 = vmatprep.subr.bf16.mxu1 %v4023_v51 }
 0x45f   :  { %3061 = vmatpush1.bf16.msra.mxu0 %v4015_v45  ;;  %3093 = vmatpush1.bf16.msra.mxu1 %v4034_v55 }
 0x460   :  { %3095 = vmatprep.subr.bf16.mxu0 %v3740_v3  ;;  %3127 = vmatprep.subr.bf16.mxu1 %v3794_v23 }
 0x514   :  { %v1139_v24 = vpop.f32.mrb[16].mxu0  ;;  %v1216_v19 = vpop.f32.mrb[16].mxu1 }
 0x515   :  { %v1227_v44 = vadd.f32 %v2614_v6, %v1139_v24  ;;  %v1141_v62 = vpop.f32.mrb[17].mxu0  ;;  %v1218_v52 = vpop.f32.mrb[17].mxu1  ;;  %v1229_v20 = vadd.f32 %v2616_v35, %v1216_v19  ;;  %v2620_v6 = vld [vmem:[%s4853_s0 + $0x130] sm:$0xff] }
 0x516   :  { %v1228_v54 = vadd.f32 %v2615_v28, %v1141_v62  ;;  %v1230_v22 = vadd.f32 %v2617_v61, %v1218_v52 }
 0x517   :  { %v2622_v50 = vmul.f32 -1.442695, %v1227_v44 }
 0x518   :  { %v2624_v12 = vmul.f32 -1.442695, %v1228_v54  ;;  %v1145_v16 = vpop.f32.mrb[18].mxu0  ;;  %v1222_v40 = vpop.f32.mrb[18].mxu1  ;;  %v2626_v37 = vmul.f32 -1.442695, %v1230_v22 }
 0x519   :  { %3490 = vpow2.f32 %v2622_v50  ;;  %v1231_v2 = vadd.f32 %v2618_v57, %v1145_v16  ;;  %v1147_v5 = vpop.f32.mrb[19].mxu0  ;;  %v1224_v4 = vpop.f32.mrb[19].mxu1  ;;  %v1233_v54 = vadd.f32 %v2620_v6, %v1222_v40 }
 0x51a   :  { %3492 = vpow2.f32 %v2624_v12  ;;  %v1232_v60 = vadd.f32 %v2619_v58, %v1147_v5  ;;  %v1234_v33 = vadd.f32 %v2621_v25, %v1224_v4  ;;  %v1294_v6 = vpop.permute.xlu0 %1293 }
 0x51b   :  { %v2623_v13 = vmul.f32 -1.442695, %v1231_v2 }
 0x51c   :  { %v2625_v29 = vmul.f32 -1.442695, %v1232_v60  ;;  %v2627_v62 = vmul.f32 -1.442695, %v1234_v33 }
 0x51d   :  { %3494 = vpow2.f32 %v2623_v13 }
 0x51e   :  { %3496 = vpow2.f32 %v2625_v29 }
 0x51f   :  { %3498 = vpow2.f32 %v2626_v37 }
 0x520   :  { %3500 = vtanh.f32 %v1229_v20 }
 0x523   :  { %v3491_v28 = vpop.eup %3490 }
 0x524   :  { %v3493_v24 = vpop.eup %3492  ;;  %v1241_v44 = vadd.f32 1.0, %v3491_v28 }
 0x525   :  { %v1253_v52 = vadd.f32 1.0, %v3493_v24 }
 0x526   :  { %3502 = vrcp.f32 %v1241_v44 }
 0x527   :  { %v3495_v57 = vpop.eup %3494  ;;  %3504 = vrcp.f32 %v1253_v52  ;;  %v1299_v52 = vpop.permute.xlu1 %1298 }
 0x528   :  { %v3497_v50 = vpop.eup %3496  ;;  %v1242_v58 = vadd.f32 1.0, %v3495_v57  ;;  %3506 = vpow2.f32 %v2627_v62 }
 0x529   :  { %3508 = vtanh.f32 %v1233_v54  ;;  %v1254_v19 = vadd.f32 1.0, %v3497_v50  ;;  %v3499_v12 = vpop.eup %3498 }
 0x52a   :  { %3510 = vrcp.f32 %v1242_v58  ;;  %v3501_v16 = vpop.eup %3500  ;;  %v1267_v4 = vadd.f32 1.0, %v3499_v12 }
 0x52b   :  { %3512 = vrcp.f32 %v1254_v19 }
 0x52c   :  { %3514 = vrcp.f32 %v1267_v4 }
 0x530   :  { %v3503_v61 = vpop.eup %3502 }
 0x531   :  { %v3505_v2 = vpop.eup %3504  ;;  %v1275_v5 = vmul.f32 %v3503_v61, %v3501_v16 }
 0x532   :  { %v3507_v60 = vpop.eup %3506  ;;  %v1273_v13 = vmul.f32 %v3505_v2, %v4384_v0 }
 0x533   :  { %v3509_v40 = vpop.eup %3508  ;;  %v1268_v37 = vadd.f32 1.0, %v3507_v60 }
 0x534   :  { %v3511_v22 = vpop.eup %3510  ;;  %v1277_v29 = vadd.f32 %v1275_v5, %v1273_v13 }
 0x535   :  { %v3513_v25 = vpop.eup %3512  ;;  %v1276_v35 = vmul.f32 %v3511_v22, %v3509_v40 }
 0x536   :  { %3516 = vtanh.f32 %v1277_v29  ;;  %v1305_v33 = vsub.f32 %v1277_v29, %v4384_v0  ;;  %v1274_v20 = vmul.f32 %v3513_v25, %v4387_v11  ;;  %v3515_v50 = vpop.eup %3514 }
 0x537   :  { %3518 = vrcp.f32 %v1268_v37  ;;  %v2634_v37 = vld [vmem:[%s4853_s0 + $0x160] sm:$0xff] }
 0x538   :  { %v1307_v28 = vmul.f32 %v1305_v33, %v1294_v6  ;;  %v1278_v24 = vadd.f32 %v1276_v35, %v1274_v20  ;;  %v2635_v20 = vld [vmem:[%s4853_s0 + $0x168] sm:$0xff] }
 0x53a   :  { %3520 = vtanh.f32 %v1278_v24  ;;  %v1306_v44 = vsub.f32 %v1278_v24, %v4387_v11  ;;  %v4466_v62 = vadd.f32 %v1307_v28, %v4384_v0 }
 0x53c   :  { %v1308_v54 = vmul.f32 %v1306_v44, %v1299_v52  ;;  %v2633_v44 = vld [vmem:[%s4853_s0 + $0x158] sm:$0xff] }
 0x53e   :  { %v4469_v57 = vadd.f32 %v1308_v54, %v4387_v11 }
 0x540   :  { %v3517_v58 = vpop.eup %3516 }
 0x541   :  { %v1281_v19 = vmul.f32 %v3517_v58, %v3515_v50  ;;  %v3519_v12 = vpop.eup %3518 }
 0x543   :  { %v1289_v16 = vsub.f32 %v1281_v19, %v4391_v41 }
 0x544   :  { %v3521_v61 = vpop.eup %3520 }
 0x545   :  { %v1301_v2 = vmul.f32 %v1294_v6, %v1289_v16  ;;  %v1282_v5 = vmul.f32 %v3521_v61, %v3519_v12  ;;  %v2637_v61 = vld [vmem:[%s4853_s0 + $0x178] sm:$0xff] }
 0x547   :  { %v4473_v4 = vadd.f32 %v1301_v2, %v4391_v41  ;;  %v1290_v0 = vsub.f32 %v1282_v5, %v4399_v42  ;;  %v2630_v41 = vld [vmem:[%s4853_s0 + $0x140] sm:$0xff]  ;;  %v2632_v2 = vld [vmem:[%s4853_s0 + $0x150] sm:$0xff] }
 0x549   :  { %1385 = vmatmul.mubr.f32.vlgmr.msra.gmra.mrb[20].mxu0 %v4473_v4  ;;  %1462 = vmatmul.mubr.f32.vlgmr.msra.gmra.mrb[20].mxu1 %v4473_v4  ;;  %v1302_v11 = vmul.f32 %v1299_v52, %v1290_v0 }
 0x54a   :  { %1390 = vmatprep.mubr.f32.mxu0 %v3706_v7  ;;  %1467 = vmatprep.mubr.f32.mxu1 %v3706_v7 }
 0x54b   :  { %v4481_v60 = vadd.f32 %v1302_v11, %v4399_v42  ;;  %3097 = vmatpush1.bf16.msra.mxu0 %v3753_v8  ;;  %3129 = vmatpush1.bf16.msra.mxu1 %v3802_v26  ;;  %v2631_v42 = vld [vmem:[%s4853_s0 + $0x148] sm:$0xff] }
 0x54c   :  { %3099 = vmatprep.subr.bf16.mxu0 %v3755_v9  ;;  %3131 = vmatprep.subr.bf16.mxu1 %v3827_v34 }
 0x54d   :  { %1391 = vmatmul.mubr.f32.gmra.mrb[22].mxu0 %v4481_v60  ;;  %1468 = vmatmul.mubr.f32.gmra.mrb[22].mxu1 %v4481_v60 }
 0x54e   :  { %1631 = vmatprep.mubr.f32.mxu0 %v3706_v7  ;;  %1708 = vmatprep.mubr.f32.mxu1 %v3706_v7 }
 0x54f   :  { %3101 = vmatpush1.bf16.msra.mxu0 %v3771_v15  ;;  %3133 = vmatpush1.bf16.msra.mxu1 %v3838_v38 }
 0x550   :  { %3103 = vmatprep.subr.bf16.mxu0 %v3780_v18  ;;  %3135 = vmatprep.subr.bf16.mxu1 %v3862_v46 }
 0x553   :  { %3105 = vmatpush1.bf16.msra.mxu0 %v3805_v27  ;;  %3137 = vmatpush1.bf16.msra.mxu1 %v3871_v49 }
 0x554   :  { %3107 = vmatprep.subr.bf16.mxu0 %v3818_v31  ;;  %3139 = vmatprep.subr.bf16.mxu1 %v3883_v53 }
 0x557   :  { %3109 = vmatpush1.bf16.msra.mxu0 %v3854_v43  ;;  %3141 = vmatpush1.bf16.msra.mxu1 %v3913_v63 }
 0x558   :  { %3111 = vmatprep.subr.bf16.mxu0 %v3865_v47  ;;  %3143 = vmatprep.subr.bf16.mxu1 %v3919_v1 }
 0x55b   :  { %3113 = vmatpush1.bf16.msra.mxu0 %v3892_v56  ;;  %3145 = vmatpush1.bf16.msra.mxu1 %v3952_v17 }
 0x55c   :  { %3115 = vmatprep.subr.bf16.mxu0 %v3901_v59  ;;  %3147 = vmatprep.subr.bf16.mxu1 %v3965_v21 }
 0x55f   :  { %3117 = vmatpush1.bf16.msra.mxu0 %v3934_v10  ;;  %3149 = vmatpush1.bf16.msra.mxu1 %v3995_v36 }
 0x560   :  { %3119 = vmatprep.subr.bf16.mxu0 %v3946_v14  ;;  %3151 = vmatprep.subr.bf16.mxu1 %v3999_v39 }
 0x563   :  { %3121 = vmatpush1.bf16.msra.mxu0 %v3983_v30  ;;  %3153 = vmatpush1.bf16.msra.mxu1 %v4019_v48 }
 0x564   :  { %3123 = vmatprep.subr.bf16.mxu0 %v3986_v32  ;;  %3155 = vmatprep.subr.bf16.mxu1 %v4023_v51 }
 0x567   :  { %3125 = vmatpush1.bf16.msra.mxu0 %v4015_v45  ;;  %3157 = vmatpush1.bf16.msra.mxu1 %v4034_v55 }
 0x568   :  { %3159 = vmatprep.subr.bf16.mxu0 %v3740_v3  ;;  %3191 = vmatprep.subr.bf16.mxu1 %v3794_v23 }
 0x61c   :  { %v1386_v13 = vpop.f32.mrb[20].mxu0  ;;  %v1463_v40 = vpop.f32.mrb[20].mxu1 }
 0x61d   :  { %v1474_v22 = vadd.f32 %v2630_v41, %v1386_v13  ;;  %v1388_v29 = vpop.f32.mrb[21].mxu0  ;;  %v1465_v25 = vpop.f32.mrb[21].mxu1  ;;  %v1476_v11 = vadd.f32 %v2632_v2, %v1463_v40  ;;  %v2636_v41 = vld [vmem:[%s4853_s0 + $0x170] sm:$0xff] }
 0x61e   :  { %v1475_v35 = vadd.f32 %v2631_v42, %v1388_v29  ;;  %v1477_v12 = vadd.f32 %v2633_v44, %v1465_v25 }
 0x61f   :  { %v2638_v33 = vmul.f32 -1.442695, %v1474_v22 }
 0x620   :  { %v2640_v6 = vmul.f32 -1.442695, %v1475_v35  ;;  %v1392_v28 = vpop.f32.mrb[22].mxu0  ;;  %v1469_v24 = vpop.f32.mrb[22].mxu1  ;;  %v2642_v5 = vmul.f32 -1.442695, %v1477_v12 }
 0x621   :  { %3522 = vpow2.f32 %v2638_v33  ;;  %v1478_v52 = vadd.f32 %v2634_v37, %v1392_v28  ;;  %v1394_v54 = vpop.f32.mrb[23].mxu0  ;;  %v1471_v50 = vpop.f32.mrb[23].mxu1  ;;  %v1480_v35 = vadd.f32 %v2636_v41, %v1469_v24 }
 0x622   :  { %3524 = vpow2.f32 %v2640_v6  ;;  %v1479_v58 = vadd.f32 %v2635_v20, %v1394_v54  ;;  %v1481_v0 = vadd.f32 %v2637_v61, %v1471_v50  ;;  %v1541_v41 = vpop.permute.xlu0 %1540 }
 0x623   :  { %v2639_v19 = vmul.f32 -1.442695, %v1478_v52 }
 0x624   :  { %v2641_v16 = vmul.f32 -1.442695, %v1479_v58  ;;  %v2643_v29 = vmul.f32 -1.442695, %v1481_v0 }
 0x625   :  { %3526 = vpow2.f32 %v2639_v19 }
 0x626   :  { %3528 = vpow2.f32 %v2641_v16 }
 0x627   :  { %3530 = vpow2.f32 %v2642_v5 }
 0x628   :  { %3532 = vtanh.f32 %v1476_v11 }
 0x62b   :  { %v3523_v42 = vpop.eup %3522 }
 0x62c   :  { %v3525_v13 = vpop.eup %3524  ;;  %v1488_v22 = vadd.f32 1.0, %v3523_v42 }
 0x62d   :  { %v1500_v25 = vadd.f32 1.0, %v3525_v13 }
 0x62e   :  { %3534 = vrcp.f32 %v1488_v22 }
 0x62f   :  { %v3527_v37 = vpop.eup %3526  ;;  %3536 = vrcp.f32 %v1500_v25  ;;  %v1546_v25 = vpop.permute.xlu1 %1545 }
 0x630   :  { %v3529_v33 = vpop.eup %3528  ;;  %v1489_v20 = vadd.f32 1.0, %v3527_v37  ;;  %3538 = vpow2.f32 %v2643_v29 }
 0x631   :  { %3540 = vtanh.f32 %v1480_v35  ;;  %v1501_v40 = vadd.f32 1.0, %v3529_v33  ;;  %v3531_v6 = vpop.eup %3530 }
 0x632   :  { %3542 = vrcp.f32 %v1489_v20  ;;  %v3533_v28 = vpop.eup %3532  ;;  %v1514_v50 = vadd.f32 1.0, %v3531_v6 }
 0x633   :  { %3544 = vrcp.f32 %v1501_v40 }
 0x634   :  { %3546 = vrcp.f32 %v1514_v50 }
 0x638   :  { %v3535_v44 = vpop.eup %3534 }
 0x639   :  { %v3537_v52 = vpop.eup %3536  ;;  %v1522_v54 = vmul.f32 %v3535_v44, %v3533_v28 }
 0x63a   :  { %v3539_v58 = vpop.eup %3538  ;;  %v1520_v19 = vmul.f32 %v3537_v52, %v4466_v62 }
 0x63b   :  { %v3541_v24 = vpop.eup %3540  ;;  %v1515_v5 = vadd.f32 1.0, %v3539_v58 }
 0x63c   :  { %v3543_v12 = vpop.eup %3542  ;;  %v1524_v16 = vadd.f32 %v1522_v54, %v1520_v19 }
 0x63d   :  { %v3545_v61 = vpop.eup %3544  ;;  %v1523_v2 = vmul.f32 %v3543_v12, %v3541_v24 }
 0x63e   :  { %3548 = vtanh.f32 %v1524_v16  ;;  %v1552_v0 = vsub.f32 %v1524_v16, %v4466_v62  ;;  %v1521_v11 = vmul.f32 %v3545_v61, %v4469_v57  ;;  %v3547_v33 = vpop.eup %3546 }
 0x63f   :  { %3550 = vrcp.f32 %v1515_v5  ;;  %v2650_v5 = vld [vmem:[%s4853_s0 + $0x1a0] sm:$0xff] }
 0x640   :  { %v1554_v42 = vmul.f32 %v1552_v0, %v1541_v41  ;;  %v1525_v13 = vadd.f32 %v1523_v2, %v1521_v11  ;;  %v2651_v11 = vld [vmem:[%s4853_s0 + $0x1a8] sm:$0xff] }
 0x642   :  { %3552 = vtanh.f32 %v1525_v13  ;;  %v1553_v22 = vsub.f32 %v1525_v13, %v4469_v57  ;;  %v4548_v29 = vadd.f32 %v1554_v42, %v4466_v62 }
 0x644   :  { %v1555_v35 = vmul.f32 %v1553_v22, %v1546_v25  ;;  %v2649_v22 = vld [vmem:[%s4853_s0 + $0x198] sm:$0xff] }
 0x646   :  { %v4551_v37 = vadd.f32 %v1555_v35, %v4469_v57 }
 0x648   :  { %v3549_v20 = vpop.eup %3548 }
 0x649   :  { %v1528_v40 = vmul.f32 %v3549_v20, %v3547_v33  ;;  %v3551_v6 = vpop.eup %3550 }
 0x64b   :  { %v1536_v28 = vsub.f32 %v1528_v40, %v4473_v4 }
 0x64c   :  { %v3553_v44 = vpop.eup %3552 }
 0x64d   :  { %v1548_v52 = vmul.f32 %v1541_v41, %v1536_v28  ;;  %v1529_v54 = vmul.f32 %v3553_v44, %v3551_v6  ;;  %v2653_v44 = vld [vmem:[%s4853_s0 + $0x1b8] sm:$0xff] }
 0x64f   :  { %v4555_v50 = vadd.f32 %v1548_v52, %v4473_v4  ;;  %v1537_v62 = vsub.f32 %v1529_v54, %v4481_v60  ;;  %v2646_v4 = vld [vmem:[%s4853_s0 + $0x180] sm:$0xff]  ;;  %v2648_v52 = vld [vmem:[%s4853_s0 + $0x190] sm:$0xff] }
 0x651   :  { %1632 = vmatmul.mubr.f32.vlgmr.msra.gmra.mrb[24].mxu0 %v4555_v50  ;;  %1709 = vmatmul.mubr.f32.vlgmr.msra.gmra.mrb[24].mxu1 %v4555_v50  ;;  %v1549_v57 = vmul.f32 %v1546_v25, %v1537_v62 }
 0x652   :  { %1637 = vmatprep.mubr.f32.mxu0 %v3706_v7  ;;  %1714 = vmatprep.mubr.f32.mxu1 %v3706_v7 }
 0x653   :  { %v4563_v58 = vadd.f32 %v1549_v57, %v4481_v60  ;;  %3161 = vmatpush1.bf16.msra.mxu0 %v3753_v8  ;;  %3193 = vmatpush1.bf16.msra.mxu1 %v3802_v26  ;;  %v2647_v60 = vld [vmem:[%s4853_s0 + $0x188] sm:$0xff] }
 0x654   :  { %3163 = vmatprep.subr.bf16.mxu0 %v3755_v9  ;;  %3195 = vmatprep.subr.bf16.mxu1 %v3827_v34 }
 0x655   :  { %1638 = vmatmul.mubr.f32.gmra.mrb[26].mxu0 %v4563_v58  ;;  %1715 = vmatmul.mubr.f32.gmra.mrb[26].mxu1 %v4563_v58 }
 0x656   :  { %1878 = vmatprep.mubr.f32.mxu0 %v3706_v7  ;;  %1955 = vmatprep.mubr.f32.mxu1 %v3706_v7 }
 0x657   :  { %3165 = vmatpush1.bf16.msra.mxu0 %v3771_v15  ;;  %3197 = vmatpush1.bf16.msra.mxu1 %v3838_v38 }
 0x658   :  { %3167 = vmatprep.subr.bf16.mxu0 %v3780_v18  ;;  %3199 = vmatprep.subr.bf16.mxu1 %v3862_v46 }
 0x65b   :  { %3169 = vmatpush1.bf16.msra.mxu0 %v3805_v27  ;;  %3201 = vmatpush1.bf16.msra.mxu1 %v3871_v49 }
 0x65c   :  { %3171 = vmatprep.subr.bf16.mxu0 %v3818_v31  ;;  %3203 = vmatprep.subr.bf16.mxu1 %v3883_v53 }
 0x65f   :  { %3173 = vmatpush1.bf16.msra.mxu0 %v3854_v43  ;;  %3205 = vmatpush1.bf16.msra.mxu1 %v3913_v63 }
 0x660   :  { %3175 = vmatprep.subr.bf16.mxu0 %v3865_v47  ;;  %3207 = vmatprep.subr.bf16.mxu1 %v3919_v1 }
 0x663   :  { %3177 = vmatpush1.bf16.msra.mxu0 %v3892_v56  ;;  %3209 = vmatpush1.bf16.msra.mxu1 %v3952_v17 }
 0x664   :  { %3179 = vmatprep.subr.bf16.mxu0 %v3901_v59  ;;  %3211 = vmatprep.subr.bf16.mxu1 %v3965_v21 }
 0x667   :  { %3181 = vmatpush1.bf16.msra.mxu0 %v3934_v10  ;;  %3213 = vmatpush1.bf16.msra.mxu1 %v3995_v36 }
 0x668   :  { %3183 = vmatprep.subr.bf16.mxu0 %v3946_v14  ;;  %3215 = vmatprep.subr.bf16.mxu1 %v3999_v39 }
 0x66b   :  { %3185 = vmatpush1.bf16.msra.mxu0 %v3983_v30  ;;  %3217 = vmatpush1.bf16.msra.mxu1 %v4019_v48 }
 0x66c   :  { %3187 = vmatprep.subr.bf16.mxu0 %v3986_v32  ;;  %3219 = vmatprep.subr.bf16.mxu1 %v4023_v51 }
 0x66f   :  { %3189 = vmatpush1.bf16.msra.mxu0 %v4015_v45  ;;  %3221 = vmatpush1.bf16.msra.mxu1 %v4034_v55 }
 0x670   :  { %3223 = vmatprep.subr.bf16.mxu0 %v3740_v3  ;;  %3255 = vmatprep.subr.bf16.mxu1 %v3794_v23 }
 0x724   :  { %v1633_v19 = vpop.f32.mrb[24].mxu0  ;;  %v1710_v24 = vpop.f32.mrb[24].mxu1 }
 0x725   :  { %v1721_v12 = vadd.f32 %v2646_v4, %v1633_v19  ;;  %v1635_v16 = vpop.f32.mrb[25].mxu0  ;;  %v1712_v61 = vpop.f32.mrb[25].mxu1  ;;  %v1723_v57 = vadd.f32 %v2648_v52, %v1710_v24  ;;  %v2652_v4 = vld [vmem:[%s4853_s0 + $0x1b0] sm:$0xff] }
 0x726   :  { %v1722_v2 = vadd.f32 %v2647_v60, %v1635_v16  ;;  %v1724_v6 = vadd.f32 %v2649_v22, %v1712_v61 }
 0x727   :  { %v2654_v0 = vmul.f32 -1.442695, %v1721_v12 }
 0x728   :  { %v2656_v41 = vmul.f32 -1.442695, %v1722_v2  ;;  %v1639_v42 = vpop.f32.mrb[26].mxu0  ;;  %v1716_v13 = vpop.f32.mrb[26].mxu1  ;;  %v2658_v54 = vmul.f32 -1.442695, %v1724_v6 }
 0x729   :  { %3554 = vpow2.f32 %v2654_v0  ;;  %v1725_v25 = vadd.f32 %v2650_v5, %v1639_v42  ;;  %v1641_v35 = vpop.f32.mrb[27].mxu0  ;;  %v1718_v33 = vpop.f32.mrb[27].mxu1  ;;  %v1727_v2 = vadd.f32 %v2652_v4, %v1716_v13 }
 0x72a   :  { %3556 = vpow2.f32 %v2656_v41  ;;  %v1726_v20 = vadd.f32 %v2651_v11, %v1641_v35  ;;  %v1728_v62 = vadd.f32 %v2653_v44, %v1718_v33  ;;  %v1788_v4 = vpop.permute.xlu0 %1787 }
 0x72b   :  { %v2655_v40 = vmul.f32 -1.442695, %v1725_v25 }
 0x72c   :  { %v2657_v28 = vmul.f32 -1.442695, %v1726_v20  ;;  %v2659_v16 = vmul.f32 -1.442695, %v1728_v62 }
 0x72d   :  { %3558 = vpow2.f32 %v2655_v40 }
 0x72e   :  { %3560 = vpow2.f32 %v2657_v28 }
 0x72f   :  { %3562 = vpow2.f32 %v2658_v54 }
 0x730   :  { %3564 = vtanh.f32 %v1723_v57 }
 0x733   :  { %v3555_v60 = vpop.eup %3554 }
 0x734   :  { %v3557_v19 = vpop.eup %3556  ;;  %v1735_v12 = vadd.f32 1.0, %v3555_v60 }
 0x735   :  { %v1747_v61 = vadd.f32 1.0, %v3557_v19 }
 0x736   :  { %3566 = vrcp.f32 %v1735_v12 }
 0x737   :  { %v3559_v5 = vpop.eup %3558  ;;  %3568 = vrcp.f32 %v1747_v61  ;;  %v1793_v61 = vpop.permute.xlu1 %1792 }
 0x738   :  { %v3561_v0 = vpop.eup %3560  ;;  %v1736_v11 = vadd.f32 1.0, %v3559_v5  ;;  %3570 = vpow2.f32 %v2659_v16 }
 0x739   :  { %3572 = vtanh.f32 %v1727_v2  ;;  %v1748_v24 = vadd.f32 1.0, %v3561_v0  ;;  %v3563_v41 = vpop.eup %3562 }
 0x73a   :  { %3574 = vrcp.f32 %v1736_v11  ;;  %v3565_v42 = vpop.eup %3564  ;;  %v1761_v33 = vadd.f32 1.0, %v3563_v41 }
 0x73b   :  { %3576 = vrcp.f32 %v1748_v24 }
 0x73c   :  { %3578 = vrcp.f32 %v1761_v33 }
 0x740   :  { %v3567_v22 = vpop.eup %3566 }
 0x741   :  { %v3569_v25 = vpop.eup %3568  ;;  %v1769_v35 = vmul.f32 %v3567_v22, %v3565_v42 }
 0x742   :  { %v3571_v20 = vpop.eup %3570  ;;  %v1767_v40 = vmul.f32 %v3569_v25, %v4548_v29 }
 0x743   :  { %v3573_v13 = vpop.eup %3572  ;;  %v1762_v54 = vadd.f32 1.0, %v3571_v20 }
 0x744   :  { %v3575_v6 = vpop.eup %3574  ;;  %v1771_v28 = vadd.f32 %v1769_v35, %v1767_v40 }
 0x745   :  { %v3577_v44 = vpop.eup %3576  ;;  %v1770_v52 = vmul.f32 %v3575_v6, %v3573_v13 }
 0x746   :  { %3580 = vtanh.f32 %v1771_v28  ;;  %v1799_v62 = vsub.f32 %v1771_v28, %v4548_v29  ;;  %v1768_v57 = vmul.f32 %v3577_v44, %v4551_v37  ;;  %v3579_v0 = vpop.eup %3578 }
 0x747   :  { %3582 = vrcp.f32 %v1762_v54 }
 0x748   :  { %v1801_v60 = vmul.f32 %v1799_v62, %v1788_v4  ;;  %v1772_v19 = vadd.f32 %v1770_v52, %v1768_v57 }
 0x74a   :  { %3584 = vtanh.f32 %v1772_v19  ;;  %v1800_v12 = vsub.f32 %v1772_v19, %v4551_v37  ;;  %v4630_v16 = vadd.f32 %v1801_v60, %v4548_v29  ;;  %v2665_v60 = vld [vmem:[%s4853_s0 + $0x1d8] sm:$0xff] }
 0x74c   :  { %v1802_v2 = vmul.f32 %v1800_v12, %v1793_v61 }
 0x74e   :  { %v4633_v5 = vadd.f32 %v1802_v2, %v4551_v37 }
 0x750   :  { %v3581_v11 = vpop.eup %3580 }
 0x751   :  { %v1775_v24 = vmul.f32 %v3581_v11, %v3579_v0  ;;  %v3583_v41 = vpop.eup %3582 }
 0x753   :  { %v1783_v42 = vsub.f32 %v1775_v24, %v4555_v50 }
 0x754   :  { %v3585_v22 = vpop.eup %3584 }
 0x755   :  { %v1795_v25 = vmul.f32 %v1788_v4, %v1783_v42  ;;  %v1776_v35 = vmul.f32 %v3585_v22, %v3583_v41  ;;  %v2669_v41 = vld [vmem:[%s4853_s0 + $0x1f8] sm:$0xff]  ;;  %v2664_v42 = vld [vmem:[%s4853_s0 + $0x1d0] sm:$0xff] }
 0x757   :  { %v4637_v33 = vadd.f32 %v1795_v25, %v4555_v50  ;;  %v1784_v29 = vsub.f32 %v1776_v35, %v4563_v58  ;;  %v2662_v50 = vld [vmem:[%s4853_s0 + $0x1c0] sm:$0xff] }
 0x759   :  { %1879 = vmatmul.mubr.f32.vlgmr.msra.gmra.mrb[28].mxu0 %v4637_v33  ;;  %1956 = vmatmul.mubr.f32.vlgmr.msra.gmra.mrb[28].mxu1 %v4637_v33  ;;  %v1796_v37 = vmul.f32 %v1793_v61, %v1784_v29  ;;  %v2668_v29 = vld [vmem:[%s4853_s0 + $0x1f0] sm:$0xff] }
 0x75a   :  { %1884 = vmatprep.mubr.f32.mxu0 %v3706_v7  ;;  %1961 = vmatprep.mubr.f32.mxu1 %v3706_v7 }
 0x75b   :  { %v4645_v20 = vadd.f32 %v1796_v37, %v4563_v58  ;;  %3225 = vmatpush1.bf16.msra.mxu0 %v3753_v8  ;;  %3257 = vmatpush1.bf16.msra.mxu1 %v3802_v26  ;;  %v2663_v58 = vld [vmem:[%s4853_s0 + $0x1c8] sm:$0xff] }
 0x75c   :  { %3227 = vmatprep.subr.bf16.mxu0 %v3755_v9  ;;  %3259 = vmatprep.subr.bf16.mxu1 %v3827_v34 }
 0x75d   :  { %1885 = vmatmul.mubr.f32.gmra.mrb[30].mxu0 %v4645_v20  ;;  %1962 = vmatmul.mubr.f32.gmra.mrb[30].mxu1 %v4645_v20 }
 0x75e   :  { %2125 = vmatprep.mubr.f32.mxu0 %v3706_v7  ;;  %2202 = vmatprep.mubr.f32.mxu1 %v3706_v7 }
 0x75f   :  { %3229 = vmatpush1.bf16.msra.mxu0 %v3771_v15  ;;  %3261 = vmatpush1.bf16.msra.mxu1 %v3838_v38 }
 0x760   :  { %3231 = vmatprep.subr.bf16.mxu0 %v3780_v18  ;;  %3263 = vmatprep.subr.bf16.mxu1 %v3862_v46 }
 0x763   :  { %3233 = vmatpush1.bf16.msra.mxu0 %v3805_v27  ;;  %3265 = vmatpush1.bf16.msra.mxu1 %v3871_v49 }
 0x764   :  { %3235 = vmatprep.subr.bf16.mxu0 %v3818_v31  ;;  %3267 = vmatprep.subr.bf16.mxu1 %v3883_v53 }
 0x767   :  { %3237 = vmatpush1.bf16.msra.mxu0 %v3854_v43  ;;  %3269 = vmatpush1.bf16.msra.mxu1 %v3913_v63 }
 0x768   :  { %3239 = vmatprep.subr.bf16.mxu0 %v3865_v47  ;;  %3271 = vmatprep.subr.bf16.mxu1 %v3919_v1 }
 0x76b   :  { %3241 = vmatpush1.bf16.msra.mxu0 %v3892_v56  ;;  %3273 = vmatpush1.bf16.msra.mxu1 %v3952_v17 }
 0x76c   :  { %3243 = vmatprep.subr.bf16.mxu0 %v3901_v59  ;;  %3275 = vmatprep.subr.bf16.mxu1 %v3965_v21 }
 0x76f   :  { %3245 = vmatpush1.bf16.msra.mxu0 %v3934_v10  ;;  %3277 = vmatpush1.bf16.msra.mxu1 %v3995_v36 }
 0x770   :  { %3247 = vmatprep.subr.bf16.mxu0 %v3946_v14  ;;  %3279 = vmatprep.subr.bf16.mxu1 %v3999_v39 }
 0x773   :  { %3249 = vmatpush1.bf16.msra.mxu0 %v3983_v30  ;;  %3281 = vmatpush1.bf16.msra.mxu1 %v4019_v48 }
 0x774   :  { %3251 = vmatprep.subr.bf16.mxu0 %v3986_v32  ;;  %3283 = vmatprep.subr.bf16.mxu1 %v4023_v51 }
 0x777   :  { %3253 = vmatpush1.bf16.msra.mxu0 %v4015_v45  ;;  %3285 = vmatpush1.bf16.msra.mxu1 %v4034_v55 }
 0x778   :  { %3287 = vmatprep.subr.bf16.mxu0 %v3740_v3  ;;  %3319 = vmatprep.subr.bf16.mxu1 %v3794_v23  ;;  %v2666_v3 = vld [vmem:[%s4853_s0 + $0x1e0] sm:$0xff]  ;;  %v2667_v23 = vld [vmem:[%s4853_s0 + $0x1e8] sm:$0xff] }
 0x82c   :  { %v1880_v40 = vpop.f32.mrb[28].mxu0  ;;  %v1957_v13 = vpop.f32.mrb[28].mxu1 }
 0x82d   :  { %v1968_v6 = vadd.f32 %v2662_v50, %v1880_v40  ;;  %v1882_v28 = vpop.f32.mrb[29].mxu0  ;;  %v1959_v44 = vpop.f32.mrb[29].mxu1  ;;  %v1970_v35 = vadd.f32 %v2664_v42, %v1957_v13 }
 0x82e   :  { %v1969_v52 = vadd.f32 %v2663_v58, %v1882_v28  ;;  %v1971_v11 = vadd.f32 %v2665_v60, %v1959_v44 }
 0x82f   :  { %v2670_v54 = vmul.f32 -1.442695, %v1968_v6 }
 0x830   :  { %v2672_v62 = vmul.f32 -1.442695, %v1969_v52  ;;  %v1886_v57 = vpop.f32.mrb[30].mxu0  ;;  %v1963_v4 = vpop.f32.mrb[30].mxu1  ;;  %v2674_v22 = vmul.f32 -1.442695, %v1971_v11 }
 0x831   :  { %3586 = vpow2.f32 %v2670_v54  ;;  %v1972_v19 = vadd.f32 %v2666_v3, %v1886_v57  ;;  %v1888_v12 = vpop.f32.mrb[31].mxu0  ;;  %v1965_v61 = vpop.f32.mrb[31].mxu1  ;;  %v1974_v28 = vadd.f32 %v2668_v29, %v1963_v4 }
 0x832   :  { %3588 = vpow2.f32 %v2672_v62  ;;  %v1973_v2 = vadd.f32 %v2667_v23, %v1888_v12  ;;  %v1975_v25 = vadd.f32 %v2669_v41, %v1965_v61 }
 0x833   :  { %v2671_v0 = vmul.f32 -1.442695, %v1972_v19 }
 0x834   :  { %v2673_v24 = vmul.f32 -1.442695, %v1973_v2  ;;  %v2675_v40 = vmul.f32 -1.442695, %v1975_v25  ;;  %v2035_v25 = vpop.permute.xlu0 %2034 }
 0x835   :  { %3590 = vpow2.f32 %v2671_v0 }
 0x836   :  { %3592 = vpow2.f32 %v2673_v24 }
 0x837   :  { %3594 = vpow2.f32 %v2674_v22 }
 0x838   :  { %3596 = vtanh.f32 %v1970_v35 }
 0x83b   :  { %v3587_v37 = vpop.eup %3586 }
 0x83c   :  { %v3589_v50 = vpop.eup %3588  ;;  %v1982_v58 = vadd.f32 1.0, %v3587_v37 }
 0x83d   :  { %v1994_v6 = vadd.f32 1.0, %v3589_v50 }
 0x83e   :  { %3598 = vrcp.f32 %v1982_v58  ;;  %v2040_v58 = vpop.permute.xlu1 %2039 }
 0x83f   :  { %v3591_v44 = vpop.eup %3590  ;;  %3600 = vrcp.f32 %v1994_v6 }
 0x840   :  { %v3593_v52 = vpop.eup %3592  ;;  %v1983_v3 = vadd.f32 1.0, %v3591_v44  ;;  %3602 = vpow2.f32 %v2675_v40 }
 0x841   :  { %3604 = vtanh.f32 %v1974_v28  ;;  %v1995_v13 = vadd.f32 1.0, %v3593_v52  ;;  %v3595_v54 = vpop.eup %3594 }
 0x842   :  { %3606 = vrcp.f32 %v1983_v3  ;;  %v3597_v23 = vpop.eup %3596  ;;  %v2008_v19 = vadd.f32 1.0, %v3595_v54 }
 0x843   :  { %3608 = vrcp.f32 %v1995_v13 }
 0x844   :  { %3610 = vrcp.f32 %v2008_v19 }
 0x848   :  { %v3599_v62 = vpop.eup %3598 }
 0x849   :  { %v3601_v57 = vpop.eup %3600  ;;  %v2016_v60 = vmul.f32 %v3599_v62, %v3597_v23 }
 0x84a   :  { %v3603_v12 = vpop.eup %3602  ;;  %v2014_v61 = vmul.f32 %v3601_v57, %v4630_v16 }
 0x84b   :  { %v3605_v4 = vpop.eup %3604  ;;  %v2009_v41 = vadd.f32 1.0, %v3603_v12 }
 0x84c   :  { %v3607_v2 = vpop.eup %3606  ;;  %v2018_v0 = vadd.f32 %v2016_v60, %v2014_v61 }
 0x84d   :  { %v3609_v11 = vpop.eup %3608  ;;  %v2017_v24 = vmul.f32 %v3607_v2, %v3605_v4 }
 0x84e   :  { %3612 = vtanh.f32 %v2018_v0  ;;  %v2046_v42 = vsub.f32 %v2018_v0, %v4630_v16  ;;  %v2015_v22 = vmul.f32 %v3609_v11, %v4633_v5  ;;  %v3611_v28 = vpop.eup %3610 }
 0x84f   :  { %3614 = vrcp.f32 %v2009_v41 }
 0x850   :  { %v2048_v35 = vmul.f32 %v2046_v42, %v2035_v25  ;;  %v2019_v29 = vadd.f32 %v2017_v24, %v2015_v22 }
 0x852   :  { %3616 = vtanh.f32 %v2019_v29  ;;  %v2047_v37 = vsub.f32 %v2019_v29, %v4633_v5  ;;  %v4712_v50 = vadd.f32 %v2048_v35, %v4630_v16 }
 0x854   :  { %v2049_v40 = vmul.f32 %v2047_v37, %v2040_v58 }
 0x856   :  { %v4715_v6 = vadd.f32 %v2049_v40, %v4633_v5 }
 0x858   :  { %v3613_v44 = vpop.eup %3612 }
 0x859   :  { %v2022_v52 = vmul.f32 %v3613_v44, %v3611_v28  ;;  %v3615_v3 = vpop.eup %3614 }
 0x85b   :  { %v2030_v13 = vsub.f32 %v2022_v52, %v4637_v33 }
 0x85c   :  { %v3617_v54 = vpop.eup %3616 }
 0x85d   :  { %v2042_v23 = vmul.f32 %v2035_v25, %v2030_v13  ;;  %v2023_v62 = vmul.f32 %v3617_v54, %v3615_v3  ;;  %v2282_v54 = vpop.permute.xlu0 %2281 }
 0x85f   :  { %v4719_v57 = vadd.f32 %v2042_v23, %v4637_v33  ;;  %v2031_v16 = vsub.f32 %v2023_v62, %v4645_v20 }
 0x861   :  { %2126 = vmatmul.mubr.f32.vlgmr.msra.gmra.mrb[32].mxu0 %v4719_v57  ;;  %2203 = vmatmul.mubr.f32.vlgmr.msra.gmra.mrb[32].mxu1 %v4719_v57  ;;  %v2043_v5 = vmul.f32 %v2040_v58, %v2031_v16 }
 0x862   :  { %2131 = vmatprep.mubr.f32.mxu0 %v3706_v7  ;;  %2208 = vmatprep.mubr.f32.mxu1 %v3706_v7 }
 0x863   :  { %v4727_v60 = vadd.f32 %v2043_v5, %v4645_v20  ;;  %3289 = vmatpush1.bf16.msra.mxu0 %v3753_v8  ;;  %3321 = vmatpush1.bf16.msra.mxu1 %v3802_v26  ;;  %v2678_v8 = vld [vmem:[%s4853_s0 + $0x200] sm:$0xff] }
 0x864   :  { %3291 = vmatprep.subr.bf16.mxu0 %v3755_v9  ;;  %3323 = vmatprep.subr.bf16.mxu1 %v3827_v34  ;;  %v2679_v9 = vld [vmem:[%s4853_s0 + $0x208] sm:$0xff] }
 0x865   :  { %2132 = vmatmul.mubr.f32.gmra.mrb[34].mxu0 %v4727_v60  ;;  %2209 = vmatmul.mubr.f32.gmra.mrb[34].mxu1 %v4727_v60 }
 0x866   :  { %2372 = vmatprep.mubr.f32.mxu0 %v3706_v7  ;;  %2449 = vmatprep.mubr.f32.mxu1 %v3706_v7 }
 0x867   :  { %3293 = vmatpush1.bf16.msra.mxu0 %v3771_v15  ;;  %3325 = vmatpush1.bf16.msra.mxu1 %v3838_v38  ;;  %v2682_v38 = vld [vmem:[%s4853_s0 + $0x220] sm:$0xff] }
 0x868   :  { %3295 = vmatprep.subr.bf16.mxu0 %v3780_v18  ;;  %3327 = vmatprep.subr.bf16.mxu1 %v3862_v46  ;;  %v2683_v46 = vld [vmem:[%s4853_s0 + $0x228] sm:$0xff] }
 0x86b   :  { %3297 = vmatpush1.bf16.msra.mxu0 %v3805_v27  ;;  %3329 = vmatpush1.bf16.msra.mxu1 %v3871_v49 }
 0x86c   :  { %3299 = vmatprep.subr.bf16.mxu0 %v3818_v31  ;;  %3331 = vmatprep.subr.bf16.mxu1 %v3883_v53 }
 0x86f   :  { %3301 = vmatpush1.bf16.msra.mxu0 %v3854_v43  ;;  %3333 = vmatpush1.bf16.msra.mxu1 %v3913_v63 }
 0x870   :  { %3303 = vmatprep.subr.bf16.mxu0 %v3865_v47  ;;  %3335 = vmatprep.subr.bf16.mxu1 %v3919_v1 }
 0x873   :  { %3305 = vmatpush1.bf16.msra.mxu0 %v3892_v56  ;;  %3337 = vmatpush1.bf16.msra.mxu1 %v3952_v17  ;;  %v2681_v56 = vld [vmem:[%s4853_s0 + $0x218] sm:$0xff] }
 0x874   :  { %3307 = vmatprep.subr.bf16.mxu0 %v3901_v59  ;;  %3339 = vmatprep.subr.bf16.mxu1 %v3965_v21 }
 0x877   :  { %3309 = vmatpush1.bf16.msra.mxu0 %v3934_v10  ;;  %3341 = vmatpush1.bf16.msra.mxu1 %v3995_v36 }
 0x878   :  { %3311 = vmatprep.subr.bf16.mxu0 %v3946_v14  ;;  %3343 = vmatprep.subr.bf16.mxu1 %v3999_v39 }
 0x87b   :  { %3313 = vmatpush1.bf16.msra.mxu0 %v3983_v30  ;;  %3345 = vmatpush1.bf16.msra.mxu1 %v4019_v48  ;;  %v2685_v30 = vld [vmem:[%s4853_s0 + $0x238] sm:$0xff]  ;;  %v2684_v48 = vld [vmem:[%s4853_s0 + $0x230] sm:$0xff] }
 0x87c   :  { %3315 = vmatprep.subr.bf16.mxu0 %v3986_v32  ;;  %3347 = vmatprep.subr.bf16.mxu1 %v4023_v51  ;;  %v2680_v32 = vld [vmem:[%s4853_s0 + $0x210] sm:$0xff] }
 0x87f   :  { %3317 = vmatpush1.bf16.msra.mxu0 %v4015_v45  ;;  %3349 = vmatpush1.bf16.msra.mxu1 %v4034_v55 }
 0x934   :  { %v2127_v15 = vpop.f32.mrb[32].mxu0  ;;  %v2204_v18 = vpop.f32.mrb[32].mxu1 }
 0x935   :  { %v2215_v26 = vadd.f32 %v2678_v8, %v2127_v15  ;;  %v2129_v27 = vpop.f32.mrb[33].mxu0  ;;  %v2206_v31 = vpop.f32.mrb[33].mxu1  ;;  %v2217_v45 = vadd.f32 %v2680_v32, %v2204_v18 }
 0x936   :  { %v2216_v34 = vadd.f32 %v2679_v9, %v2129_v27  ;;  %v2218_v17 = vadd.f32 %v2681_v56, %v2206_v31  ;;  %v2287_v8 = vpop.permute.xlu1 %2286 }
 0x937   :  { %v2686_v43 = vmul.f32 -1.442695, %v2215_v26 }
 0x938   :  { %v2688_v47 = vmul.f32 -1.442695, %v2216_v34  ;;  %v2133_v49 = vpop.f32.mrb[34].mxu0  ;;  %v2210_v53 = vpop.f32.mrb[34].mxu1  ;;  %v2690_v36 = vmul.f32 -1.442695, %v2218_v17 }
 0x939   :  { %3618 = vpow2.f32 %v2686_v43  ;;  %v2219_v59 = vadd.f32 %v2682_v38, %v2133_v49  ;;  %v2135_v63 = vpop.f32.mrb[35].mxu0  ;;  %v2212_v1 = vpop.f32.mrb[35].mxu1  ;;  %v2221_v12 = vadd.f32 %v2684_v48, %v2210_v53  ;;  %v2695_v53 = vld [vmem:[%s4853_s0 + $0x248] sm:$0xff] }
 0x93a   :  { %3620 = vpow2.f32 %v2688_v47  ;;  %v2220_v10 = vadd.f32 %v2683_v46, %v2135_v63  ;;  %v2222_v39 = vadd.f32 %v2685_v30, %v2212_v1  ;;  %v2699_v17 = vld [vmem:[%s4853_s0 + $0x268] sm:$0xff] }
 0x93b   :  { %v2687_v14 = vmul.f32 -1.442695, %v2219_v59 }
 0x93c   :  { %v2689_v21 = vmul.f32 -1.442695, %v2220_v10  ;;  %v2691_v20 = vmul.f32 -1.442695, %v2222_v39 }
 0x93d   :  { %3622 = vpow2.f32 %v2687_v14 }
 0x93e   :  { %3624 = vpow2.f32 %v2689_v21 }
 0x93f   :  { %3626 = vpow2.f32 %v2690_v36  ;;  %v2697_v36 = vld [vmem:[%s4853_s0 + $0x258] sm:$0xff] }
 0x940   :  { %3628 = vtanh.f32 %v2217_v45 }
 0x943   :  { %v3619_v51 = vpop.eup %3618 }
 0x944   :  { %v3621_v55 = vpop.eup %3620  ;;  %v2229_v33 = vadd.f32 1.0, %v3619_v51 }
 0x945   :  { %v2241_v19 = vadd.f32 1.0, %v3621_v55 }
 0x946   :  { %3630 = vrcp.f32 %v2229_v33 }
 0x947   :  { %v3623_v61 = vpop.eup %3622  ;;  %3632 = vrcp.f32 %v2241_v19  ;;  %v2701_v19 = vld [vmem:[%s4853_s0 + $0x278] sm:$0xff] }
 0x948   :  { %v3625_v4 = vpop.eup %3624  ;;  %v2230_v2 = vadd.f32 1.0, %v3623_v61  ;;  %3634 = vpow2.f32 %v2691_v20 }
 0x949   :  { %3636 = vtanh.f32 %v2221_v12  ;;  %v2242_v0 = vadd.f32 1.0, %v3625_v4  ;;  %v3627_v11 = vpop.eup %3626  ;;  %v2696_v12 = vld [vmem:[%s4853_s0 + $0x250] sm:$0xff] }
 0x94a   :  { %3638 = vrcp.f32 %v2230_v2  ;;  %v3629_v24 = vpop.eup %3628  ;;  %v2255_v25 = vadd.f32 1.0, %v3627_v11 }
 0x94b   :  { %3640 = vrcp.f32 %v2242_v0  ;;  %v2700_v0 = vld [vmem:[%s4853_s0 + $0x270] sm:$0xff] }
 0x94c   :  { %3642 = vrcp.f32 %v2255_v25 }
 0x950   :  { %v3631_v41 = vpop.eup %3630 }
 0x951   :  { %v3633_v42 = vpop.eup %3632  ;;  %v2263_v22 = vmul.f32 %v3631_v41, %v3629_v24 }
 0x952   :  { %v3635_v35 = vpop.eup %3634  ;;  %v2261_v29 = vmul.f32 %v3633_v42, %v4712_v50 }
 0x953   :  { %v3637_v37 = vpop.eup %3636  ;;  %v2256_v52 = vadd.f32 1.0, %v3635_v35 }
 0x954   :  { %v3639_v58 = vpop.eup %3638  ;;  %v2265_v40 = vadd.f32 %v2263_v22, %v2261_v29 }
 0x955   :  { %v3641_v28 = vpop.eup %3640  ;;  %v2264_v44 = vmul.f32 %v3639_v58, %v3637_v37 }
 0x956   :  { %3644 = vtanh.f32 %v2265_v40  ;;  %v2293_v3 = vsub.f32 %v2265_v40, %v4712_v50  ;;  %v2262_v13 = vmul.f32 %v3641_v28, %v4715_v6  ;;  %v3643_v18 = vpop.eup %3642 }
 0x957   :  { %3646 = vrcp.f32 %v2256_v52 }
 0x958   :  { %v2266_v23 = vadd.f32 %v2264_v44, %v2262_v13  ;;  %v2295_v62 = vmul.f32 %v2293_v3, %v2282_v54 }
 0x95a   :  { %3648 = vtanh.f32 %v2266_v23  ;;  %v2294_v16 = vsub.f32 %v2266_v23, %v4715_v6  ;;  %v4792_v5 = vadd.f32 %v2295_v62, %v4712_v50 }
 0x95c   :  { %v2296_v9 = vmul.f32 %v2294_v16, %v2287_v8 }
 0x95e   :  { %v4795_v15 = vadd.f32 %v2296_v9, %v4715_v6 }
 0x960   :  { %v3645_v26 = vpop.eup %3644 }
 0x961   :  { %v2269_v27 = vmul.f32 %v3645_v26, %v3643_v18  ;;  %v3647_v31 = vpop.eup %3646 }
 0x963   :  { %v2277_v34 = vsub.f32 %v2269_v27, %v4719_v57 }
 0x964   :  { %v3649_v38 = vpop.eup %3648 }
 0x965   :  { %v2289_v43 = vmul.f32 %v2282_v54, %v2277_v34  ;;  %v2270_v46 = vmul.f32 %v3649_v38, %v3647_v31 }
 0x967   :  { %v4799_v47 = vadd.f32 %v2289_v43, %v4719_v57  ;;  %v2278_v50 = vsub.f32 %v2270_v46, %v4727_v60  ;;  %v2694_v57 = vld [vmem:[%s4853_s0 + $0x240] sm:$0xff]  ;;  %v3359_v43 = vpop.permute.xlu0 %3358 }
 0x969   :  { %2373 = vmatmul.mubr.f32.vlgmr.msra.gmra.mrb[36].mxu0 %v4799_v47  ;;  %2450 = vmatmul.mubr.f32.vlgmr.msra.gmra.mrb[36].mxu1 %v4799_v47  ;;  %v2290_v6 = vmul.f32 %v2287_v8, %v2278_v50 }
 0x96a   :  { %2378 = vmatprep.mubr.f32.mxu0 %v3706_v7  ;;  %2455 = vmatprep.mubr.f32.mxu1 %v3706_v7 }
 0x96b   :  { %v4807_v49 = vadd.f32 %v2290_v6, %v4727_v60  ;;  %v2698_v60 = vld [vmem:[%s4853_s0 + $0x260] sm:$0xff]  ;;  %v3360_v6 = vunpack.i.l.bf16 %v3359_v43  ;;  %s3708_s0 = smov [#allocation2]  }
 0x96c   :  { %s2547_s21 = sshll.u32 %s3708_s0, 4  ;;  %s2548_s21 = int_to_ptr.vmem [resolvable:$true] %s2547_s21 }
 0x96d   :  { %2379 = vmatmul.mubr.f32.gmra.mrb[38].mxu0 %v4807_v49  ;;  %2456 = vmatmul.mubr.f32.gmra.mrb[38].mxu1 %v4807_v49  ;;  %s3682_s22 = scalar_lea.vmem %s2548_s21, 256  ;;  %p3687_p1 = scmp.lt.s32.totalorder %s2548_s21, %s2548_s21 }
 0x96e   :  { %p3683_p0 = scmp.ne.s32.totalorder %s2548_s21, %s3682_s22  ;;  %p3688_p2 = scmp.lt.s32.totalorder %s3682_s22, %s3682_s22 }
 0x970   :  { %p3689_p3 = por %p3688_p2, %p3687_p1 }
 0x972   :  { %p3690_p4 = pnand %p3689_p3, %p3683_p0 }
 0xa3c   :  { %v2374_v56 = vpop.f32.mrb[36].mxu0  ;;  %v2451_v59 = vpop.f32.mrb[36].mxu1 }
 0xa3d   :  { %v2462_v63 = vadd.f32 %v2694_v57, %v2374_v56  ;;  %v2376_v1 = vpop.f32.mrb[37].mxu0  ;;  %v2453_v7 = vpop.f32.mrb[37].mxu1  ;;  %v2464_v2 = vadd.f32 %v2696_v12, %v2451_v59  ;;  %v3361_v59 = vunpack.i.h.bf16 %v3359_v43 }
 0xa3e   :  { %v2463_v10 = vadd.f32 %v2695_v53, %v2376_v1  ;;  %v2465_v33 = vadd.f32 %v2697_v36, %v2453_v7 }
 0xa3f   :  { %v2702_v14 = vmul.f32 -1.442695, %v2462_v63 }
 0xa40   :  { %v2704_v21 = vmul.f32 -1.442695, %v2463_v10  ;;  %v2380_v30 = vpop.f32.mrb[38].mxu0  ;;  %v2457_v32 = vpop.f32.mrb[38].mxu1  ;;  %v2706_v61 = vmul.f32 -1.442695, %v2465_v33 }
 0xa41   :  { %3650 = vpow2.f32 %v2702_v14  ;;  %v2466_v39 = vadd.f32 %v2698_v60, %v2380_v30  ;;  %v2382_v45 = vpop.f32.mrb[39].mxu0  ;;  %v2459_v48 = vpop.f32.mrb[39].mxu1  ;;  %v2468_v25 = vadd.f32 %v2700_v0, %v2457_v32 }
 0xa42   :  { %3652 = vpow2.f32 %v2704_v21  ;;  %v2467_v51 = vadd.f32 %v2699_v17, %v2382_v45  ;;  %v2469_v4 = vadd.f32 %v2701_v19, %v2459_v48 }
 0xa43   :  { %v2703_v55 = vmul.f32 -1.442695, %v2466_v39 }
 0xa44   :  { %v2705_v20 = vmul.f32 -1.442695, %v2467_v51  ;;  %v2707_v42 = vmul.f32 -1.442695, %v2469_v4 }
 0xa45   :  { %3654 = vpow2.f32 %v2703_v55 }
 0xa46   :  { %3656 = vpow2.f32 %v2705_v20 }
 0xa47   :  { %3658 = vpow2.f32 %v2706_v61 }
 0xa48   :  { %3660 = vtanh.f32 %v2464_v2 }
 0xa4b   :  { %v3651_v11 = vpop.eup %3650 }
 0xa4c   :  { %v3653_v24 = vpop.eup %3652  ;;  %v2476_v41 = vadd.f32 1.0, %v3651_v11 }
 0xa4d   :  { %v2488_v22 = vadd.f32 1.0, %v3653_v24 }
 0xa4e   :  { %3662 = vrcp.f32 %v2476_v41 }
 0xa4f   :  { %v3655_v35 = vpop.eup %3654  ;;  %3664 = vrcp.f32 %v2488_v22 }
 0xa50   :  { %v3657_v29 = vpop.eup %3656  ;;  %v2477_v37 = vadd.f32 1.0, %v3655_v35  ;;  %3666 = vpow2.f32 %v2707_v42 }
 0xa51   :  { %3668 = vtanh.f32 %v2468_v25  ;;  %v2489_v58 = vadd.f32 1.0, %v3657_v29  ;;  %v3659_v40 = vpop.eup %3658 }
 0xa52   :  { %3670 = vrcp.f32 %v2477_v37  ;;  %v3661_v28 = vpop.eup %3660  ;;  %v2502_v13 = vadd.f32 1.0, %v3659_v40 }
 0xa53   :  { %3672 = vrcp.f32 %v2489_v58 }
 0xa54   :  { %3674 = vrcp.f32 %v2502_v13 }
 0xa58   :  { %v3663_v44 = vpop.eup %3662 }
 0xa59   :  { %v3665_v52 = vpop.eup %3664  ;;  %v2510_v3 = vmul.f32 %v3663_v44, %v3661_v28 }
 0xa5a   :  { %v3667_v54 = vpop.eup %3666  ;;  %v2508_v23 = vmul.f32 %v3665_v52, %v4792_v5 }
 0xa5b   :  { %v3669_v62 = vpop.eup %3668  ;;  %v2503_v26 = vadd.f32 1.0, %v3667_v54 }
 0xa5c   :  { %v3671_v16 = vpop.eup %3670  ;;  %v2512_v8 = vadd.f32 %v2510_v3, %v2508_v23 }
 0xa5d   :  { %v3673_v9 = vpop.eup %3672  ;;  %v2511_v18 = vmul.f32 %v3671_v16, %v3669_v62 }
 0xa5e   :  { %3676 = vtanh.f32 %v2512_v8  ;;  %v2509_v27 = vmul.f32 %v3673_v9, %v4795_v15  ;;  %v3675_v34 = vpop.eup %3674 }
 0xa5f   :  { %3678 = vrcp.f32 %v2503_v26 }
 0xa60   :  { %v2513_v31 = vadd.f32 %v2511_v18, %v2509_v27 }
 0xa62   :  { %3680 = vtanh.f32 %v2513_v31 }
 0xa68   :  { %v3677_v38 = vpop.eup %3676 }
 0xa69   :  { %v2516_v46 = vmul.f32 %v3677_v38, %v3675_v34  ;;  %v3679_v50 = vpop.eup %3678 }
 0xa6b   :  { %v2524_v5 = vsub.f32 %v2516_v46, %v4799_v47 }
 0xa6c   :  { %v3681_v57 = vpop.eup %3680 }
 0xa6d   :  { %v2517_v53 = vmul.f32 %v3681_v57, %v3679_v50  ;;  %v2536_v56 = vmul.f32 %v3360_v6, %v2524_v5 }
 0xa6f   :  { %v2525_v63 = vsub.f32 %v2517_v53, %v4807_v49  ;;  %v2538_v1 = vadd.f32 %v2536_v56, %v4799_v47 }
 0xa71   :  { %v2537_v15 = vmul.f32 %v3361_v59, %v2525_v63  ;;  %2540 = vst [vmem:[#allocation2] sm:$0xff] %v2538_v1 }
 0xa73   :  { %v2539_v7 = vadd.f32 %v2537_v15, %v4807_v49 }
 0xa75   :  { %2541 = vst [vmem:[#allocation2 + $0x8] sm:$0xff] %v2539_v7 }
 0xa76   :  { %3693 = shalt.err (!%p3690_p4)
}
 0xa77   :  { %s3694_s25 = scalar_lea.hbm %s4856_s3, 256 }
 0xa78   :  { %p3695_p5 = scmp.ne.s32.totalorder %s4856_s3, %s3694_s25  ;;  %p3698_p6 = scmp.lt.u32.totalorder %s3694_s25, %s4856_s3 }
 0xa7a   :  { %p3700_p7 = pnand %p3698_p6, %p3695_p5 }
 0xa7c   :  { %3703 = shalt.err (!%p3700_p7)
}
 0xa7d   :  { %s3709_s30 = smov 128   ;;  %s3710_s4 = smov 8  }
 0xa7e   :  { %2553 = dma.vmem_to_hbm [thread:$0]  %s2548_s21, 256, %s4856_s3, [#allocation3], %s3709_s30, %s3709_s30, %s3710_s4  }
 0xa7f   :  { %3704 = dma.done.wait [#allocation3], 256  }
 0xa80   :  { %3705 = vsyncadd [#allocation3], 4294967040 }
 0xa81   :  { %2557 = vsyncpa [#allocation3], 1 }

</bundles_post_ra>
